<compile_context>
chip_gen: v7x
topology: tpu7x:2x2x1
jax: 0.10.0
libtpu: 0.0.40
codegen_flags: <defaults>
</compile_context>

<pallas_src>
import functools

import jax
import jax.numpy as jnp
from jax.experimental import pallas as pl
from jax.experimental.pallas import tpu as pltpu


def _round_up(n, m):
    return ((n + m - 1) // m) * m


# ----------------------------- Pallas kernel -------------------------------

def _vae_forward_kernel(
    x_ref, eps_ref,
    w1_ref, b1_ref, w2_ref, b2_ref,
    wh_ref, bh_ref,                      # fused [mu | logvar] head
    wd1_ref, bd1_ref, wd2_ref, bd2_ref, wd3_ref, bd3_ref,
    recon_ref, mu_ref, logvar_ref,
):
    lp = mu_ref.shape[-1]                 # padded latent width (multiple of 128)

    # ---- encoder: Linear -> ReLU -> Linear -> ReLU (bf16 MXU, f32 accum) ----
    x = x_ref[...]                        # already bf16 (cast once in wrapper)
    h = jnp.dot(x, w1_ref[...], preferred_element_type=jnp.float32) + b1_ref[...]
    h = jnp.maximum(h, 0.0).astype(jnp.bfloat16)
    h = jnp.dot(h, w2_ref[...], preferred_element_type=jnp.float32) + b2_ref[...]
    h = jnp.maximum(h, 0.0).astype(jnp.bfloat16)

    # ---- fused mu / logvar heads: one lane-dense (hidden, 2*Lp) matmul ----
    heads = jnp.dot(h, wh_ref[...], preferred_element_type=jnp.float32) + bh_ref[...]
    mu = heads[:, :lp]
    logvar = heads[:, lp:]

    # ---- reparameterize: z = mu + eps * exp(0.5 * logvar) ----
    # Padded latent columns: mu=logvar=0 and eps=0 -> z=0; zero wd1 rows keep
    # the decoder result identical to the unpadded computation.
    z = mu + eps_ref[...] * jnp.exp(0.5 * logvar)

    # ---- decoder: Linear -> ReLU -> Linear -> ReLU -> Linear -> Sigmoid ----
    g = jnp.dot(z.astype(jnp.bfloat16), wd1_ref[...],
                preferred_element_type=jnp.float32) + bd1_ref[...]
    g = jnp.maximum(g, 0.0).astype(jnp.bfloat16)
    g = jnp.dot(g, wd2_ref[...], preferred_element_type=jnp.float32) + bd2_ref[...]
    g = jnp.maximum(g, 0.0).astype(jnp.bfloat16)
    logits = jnp.dot(g, wd3_ref[...], preferred_element_type=jnp.float32) + bd3_ref[...]

    recon_ref[...] = jax.nn.sigmoid(logits)
    mu_ref[...] = mu
    logvar_ref[...] = logvar


# ---------------------- one-time weight preparation -------------------------

def prepare_params(params, latent_dim):
    """Pad latent to a 128 multiple, fuse mu/logvar heads, cast weights to bf16.

    Run once outside the jitted forward so the cast/pad cost is not paid per call.
    Biases may be torch-style (fan_out,) or (1, fan_out); both are accepted.
    """
    Lp = _round_up(latent_dim, 128)
    pad_l = Lp - latent_dim

    def row(b):                            # reshape guard for biases
        return jnp.asarray(b, jnp.float32).reshape(1, -1)

    wmu = jnp.pad(params["wmu"], ((0, 0), (0, pad_l)))
    wlv = jnp.pad(params["wlv"], ((0, 0), (0, pad_l)))
    bmu = jnp.pad(row(params["bmu"]), ((0, 0), (0, pad_l)))
    blv = jnp.pad(row(params["blv"]), ((0, 0), (0, pad_l)))
    wh = jnp.concatenate([wmu, wlv], axis=1)            # (H, 2*Lp)
    bh = jnp.concatenate([bmu, blv], axis=1)            # (1, 2*Lp)
    wd1 = jnp.pad(params["wd1"], ((0, pad_l), (0, 0)))  # zero rows for padded z

    bf = lambda w: jnp.asarray(w).astype(jnp.bfloat16)
    # TODO(synk): on v7x, w1/wd3 could additionally be quantized to fp8 for the
    # small-batch (weight-DMA-bound) regime; kept bf16 here for portability.
    return dict(
        w1=bf(params["w1"]), b1=row(params["b1"]),
        w2=bf(params["w2"]), b2=row(params["b2"]),
        wh=bf(wh), bh=bh,
        wd1=bf(wd1), bd1=row(params["bd1"]),
        wd2=bf(params["wd2"]), bd2=row(params["bd2"]),
        wd3=bf(params["wd3"]), bd3=row(params["bd3"]),
    )


# ---------------------- per-generation tiling configuration -----------------

@functools.lru_cache(maxsize=None)
def _tpu_config():
    """Returns (max_batch_tile, vmem_limit_bytes, has_two_tensorcores)."""
    try:
        kind = jax.devices()[0].device_kind.lower()
    except Exception:  # pragma: no cover - defensive
        kind = ""
    big_vmem = ("v5" in kind) or ("v6" in kind)   # 128 MiB VMEM, single TC
    if big_vmem:
        return 512, 100 << 20, False
    # v7x (and unknown chips): 64 MiB physical VMEM, two TensorCores.
    return 256, 48 << 20, True


# ------------------------------ JAX wrapper ---------------------------------

@jax.jit
def vae_defense_forward(x, eps, prep):
    """Forward pass of VAEDefense.

    x    : (B, C, H, W), NCHW (torch convention); bf16 input avoids any cast.
    eps  : (B, latent_dim) float32 standard-normal noise (reparam trick)
    prep : dict from prepare_params()

    Returns (recon [B,C,H,W] f32, mu [B,latent] f32, logvar [B,latent] f32).
    """
    orig_shape = x.shape
    B = orig_shape[0]
    # bf16 activation stream: halves the dominant input DMA inside the kernel.
    # (No-op if the caller already supplies bf16 images.)
    x_flat = x.reshape(B, -1).astype(jnp.bfloat16)
    D = x_flat.shape[1]
    L = eps.shape[1]
    Lp = prep["wd1"].shape[0]             # padded latent (static from shape)
    Hd = prep["w2"].shape[0]

    max_bm, vmem_limit, two_cores = _tpu_config()

    # Batch tiling. Ragged last tile is handled by Pallas (reads padded,
    # writes clipped), so no host-side pad/slice of the (B, D) streams.
    B8 = _round_up(B, 8)
    if two_cores and B8 > 128:
        # Ensure >= 2 grid steps so the "parallel" axis shards across both
        # v7x TensorCores; no-op on single-TC v5e/v6e.
        Bm = min(max_bm, _round_up((B8 + 1) // 2, 8))
    else:
        Bm = min(max_bm, B8)
    grid = (pl.cdiv(B, Bm),)

    # Only the tiny latent dim is padded (64 -> 128 lanes).
    eps_p = jnp.pad(eps.astype(jnp.float32), ((0, 0), (0, Lp - L)))

    weight_args = (
        prep["w1"], prep["b1"], prep["w2"], prep["b2"],
        prep["wh"], prep["bh"],
        prep["wd1"], prep["bd1"], prep["wd2"], prep["bd2"],
        prep["wd3"], prep["bd3"],
    )

    def batch_spec(cols):
        return pl.BlockSpec((Bm, cols), lambda i: (i, 0))

    def resident_spec(arr):
        # Constant index_map: weights/biases stay resident in VMEM across the
        # batch grid (no per-step re-DMA).
        ndim = arr.ndim
        return pl.BlockSpec(arr.shape, lambda i: (0,) * ndim)

    rows = Bm * grid[0]
    flops = 2 * rows * (D * Hd + Hd * Hd + Hd * (2 * Lp)
                        + Lp * Hd + Hd * Hd + Hd * D)
    transcendentals = rows * (Lp + D)                    # exp + sigmoid
    bytes_accessed = (
        sum(int(w.size) * w.dtype.itemsize for w in weight_args)
        + rows * (2 * D + 4 * D + 3 * 4 * Lp)            # bf16 x, f32 recon, eps/mu/logvar
    )

    recon_p, mu_p, logvar_p = pl.pallas_call(
        _vae_forward_kernel,
        grid=grid,
        out_shape=(
            jax.ShapeDtypeStruct((B, D), jnp.float32),
            jax.ShapeDtypeStruct((B, Lp), jnp.float32),
            jax.ShapeDtypeStruct((B, Lp), jnp.float32),
        ),
        in_specs=[batch_spec(D), batch_spec(Lp)]
                 + [resident_spec(w) for w in weight_args],
        out_specs=(batch_spec(D), batch_spec(Lp), batch_spec(Lp)),
        compiler_params=pltpu.CompilerParams(
            dimension_semantics=("parallel",),
            vmem_limit_bytes=vmem_limit,
        ),
        cost_estimate=pl.CostEstimate(
            flops=int(flops),
            transcendentals=int(transcendentals),
            bytes_accessed=int(bytes_accessed),
        ),
    )(x_flat, eps_p, *weight_args)

    recon = recon_p.reshape(orig_shape)
    mu = mu_p[:, :L]
    logvar = logvar_p[:, :L]
    return recon, mu, logvar


# ------------------------- deterministic parameter init ---------------------

def _linear_init(key, fan_in, fan_out):
    # torch.nn.Linear default: U(-1/sqrt(fan_in), 1/sqrt(fan_in)) for W and b.
    kw, kb = jax.random.split(key)
    bound = 1.0 / jnp.sqrt(jnp.float32(fan_in))
    w = jax.random.uniform(kw, (fan_in, fan_out), jnp.float32, -bound, bound)
    b = jax.random.uniform(kb, (1, fan_out), jnp.float32, -bound, bound)
    return w, b


def init_params(key, input_dim, hidden_dim, latent_dim):
    keys = jax.random.split(key, 7)
    w1, b1 = _linear_init(keys[0], input_dim, hidden_dim)
    w2, b2 = _linear_init(keys[1], hidden_dim, hidden_dim)
    wmu, bmu = _linear_init(keys[2], hidden_dim, latent_dim)
    wlv, blv = _linear_init(keys[3], hidden_dim, latent_dim)
    wd1, bd1 = _linear_init(keys[4], latent_dim, hidden_dim)
    wd2, bd2 = _linear_init(keys[5], hidden_dim, hidden_dim)
    wd3, bd3 = _linear_init(keys[6], hidden_dim, input_dim)
    return dict(
        w1=w1, b1=b1, w2=w2, b2=b2,
        wmu=wmu, bmu=bmu, wlv=wlv, blv=blv,
        wd1=wd1, bd1=bd1, wd2=wd2, bd2=bd2, wd3=wd3, bd3=bd3,
    )


# ------------------------------- reference ----------------------------------

def vae_forward_ref(x, eps, params):
    """Pure-f32 JAX reference with original (unfused) parameters."""
    B = x.shape[0]
    xf = x.reshape(B, -1)
    h = jax.nn.relu(xf @ params["w1"] + params["b1"])
    h = jax.nn.relu(h @ params["w2"] + params["b2"])
    mu = h @ params["wmu"] + params["bmu"]
    logvar = h @ params["wlv"] + params["blv"]
    z = mu + eps * jnp.exp(0.5 * logvar)
    g = jax.nn.relu(z @ params["wd1"] + params["bd1"])
    g = jax.nn.relu(g @ params["wd2"] + params["bd2"])
    recon = jax.nn.sigmoid(g @ params["wd3"] + params["bd3"])
    return recon.reshape(x.shape), mu, logvar


# --------------------------------- main --------------------------------------

if __name__ == "__main__":
    B, C, H, W = 2, 3, 32, 32            # module default: input_dim = 3*32*32
    hidden_dim, latent_dim = 256, 64
    input_dim = C * H * W

    key = jax.random.PRNGKey(0)
    k_x, k_eps, k_p = jax.random.split(key, 3)

    x = jax.random.uniform(k_x, (B, C, H, W), jnp.float32)        # image-like input
    eps = jax.random.normal(k_eps, (B, latent_dim), jnp.float32)  # reparam noise
    params = init_params(k_p, input_dim, hidden_dim, latent_dim)
    prep = prepare_params(params, latent_dim)                     # one-time bf16/pad/fuse

    recon, mu, logvar = vae_defense_forward(x, eps, prep)
    jax.block_until_ready((recon, mu, logvar))

    # correctness check against pure-f32 JAX reference (tolerances account for
    # bf16 input/weight rounding; accumulation stays f32 in the kernel)
    recon_r, mu_r, logvar_r = vae_forward_ref(x, eps, params)
    assert recon.shape == x.shape
    assert mu.shape == (B, latent_dim) and logvar.shape == (B, latent_dim)
    assert jnp.allclose(recon, recon_r, atol=2e-2, rtol=2e-2)
    assert jnp.allclose(mu, mu_r, atol=5e-2, rtol=5e-2)
    assert jnp.allclose(logvar, logvar_r, atol=5e-2, rtol=5e-2)

    print("KERNEL_OK")
</pallas_src>

<mosaic_0001>
module attributes {stable_mosaic.version = 11 : i64} {
  func.func @_vae_forward_kernel(%arg0: i32, %arg1: memref<8x3072xbf16, #tpu.memory_space<vmem>>, %arg2: memref<8x128xf32, #tpu.memory_space<vmem>>, %arg3: memref<3072x256xbf16, #tpu.memory_space<vmem>>, %arg4: memref<1x256xf32, #tpu.memory_space<vmem>>, %arg5: memref<256x256xbf16, #tpu.memory_space<vmem>>, %arg6: memref<1x256xf32, #tpu.memory_space<vmem>>, %arg7: memref<256x256xbf16, #tpu.memory_space<vmem>>, %arg8: memref<1x256xf32, #tpu.memory_space<vmem>>, %arg9: memref<128x256xbf16, #tpu.memory_space<vmem>>, %arg10: memref<1x256xf32, #tpu.memory_space<vmem>>, %arg11: memref<256x256xbf16, #tpu.memory_space<vmem>>, %arg12: memref<1x256xf32, #tpu.memory_space<vmem>>, %arg13: memref<256x3072xbf16, #tpu.memory_space<vmem>>, %arg14: memref<1x3072xf32, #tpu.memory_space<vmem>>, %arg15: memref<8x3072xf32, #tpu.memory_space<vmem>>, %arg16: memref<8x128xf32, #tpu.memory_space<vmem>>, %arg17: memref<8x128xf32, #tpu.memory_space<vmem>>) attributes {dimension_semantics = [#tpu.dimension_semantics<parallel>], iteration_bounds = array<i64: 1>, scalar_prefetch = 0 : i64, scratch_operands = 0 : i64, tpu.core_type = #tpu.core_type<tc>, window_params = [{transform_indices = @transform_0, window_bounds = array<i64: 8, 3072>}, {transform_indices = @transform_1, window_bounds = array<i64: 8, 128>}, {pipeline_mode = #tpu.pipeline_mode<synchronous>, transform_indices = @transform_2, window_bounds = array<i64: 3072, 256>}, {pipeline_mode = #tpu.pipeline_mode<synchronous>, transform_indices = @transform_3, window_bounds = array<i64: 1, 256>}, {pipeline_mode = #tpu.pipeline_mode<synchronous>, transform_indices = @transform_4, window_bounds = array<i64: 256, 256>}, {pipeline_mode = #tpu.pipeline_mode<synchronous>, transform_indices = @transform_5, window_bounds = array<i64: 1, 256>}, {pipeline_mode = #tpu.pipeline_mode<synchronous>, transform_indices = @transform_6, window_bounds = array<i64: 256, 256>}, {pipeline_mode = #tpu.pipeline_mode<synchronous>, transform_indices = @transform_7, window_bounds = array<i64: 1, 256>}, {pipeline_mode = #tpu.pipeline_mode<synchronous>, transform_indices = @transform_8, window_bounds = array<i64: 128, 256>}, {pipeline_mode = #tpu.pipeline_mode<synchronous>, transform_indices = @transform_9, window_bounds = array<i64: 1, 256>}, {pipeline_mode = #tpu.pipeline_mode<synchronous>, transform_indices = @transform_10, window_bounds = array<i64: 256, 256>}, {pipeline_mode = #tpu.pipeline_mode<synchronous>, transform_indices = @transform_11, window_bounds = array<i64: 1, 256>}, {pipeline_mode = #tpu.pipeline_mode<synchronous>, transform_indices = @transform_12, window_bounds = array<i64: 256, 3072>}, {pipeline_mode = #tpu.pipeline_mode<synchronous>, transform_indices = @transform_13, window_bounds = array<i64: 1, 3072>}, {transform_indices = @transform_14, window_bounds = array<i64: 8, 3072>}, {transform_indices = @transform_15, window_bounds = array<i64: 8, 128>}, {transform_indices = @transform_16, window_bounds = array<i64: 8, 128>}]} {
    %c0 = arith.constant 0 : index
    %c0_0 = arith.constant 0 : index
    %0 = vector.load %arg1[%c0, %c0_0] : memref<8x3072xbf16, #tpu.memory_space<vmem>>, vector<8x3072xbf16>
    %c0_1 = arith.constant 0 : index
    %c0_2 = arith.constant 0 : index
    %1 = vector.load %arg3[%c0_1, %c0_2] : memref<3072x256xbf16, #tpu.memory_space<vmem>>, vector<3072x256xbf16>
    %cst = arith.constant dense<0.000000e+00> : vector<8x256xf32>
    %2 = tpu.matmul %0, %1, %cst {dimension_numbers = #tpu.dot_dimension_numbers<[1], [0], [0], [1], [0, 0, 1, 1], [], []>} : vector<8x3072xbf16>, vector<3072x256xbf16>, vector<8x256xf32> -> vector<8x256xf32>
    %c0_3 = arith.constant 0 : index
    %c0_4 = arith.constant 0 : index
    %3 = vector.load %arg4[%c0_3, %c0_4] : memref<1x256xf32, #tpu.memory_space<vmem>>, vector<1x256xf32>
    %4 = vector.broadcast %3 : vector<1x256xf32> to vector<8x256xf32>
    %5 = arith.addf %2, %4 : vector<8x256xf32>
    %cst_5 = arith.constant 0.000000e+00 : f32
    %6 = vector.broadcast %cst_5 : f32 to vector<8x256xf32>
    %7 = arith.maximumf %5, %6 : vector<8x256xf32>
    %8 = arith.truncf %7 : vector<8x256xf32> to vector<8x256xbf16>
    %c0_6 = arith.constant 0 : index
    %c0_7 = arith.constant 0 : index
    %9 = vector.load %arg5[%c0_6, %c0_7] : memref<256x256xbf16, #tpu.memory_space<vmem>>, vector<256x256xbf16>
    %cst_8 = arith.constant dense<0.000000e+00> : vector<8x256xf32>
    %10 = tpu.matmul %8, %9, %cst_8 {dimension_numbers = #tpu.dot_dimension_numbers<[1], [0], [0], [1], [0, 0, 1, 1], [], []>} : vector<8x256xbf16>, vector<256x256xbf16>, vector<8x256xf32> -> vector<8x256xf32>
    %c0_9 = arith.constant 0 : index
    %c0_10 = arith.constant 0 : index
    %11 = vector.load %arg6[%c0_9, %c0_10] : memref<1x256xf32, #tpu.memory_space<vmem>>, vector<1x256xf32>
    %12 = vector.broadcast %11 : vector<1x256xf32> to vector<8x256xf32>
    %13 = arith.addf %10, %12 : vector<8x256xf32>
    %cst_11 = arith.constant 0.000000e+00 : f32
    %14 = vector.broadcast %cst_11 : f32 to vector<8x256xf32>
    %15 = arith.maximumf %13, %14 : vector<8x256xf32>
    %16 = arith.truncf %15 : vector<8x256xf32> to vector<8x256xbf16>
    %c0_12 = arith.constant 0 : index
    %c0_13 = arith.constant 0 : index
    %17 = vector.load %arg7[%c0_12, %c0_13] : memref<256x256xbf16, #tpu.memory_space<vmem>>, vector<256x256xbf16>
    %cst_14 = arith.constant dense<0.000000e+00> : vector<8x256xf32>
    %18 = tpu.matmul %16, %17, %cst_14 {dimension_numbers = #tpu.dot_dimension_numbers<[1], [0], [0], [1], [0, 0, 1, 1], [], []>} : vector<8x256xbf16>, vector<256x256xbf16>, vector<8x256xf32> -> vector<8x256xf32>
    %c0_15 = arith.constant 0 : index
    %c0_16 = arith.constant 0 : index
    %19 = vector.load %arg8[%c0_15, %c0_16] : memref<1x256xf32, #tpu.memory_space<vmem>>, vector<1x256xf32>
    %20 = vector.broadcast %19 : vector<1x256xf32> to vector<8x256xf32>
    %21 = arith.addf %18, %20 : vector<8x256xf32>
    %22 = vector.extract_strided_slice %21 {offsets = [0, 0], sizes = [8, 128], strides = [1, 1]} : vector<8x256xf32> to vector<8x128xf32>
    %23 = vector.extract_strided_slice %21 {offsets = [0, 128], sizes = [8, 128], strides = [1, 1]} : vector<8x256xf32> to vector<8x128xf32>
    %c0_17 = arith.constant 0 : index
    %c0_18 = arith.constant 0 : index
    %24 = vector.load %arg2[%c0_17, %c0_18] : memref<8x128xf32, #tpu.memory_space<vmem>>, vector<8x128xf32>
    %cst_19 = arith.constant 5.000000e-01 : f32
    %25 = vector.broadcast %cst_19 : f32 to vector<8x128xf32>
    %26 = arith.mulf %25, %23 : vector<8x128xf32>
    %27 = math.exp %26 : vector<8x128xf32>
    %28 = arith.mulf %24, %27 : vector<8x128xf32>
    %29 = arith.addf %22, %28 : vector<8x128xf32>
    %30 = arith.truncf %29 : vector<8x128xf32> to vector<8x128xbf16>
    %c0_20 = arith.constant 0 : index
    %c0_21 = arith.constant 0 : index
    %31 = vector.load %arg9[%c0_20, %c0_21] : memref<128x256xbf16, #tpu.memory_space<vmem>>, vector<128x256xbf16>
    %cst_22 = arith.constant dense<0.000000e+00> : vector<8x256xf32>
    %32 = tpu.matmul %30, %31, %cst_22 {dimension_numbers = #tpu.dot_dimension_numbers<[1], [0], [0], [1], [0, 0, 1, 1], [], []>} : vector<8x128xbf16>, vector<128x256xbf16>, vector<8x256xf32> -> vector<8x256xf32>
    %c0_23 = arith.constant 0 : index
    %c0_24 = arith.constant 0 : index
    %33 = vector.load %arg10[%c0_23, %c0_24] : memref<1x256xf32, #tpu.memory_space<vmem>>, vector<1x256xf32>
    %34 = vector.broadcast %33 : vector<1x256xf32> to vector<8x256xf32>
    %35 = arith.addf %32, %34 : vector<8x256xf32>
    %cst_25 = arith.constant 0.000000e+00 : f32
    %36 = vector.broadcast %cst_25 : f32 to vector<8x256xf32>
    %37 = arith.maximumf %35, %36 : vector<8x256xf32>
    %38 = arith.truncf %37 : vector<8x256xf32> to vector<8x256xbf16>
    %c0_26 = arith.constant 0 : index
    %c0_27 = arith.constant 0 : index
    %39 = vector.load %arg11[%c0_26, %c0_27] : memref<256x256xbf16, #tpu.memory_space<vmem>>, vector<256x256xbf16>
    %cst_28 = arith.constant dense<0.000000e+00> : vector<8x256xf32>
    %40 = tpu.matmul %38, %39, %cst_28 {dimension_numbers = #tpu.dot_dimension_numbers<[1], [0], [0], [1], [0, 0, 1, 1], [], []>} : vector<8x256xbf16>, vector<256x256xbf16>, vector<8x256xf32> -> vector<8x256xf32>
    %c0_29 = arith.constant 0 : index
    %c0_30 = arith.constant 0 : index
    %41 = vector.load %arg12[%c0_29, %c0_30] : memref<1x256xf32, #tpu.memory_space<vmem>>, vector<1x256xf32>
    %42 = vector.broadcast %41 : vector<1x256xf32> to vector<8x256xf32>
    %43 = arith.addf %40, %42 : vector<8x256xf32>
    %cst_31 = arith.constant 0.000000e+00 : f32
    %44 = vector.broadcast %cst_31 : f32 to vector<8x256xf32>
    %45 = arith.maximumf %43, %44 : vector<8x256xf32>
    %46 = arith.truncf %45 : vector<8x256xf32> to vector<8x256xbf16>
    %c0_32 = arith.constant 0 : index
    %c0_33 = arith.constant 0 : index
    %47 = vector.load %arg13[%c0_32, %c0_33] : memref<256x3072xbf16, #tpu.memory_space<vmem>>, vector<256x3072xbf16>
    %cst_34 = arith.constant dense<0.000000e+00> : vector<8x3072xf32>
    %48 = tpu.matmul %46, %47, %cst_34 {dimension_numbers = #tpu.dot_dimension_numbers<[1], [0], [0], [1], [0, 0, 1, 1], [], []>} : vector<8x256xbf16>, vector<256x3072xbf16>, vector<8x3072xf32> -> vector<8x3072xf32>
    %c0_35 = arith.constant 0 : index
    %c0_36 = arith.constant 0 : index
    %49 = vector.load %arg14[%c0_35, %c0_36] : memref<1x3072xf32, #tpu.memory_space<vmem>>, vector<1x3072xf32>
    %50 = vector.broadcast %49 : vector<1x3072xf32> to vector<8x3072xf32>
    %51 = arith.addf %48, %50 : vector<8x3072xf32>
    %52 = arith.negf %51 : vector<8x3072xf32>
    %53 = math.exp %52 : vector<8x3072xf32>
    %cst_37 = arith.constant 1.000000e+00 : f32
    %54 = vector.broadcast %cst_37 : f32 to vector<8x3072xf32>
    %55 = arith.addf %54, %53 : vector<8x3072xf32>
    %56 = arith.divf %54, %55 : vector<8x3072xf32>
    %c0_38 = arith.constant 0 : index
    %c0_39 = arith.constant 0 : index
    %57 = vector.load %arg15[%c0_38, %c0_39] : memref<8x3072xf32, #tpu.memory_space<vmem>>, vector<8x3072xf32>
    tpu.vector_store %arg15[%c0_38, %c0_39], %56 {strides = array<i32>} : memref<8x3072xf32, #tpu.memory_space<vmem>>, vector<8x3072xf32>,
    %c0_40 = arith.constant 0 : index
    %c0_41 = arith.constant 0 : index
    %58 = vector.load %arg16[%c0_40, %c0_41] : memref<8x128xf32, #tpu.memory_space<vmem>>, vector<8x128xf32>
    tpu.vector_store %arg16[%c0_40, %c0_41], %22 {strides = array<i32>} : memref<8x128xf32, #tpu.memory_space<vmem>>, vector<8x128xf32>,
    %c0_42 = arith.constant 0 : index
    %c0_43 = arith.constant 0 : index
    %59 = vector.load %arg17[%c0_42, %c0_43] : memref<8x128xf32, #tpu.memory_space<vmem>>, vector<8x128xf32>
    tpu.vector_store %arg17[%c0_42, %c0_43], %23 {strides = array<i32>} : memref<8x128xf32, #tpu.memory_space<vmem>>, vector<8x128xf32>,
    return
  }
  func.func @transform_0(%arg0: i32) -> (i32, i32) {
    %c0_i32 = arith.constant 0 : i32
    %c0_i32_0 = arith.constant 0 : i32
    return %arg0, %c0_i32 : i32, i32
  }
  func.func @transform_1(%arg0: i32) -> (i32, i32) {
    %c0_i32 = arith.constant 0 : i32
    %c0_i32_0 = arith.constant 0 : i32
    return %arg0, %c0_i32 : i32, i32
  }
  func.func @transform_2(%arg0: i32) -> (i32, i32) {
    %c0_i32 = arith.constant 0 : i32
    %c0_i32_0 = arith.constant 0 : i32
    %c0_i32_1 = arith.constant 0 : i32
    return %c0_i32, %c0_i32_0 : i32, i32
  }
  func.func @transform_3(%arg0: i32) -> (i32, i32) {
    %c0_i32 = arith.constant 0 : i32
    %c0_i32_0 = arith.constant 0 : i32
    %c0_i32_1 = arith.constant 0 : i32
    return %c0_i32, %c0_i32_0 : i32, i32
  }
  func.func @transform_4(%arg0: i32) -> (i32, i32) {
    %c0_i32 = arith.constant 0 : i32
    %c0_i32_0 = arith.constant 0 : i32
    %c0_i32_1 = arith.constant 0 : i32
    return %c0_i32, %c0_i32_0 : i32, i32
  }
  func.func @transform_5(%arg0: i32) -> (i32, i32) {
    %c0_i32 = arith.constant 0 : i32
    %c0_i32_0 = arith.constant 0 : i32
    %c0_i32_1 = arith.constant 0 : i32
    return %c0_i32, %c0_i32_0 : i32, i32
  }
  func.func @transform_6(%arg0: i32) -> (i32, i32) {
    %c0_i32 = arith.constant 0 : i32
    %c0_i32_0 = arith.constant 0 : i32
    %c0_i32_1 = arith.constant 0 : i32
    return %c0_i32, %c0_i32_0 : i32, i32
  }
  func.func @transform_7(%arg0: i32) -> (i32, i32) {
    %c0_i32 = arith.constant 0 : i32
    %c0_i32_0 = arith.constant 0 : i32
    %c0_i32_1 = arith.constant 0 : i32
    return %c0_i32, %c0_i32_0 : i32, i32
  }
  func.func @transform_8(%arg0: i32) -> (i32, i32) {
    %c0_i32 = arith.constant 0 : i32
    %c0_i32_0 = arith.constant 0 : i32
    %c0_i32_1 = arith.constant 0 : i32
    return %c0_i32, %c0_i32_0 : i32, i32
  }
  func.func @transform_9(%arg0: i32) -> (i32, i32) {
    %c0_i32 = arith.constant 0 : i32
    %c0_i32_0 = arith.constant 0 : i32
    %c0_i32_1 = arith.constant 0 : i32
    return %c0_i32, %c0_i32_0 : i32, i32
  }
  func.func @transform_10(%arg0: i32) -> (i32, i32) {
    %c0_i32 = arith.constant 0 : i32
    %c0_i32_0 = arith.constant 0 : i32
    %c0_i32_1 = arith.constant 0 : i32
    return %c0_i32, %c0_i32_0 : i32, i32
  }
  func.func @transform_11(%arg0: i32) -> (i32, i32) {
    %c0_i32 = arith.constant 0 : i32
    %c0_i32_0 = arith.constant 0 : i32
    %c0_i32_1 = arith.constant 0 : i32
    return %c0_i32, %c0_i32_0 : i32, i32
  }
  func.func @transform_12(%arg0: i32) -> (i32, i32) {
    %c0_i32 = arith.constant 0 : i32
    %c0_i32_0 = arith.constant 0 : i32
    %c0_i32_1 = arith.constant 0 : i32
    return %c0_i32, %c0_i32_0 : i32, i32
  }
  func.func @transform_13(%arg0: i32) -> (i32, i32) {
    %c0_i32 = arith.constant 0 : i32
    %c0_i32_0 = arith.constant 0 : i32
    %c0_i32_1 = arith.constant 0 : i32
    return %c0_i32, %c0_i32_0 : i32, i32
  }
  func.func @transform_14(%arg0: i32) -> (i32, i32) {
    %c0_i32 = arith.constant 0 : i32
    %c0_i32_0 = arith.constant 0 : i32
    return %arg0, %c0_i32 : i32, i32
  }
  func.func @transform_15(%arg0: i32) -> (i32, i32) {
    %c0_i32 = arith.constant 0 : i32
    %c0_i32_0 = arith.constant 0 : i32
    return %arg0, %c0_i32 : i32, i32
  }
  func.func @transform_16(%arg0: i32) -> (i32, i32) {
    %c0_i32 = arith.constant 0 : i32
    %c0_i32_0 = arith.constant 0 : i32
    return %arg0, %c0_i32 : i32, i32
  }
}

</mosaic_0001>

<bundles_post_ra>
// kernel: vae_defense_forward.1
= control target key start
LH: loop header
LB: loop body
LE: loop exit
PB: predicated region body
PF: predicated region fallthrough
CT: control target
= control target key end

     0   :  { %s10452_s0 = inlined_call_operand.vmem [shape: bf16[2,3072], index: 0, kind: input, shape index: {}]   ;;  %s10453_s1 = inlined_call_operand.vmem [shape: f32[2,128], index: 1, kind: input, shape index: {}]   ;;  %s10454_s2 = inlined_call_operand.hbm [shape: bf16[3072,256], index: 2, kind: input, shape index: {}]   ;;  %s10455_s3 = inlined_call_operand.hbm [shape: f32[1,256], index: 3, kind: input, shape index: {}]   ;;  %s10456_s4 = inlined_call_operand.hbm [shape: bf16[256,256], index: 4, kind: input, shape index: {}]   ;;  %s10457_s5 = inlined_call_operand.hbm [shape: f32[1,256], index: 5, kind: input, shape index: {}]   ;;  %s10458_s6 = inlined_call_operand.hbm [shape: bf16[256,256], index: 6, kind: input, shape index: {}]   ;;  %s10459_s7 = inlined_call_operand.hbm [shape: f32[1,256], index: 7, kind: input, shape index: {}]   ;;  %s10460_s8 = inlined_call_operand.hbm [shape: bf16[128,256], index: 8, kind: input, shape index: {}]   ;;  %s10461_s9 = inlined_call_operand.hbm [shape: f32[1,256], index: 9, kind: input, shape index: {}]   ;;  %s10462_s10 = inlined_call_operand.hbm [shape: bf16[256,256], index: 10, kind: input, shape index: {}]   ;;  %s10463_s11 = inlined_call_operand.hbm [shape: f32[1,256], index: 11, kind: input, shape index: {}]   ;;  %s10464_s12 = inlined_call_operand.hbm [shape: bf16[256,3072], index: 12, kind: input, shape index: {}]   ;;  %s10465_s13 = inlined_call_operand.hbm [shape: f32[1,3072], index: 13, kind: input, shape index: {}]   ;;  %s10466_s14 = inlined_call_operand.vmem [shape: f32[2,3072], index: 14, kind: output, shape index: {0}]   ;;  %s10467_s15 = inlined_call_operand.hbm [shape: f32[2,128], index: 15, kind: output, shape index: {1}]   ;;  %s10468_s16 = inlined_call_operand.hbm [shape: f32[2,128], index: 16, kind: output, shape index: {2}]  }
   0x1   :  { %10470 = sst [smem:[#allocation35_spill]] %s10452_s0 }
   0x2   :  { %22 = vsyncpa [#allocation3], 0 }
   0x3   :  { %23 = vsyncpa [#allocation6], 0 }
   0x4   :  { %24 = vsyncpa [#allocation9], 0 }
   0x5   :  { %25 = vsyncpa [#allocation12], 0 }
   0x6   :  { %26 = vsyncpa [#allocation15], 0 }
   0x7   :  { %27 = vsyncpa [#allocation18], 0 }
   0x8   :  { %28 = vsyncpa [#allocation21], 0 }
   0x9   :  { %29 = vsyncpa [#allocation4], 0 }
   0xa   :  { %30 = vsyncpa [#allocation25], 0  ;;  %s9761_s21 = smov [#allocation5]   ;;  %s9762_s23 = smov [#allocation8]  }
   0xb   :  { %s53_s22 = sshll.u32 %s9761_s21, 4  ;;  %s75_s24 = sshll.u32 %s9762_s23, 4  ;;  %s54_s22 = int_to_ptr.vmem [resolvable:$true] %s53_s22  ;;  %s76_s24 = int_to_ptr.vmem [resolvable:$true] %s75_s24 }
   0xc   :  { %s9435_s27 = scalar_lea.hbm %s10455_s3, 32 }
   0xd   :  { %p9436_p0 = scmp.ne.s32.totalorder %s10455_s3, %s9435_s27  ;;  %p9439_p1 = scmp.lt.u32.totalorder %s9435_s27, %s10455_s3 }
   0xf   :  { %p9441_p2 = pnand %p9439_p1, %p9436_p0 }
  0x11   :  { %9444 = shalt.err (!%p9441_p2)
}
  0x12   :  { %s9445_s17 = scalar_lea.vmem %s54_s22, 32  ;;  %p9450_p4 = scmp.lt.s32.totalorder %s54_s22, %s54_s22 }
  0x13   :  { %p9446_p3 = scmp.ne.s32.totalorder %s54_s22, %s9445_s17  ;;  %p9451_p5 = scmp.lt.s32.totalorder %s9445_s17, %s9445_s17 }
  0x15   :  { %p9452_p6 = por %p9451_p5, %p9450_p4 }
  0x17   :  { %p9453_p7 = pnand %p9452_p6, %p9446_p3 }
  0x19   :  { %9456 = shalt.err (!%p9453_p7)
}
  0x1a   :  { %56 = dma.hbm_to_vmem [thread:$0]  %s10455_s3, 32, %s54_s22, [#allocation6]  }
  0x1b   :  { %s9457_s23 = scalar_lea.hbm %s10457_s5, 32 }
  0x1c   :  { %p9458_p8 = scmp.ne.s32.totalorder %s10457_s5, %s9457_s23  ;;  %p9461_p9 = scmp.lt.u32.totalorder %s9457_s23, %s10457_s5 }
  0x1e   :  { %p9463_p10 = pnand %p9461_p9, %p9458_p8 }
  0x20   :  { %9466 = shalt.err (!%p9463_p10)
}
  0x21   :  { %s9467_s29 = scalar_lea.vmem %s76_s24, 32  ;;  %p9472_p12 = scmp.lt.s32.totalorder %s76_s24, %s76_s24 }
  0x22   :  { %p9468_p11 = scmp.ne.s32.totalorder %s76_s24, %s9467_s29  ;;  %p9473_p13 = scmp.lt.s32.totalorder %s9467_s29, %s9467_s29 }
  0x24   :  { %p9474_p0 = por %p9473_p13, %p9472_p12 }
  0x26   :  { %p9475_p1 = pnand %p9474_p0, %p9468_p11 }
  0x28   :  { %9478 = shalt.err (!%p9475_p1)
}
  0x29   :  { %78 = dma.hbm_to_vmem [thread:$0]  %s10457_s5, 32, %s76_s24, [#allocation9]  }
  0x2a   :  { %s9763_s30 = smov [#allocation11]   ;;  %s9764_s17 = smov [#allocation14]  }
  0x2b   :  { %s97_s0 = sshll.u32 %s9763_s30, 4  ;;  %s119_s18 = sshll.u32 %s9764_s17, 4  ;;  %s98_s0 = int_to_ptr.vmem [resolvable:$true] %s97_s0  ;;  %s120_s18 = int_to_ptr.vmem [resolvable:$true] %s119_s18 }
  0x2c   :  { %s9479_s21 = scalar_lea.hbm %s10459_s7, 32 }
  0x2d   :  { %p9480_p2 = scmp.ne.s32.totalorder %s10459_s7, %s9479_s21  ;;  %p9483_p3 = scmp.lt.u32.totalorder %s9479_s21, %s10459_s7 }
  0x2f   :  { %p9485_p4 = pnand %p9483_p3, %p9480_p2 }
  0x31   :  { %9488 = shalt.err (!%p9485_p4)
}
  0x32   :  { %s9489_s5 = scalar_lea.vmem %s98_s0, 32  ;;  %p9494_p6 = scmp.lt.s32.totalorder %s98_s0, %s98_s0 }
  0x33   :  { %p9490_p5 = scmp.ne.s32.totalorder %s98_s0, %s9489_s5  ;;  %p9495_p7 = scmp.lt.s32.totalorder %s9489_s5, %s9489_s5 }
  0x35   :  { %p9496_p8 = por %p9495_p7, %p9494_p6 }
  0x37   :  { %p9497_p9 = pnand %p9496_p8, %p9490_p5 }
  0x39   :  { %9500 = shalt.err (!%p9497_p9)
}
  0x3a   :  { %100 = dma.hbm_to_vmem [thread:$0]  %s10459_s7, 32, %s98_s0, [#allocation12]  }
  0x3b   :  { %s9501_s22 = scalar_lea.hbm %s10461_s9, 32 }
  0x3c   :  { %p9502_p10 = scmp.ne.s32.totalorder %s10461_s9, %s9501_s22  ;;  %p9505_p11 = scmp.lt.u32.totalorder %s9501_s22, %s10461_s9 }
  0x3e   :  { %p9507_p12 = pnand %p9505_p11, %p9502_p10 }
  0x40   :  { %9510 = shalt.err (!%p9507_p12)
}
  0x41   :  { %s9511_s21 = scalar_lea.vmem %s120_s18, 32  ;;  %p9516_p0 = scmp.lt.s32.totalorder %s120_s18, %s120_s18 }
  0x42   :  { %p9512_p13 = scmp.ne.s32.totalorder %s120_s18, %s9511_s21  ;;  %p9517_p1 = scmp.lt.s32.totalorder %s9511_s21, %s9511_s21 }
  0x44   :  { %p9518_p2 = por %p9517_p1, %p9516_p0 }
  0x46   :  { %p9519_p3 = pnand %p9518_p2, %p9512_p13 }
  0x48   :  { %9522 = shalt.err (!%p9519_p3)
}
  0x49   :  { %122 = dma.hbm_to_vmem [thread:$0]  %s10461_s9, 32, %s120_s18, [#allocation15]  }
  0x4a   :  { %s9765_s23 = smov [#allocation17]   ;;  %s9766_s26 = smov [#allocation2]  }
  0x4b   :  { %s141_s25 = sshll.u32 %s9765_s23, 4  ;;  %s40_s27 = sshll.u32 %s9766_s26, 4  ;;  %s142_s25 = int_to_ptr.vmem [resolvable:$true] %s141_s25  ;;  %s9917_s27 = int_to_ptr.vmem [resolvable:$true] %s40_s27 }
  0x4c   :  { %s9523_s28 = scalar_lea.hbm %s10463_s11, 32 }
  0x4d   :  { %p9524_p4 = scmp.ne.s32.totalorder %s10463_s11, %s9523_s28  ;;  %p9527_p5 = scmp.lt.u32.totalorder %s9523_s28, %s10463_s11 }
  0x4f   :  { %p9529_p6 = pnand %p9527_p5, %p9524_p4 }
  0x51   :  { %9532 = shalt.err (!%p9529_p6)
}
  0x52   :  { %s9533_s9 = scalar_lea.vmem %s142_s25, 32  ;;  %p9538_p8 = scmp.lt.s32.totalorder %s142_s25, %s142_s25 }
  0x53   :  { %p9534_p7 = scmp.ne.s32.totalorder %s142_s25, %s9533_s9  ;;  %p9539_p9 = scmp.lt.s32.totalorder %s9533_s9, %s9533_s9 }
  0x55   :  { %p9540_p10 = por %p9539_p9, %p9538_p8 }
  0x57   :  { %p9541_p11 = pnand %p9540_p10, %p9534_p7 }
  0x59   :  { %9544 = shalt.err (!%p9541_p11)
}
  0x5a   :  { %144 = dma.hbm_to_vmem [thread:$0]  %s10463_s11, 32, %s142_s25, [#allocation18]  }
  0x5b   :  { %s9545_s21 = scalar_lea.hbm %s10454_s2, 49152 }
  0x5c   :  { %p9546_p12 = scmp.ne.s32.totalorder %s10454_s2, %s9545_s21  ;;  %p9549_p13 = scmp.lt.u32.totalorder %s9545_s21, %s10454_s2 }
  0x5e   :  { %p9551_p0 = pnand %p9549_p13, %p9546_p12 }
  0x60   :  { %9554 = shalt.err (!%p9551_p0)
}
  0x61   :  { %s9555_s5 = scalar_lea.vmem %s9917_s27, 49152  ;;  %p9560_p2 = scmp.lt.s32.totalorder %s9917_s27, %s9917_s27 }
  0x62   :  { %p9556_p1 = scmp.ne.s32.totalorder %s9917_s27, %s9555_s5  ;;  %p9561_p3 = scmp.lt.s32.totalorder %s9555_s5, %s9555_s5 }
  0x64   :  { %p9562_p4 = por %p9561_p3, %p9560_p2 }
  0x66   :  { %p9563_p5 = pnand %p9562_p4, %p9556_p1 }
  0x68   :  { %9566 = shalt.err (!%p9563_p5)
}
  0x69   :  { %s9767_s11 = smov 128   ;;  %s9768_s25 = smov 8  }
  0x6a   :  { %46 = dma.hbm_to_vmem [thread:$0]  %s10454_s2, 49152, %s9917_s27, [#allocation3], %s9767_s11, %s9767_s11, %s9768_s25  }
  0x6b   :  { %s9769_s29 = smov [#allocation7]   ;;  %s9770_s22 = smov [#allocation10]  }
  0x6c   :  { %s62_s3 = sshll.u32 %s9769_s29, 4  ;;  %s84_s30 = sshll.u32 %s9770_s22, 4  ;;  %s63_s3 = int_to_ptr.vmem [resolvable:$true] %s62_s3  ;;  %s9951_s30 = int_to_ptr.vmem [resolvable:$true] %s84_s30 }
  0x6d   :  { %s9567_s17 = scalar_lea.hbm %s10456_s4, 4096 }
  0x6e   :  { %p9568_p6 = scmp.ne.s32.totalorder %s10456_s4, %s9567_s17  ;;  %p9571_p7 = scmp.lt.u32.totalorder %s9567_s17, %s10456_s4 }
  0x70   :  { %p9573_p8 = pnand %p9571_p7, %p9568_p6 }
  0x72   :  { %9576 = shalt.err (!%p9573_p8)
}
  0x73   :  { %s9577_s2 = scalar_lea.vmem %s63_s3, 4096  ;;  %p9582_p10 = scmp.lt.s32.totalorder %s63_s3, %s63_s3 }
  0x74   :  { %p9578_p9 = scmp.ne.s32.totalorder %s63_s3, %s9577_s2  ;;  %p9583_p11 = scmp.lt.s32.totalorder %s9577_s2, %s9577_s2 }
  0x76   :  { %p9584_p12 = por %p9583_p11, %p9582_p10 }
  0x78   :  { %p9585_p13 = pnand %p9584_p12, %p9578_p9 }
  0x7a   :  { %9588 = shalt.err (!%p9585_p13)
}
  0x7b   :  { %68 = dma.hbm_to_vmem [thread:$0]  %s10456_s4, 4096, %s63_s3, [#allocation6], %s9767_s11, %s9767_s11, %s9768_s25  }
  0x7c   :  { %s9589_s5 = scalar_lea.hbm %s10458_s6, 4096 }
  0x7d   :  { %p9590_p0 = scmp.ne.s32.totalorder %s10458_s6, %s9589_s5  ;;  %p9593_p1 = scmp.lt.u32.totalorder %s9589_s5, %s10458_s6 }
  0x7f   :  { %p9595_p2 = pnand %p9593_p1, %p9590_p0 }
  0x81   :  { %9598 = shalt.err (!%p9595_p2)
}
  0x82   :  { %s9599_s9 = scalar_lea.vmem %s9951_s30, 4096  ;;  %p9604_p4 = scmp.lt.s32.totalorder %s9951_s30, %s9951_s30 }
  0x83   :  { %p9600_p3 = scmp.ne.s32.totalorder %s9951_s30, %s9599_s9  ;;  %p9605_p5 = scmp.lt.s32.totalorder %s9599_s9, %s9599_s9 }
  0x85   :  { %p9606_p6 = por %p9605_p5, %p9604_p4 }
  0x87   :  { %p9607_p7 = pnand %p9606_p6, %p9600_p3 }
  0x89   :  { %9610 = shalt.err (!%p9607_p7)
}
  0x8a   :  { %90 = dma.hbm_to_vmem [thread:$0]  %s10458_s6, 4096, %s9951_s30, [#allocation9], %s9767_s11, %s9767_s11, %s9768_s25  }
  0x8b   :  { %s9771_s18 = smov [#allocation13]   ;;  %s9772_s19 = smov [#allocation16]  }
  0x8c   :  { %s106_s17 = sshll.u32 %s9771_s18, 4  ;;  %s128_s20 = sshll.u32 %s9772_s19, 4  ;;  %s107_s17 = int_to_ptr.vmem [resolvable:$true] %s106_s17  ;;  %s9988_s20 = int_to_ptr.vmem [resolvable:$true] %s128_s20 }
  0x8d   :  { %s9611_s2 = scalar_lea.hbm %s10460_s8, 2048 }
  0x8e   :  { %p9612_p8 = scmp.ne.s32.totalorder %s10460_s8, %s9611_s2  ;;  %p9615_p9 = scmp.lt.u32.totalorder %s9611_s2, %s10460_s8 }
  0x90   :  { %p9617_p10 = pnand %p9615_p9, %p9612_p8 }
  0x92   :  { %9620 = shalt.err (!%p9617_p10)
}
  0x93   :  { %s9621_s6 = scalar_lea.vmem %s107_s17, 2048  ;;  %p9626_p12 = scmp.lt.s32.totalorder %s107_s17, %s107_s17 }
  0x94   :  { %p9622_p11 = scmp.ne.s32.totalorder %s107_s17, %s9621_s6  ;;  %p9627_p13 = scmp.lt.s32.totalorder %s9621_s6, %s9621_s6 }
  0x96   :  { %p9628_p0 = por %p9627_p13, %p9626_p12 }
  0x98   :  { %p9629_p1 = pnand %p9628_p0, %p9622_p11 }
  0x9a   :  { %9632 = shalt.err (!%p9629_p1)
}
  0x9b   :  { %112 = dma.hbm_to_vmem [thread:$0]  %s10460_s8, 2048, %s107_s17, [#allocation12], %s9767_s11, %s9767_s11, %s9768_s25  }
  0x9c   :  { %s9633_s29 = scalar_lea.hbm %s10462_s10, 4096 }
  0x9d   :  { %p9634_p2 = scmp.ne.s32.totalorder %s10462_s10, %s9633_s29  ;;  %p9637_p3 = scmp.lt.u32.totalorder %s9633_s29, %s10462_s10 }
  0x9f   :  { %p9639_p4 = pnand %p9637_p3, %p9634_p2 }
  0xa1   :  { %9642 = shalt.err (!%p9639_p4)
}
  0xa2   :  { %s9643_s18 = scalar_lea.vmem %s9988_s20, 4096  ;;  %p9648_p6 = scmp.lt.s32.totalorder %s9988_s20, %s9988_s20 }
  0xa3   :  { %p9644_p5 = scmp.ne.s32.totalorder %s9988_s20, %s9643_s18  ;;  %p9649_p7 = scmp.lt.s32.totalorder %s9643_s18, %s9643_s18 }
  0xa5   :  { %p9650_p8 = por %p9649_p7, %p9648_p6 }
  0xa7   :  { %p9651_p9 = pnand %p9650_p8, %p9644_p5 }
  0xa9   :  { %9654 = shalt.err (!%p9651_p9)
}
  0xaa   :  { %134 = dma.hbm_to_vmem [thread:$0]  %s10462_s10, 4096, %s9988_s20, [#allocation15], %s9767_s11, %s9767_s11, %s9768_s25  }
  0xab   :  { %s9773_s19 = smov [#allocation19]   ;;  %s9655_s27 = scalar_lea.hbm %s10464_s12, 49152 }
  0xac   :  { %s150_s21 = sshll.u32 %s9773_s19, 4  ;;  %p9656_p10 = scmp.ne.s32.totalorder %s10464_s12, %s9655_s27  ;;  %s151_s21 = int_to_ptr.vmem [resolvable:$true] %s150_s21 }
  0xad   :  { %p9659_p11 = scmp.lt.u32.totalorder %s9655_s27, %s10464_s12 }
  0xaf   :  { %p9661_p12 = pnand %p9659_p11, %p9656_p10 }
  0xb1   :  { %9664 = shalt.err (!%p9661_p12)
}
  0xb2   :  { %s9665_s30 = scalar_lea.vmem %s151_s21, 49152  ;;  %p9670_p0 = scmp.lt.s32.totalorder %s151_s21, %s151_s21 }
  0xb3   :  { %p9666_p13 = scmp.ne.s32.totalorder %s151_s21, %s9665_s30  ;;  %p9671_p1 = scmp.lt.s32.totalorder %s9665_s30, %s9665_s30 }
  0xb5   :  { %p9672_p2 = por %p9671_p1, %p9670_p0 }
  0xb7   :  { %p9673_p3 = pnand %p9672_p2, %p9666_p13 }
  0xb9   :  { %9676 = shalt.err (!%p9673_p3)
}
  0xba   :  { %s9774_s10 = smov 1536   ;;  %s9775_s11 = smov 96  }
  0xbb   :  { %156 = dma.hbm_to_vmem [thread:$0]  %s10464_s12, 49152, %s151_s21, [#allocation18], %s9774_s10, %s9774_s10, %s9775_s11  }
  0xbc   :  { %s9776_s5 = smov [#allocation20]   ;;  %s9677_s22 = scalar_lea.hbm %s10465_s13, 384 }
  0xbd   :  { %s163_s24 = sshll.u32 %s9776_s5, 4  ;;  %p9678_p4 = scmp.ne.s32.totalorder %s10465_s13, %s9677_s22  ;;  %s164_s24 = int_to_ptr.vmem [resolvable:$true] %s163_s24 }
  0xbe   :  { %p9681_p5 = scmp.lt.u32.totalorder %s9677_s22, %s10465_s13 }
  0xc0   :  { %p9683_p6 = pnand %p9681_p5, %p9678_p4 }
  0xc2   :  { %9686 = shalt.err (!%p9683_p6)
}
  0xc3   :  { %s9687_s8 = scalar_lea.vmem %s164_s24, 384  ;;  %p9692_p8 = scmp.lt.s32.totalorder %s164_s24, %s164_s24 }
  0xc4   :  { %p9688_p7 = scmp.ne.s32.totalorder %s164_s24, %s9687_s8  ;;  %p9693_p9 = scmp.lt.s32.totalorder %s9687_s8, %s9687_s8 }
  0xc6   :  { %p9694_p10 = por %p9693_p9, %p9692_p8 }
  0xc8   :  { %p9695_p11 = pnand %p9694_p10, %p9688_p7 }
  0xca   :  { %9698 = shalt.err (!%p9695_p11)
}
  0xcb   :  { %166 = dma.hbm_to_vmem [thread:$0]  %s10465_s13, 384, %s164_s24, [#allocation21]  }
  0xcc   :  { %9743 = dma.done.wait [#allocation3], 49152  }
  0xcd   :  { %9744 = vsyncadd [#allocation3], 4294918144 }
  0xce   :  { %9745 = dma.done.wait [#allocation6], 4128  }
  0xcf   :  { %9746 = vsyncadd [#allocation6], 4294963168 }
  0xd0   :  { %9747 = dma.done.wait [#allocation9], 4128  }
  0xd1   :  { %9748 = vsyncadd [#allocation9], 4294963168 }
  0xd2   :  { %9749 = dma.done.wait [#allocation12], 2080  }
  0xd3   :  { %9750 = vsyncadd [#allocation12], 4294965216 }
  0xd4   :  { %9751 = dma.done.wait [#allocation15], 4128  }
  0xd5   :  { %9752 = vsyncadd [#allocation15], 4294963168 }
  0xd6   :  { %9753 = dma.done.wait [#allocation18], 49184  }
  0xd7   :  { %9754 = vsyncadd [#allocation18], 4294918112 }
  0xd8   :  { %9755 = dma.done.wait [#allocation21], 384  }
  0xd9   :  { %9756 = vsyncadd [#allocation21], 4294966912  ;;  %v8574_v0 = vld [vmem:[#allocation2 + $0x4] ss:$8 sps:$4 sm:$0xff]   ;;  %v8576_v1 = vld [vmem:[#allocation2] ss:$8 sps:$4 sm:$0xff]   ;;  %v602_v9 = vlaneseq }
  0xda   :  { %2772 = vmatprep.subr.bf16.mxu0 %v8574_v0  ;;  %v8577_v2 = vld [vmem:[#allocation2 + $0x14] ss:$8 sps:$4 sm:$0xff]   ;;  %v8579_v3 = vld [vmem:[#allocation2 + $0x10] ss:$8 sps:$4 sm:$0xff]   ;;  %v8580_v4 = vld [vmem:[#allocation2 + $0x24] ss:$8 sps:$4 sm:$0xff]  }
  0xdb   :  { %2773 = vmatpush1.bf16.msra.mxu0 %v8576_v1  ;;  %v8582_v5 = vld [vmem:[#allocation2 + $0x20] ss:$8 sps:$4 sm:$0xff]   ;;  %v8583_v6 = vld [vmem:[#allocation2 + $0x34] ss:$8 sps:$4 sm:$0xff]   ;;  %v8585_v7 = vld [vmem:[#allocation2 + $0x30] ss:$8 sps:$4 sm:$0xff]  }
  0xdc   :  { %2774 = vmatprep.subr.bf16.mxu0 %v8577_v2  ;;  %v8586_v8 = vld [vmem:[#allocation2 + $0x44] ss:$8 sps:$4 sm:$0xff]   ;;  %v9777_v10 = vmov 1966171168   ;;  %v8588_v12 = vld [vmem:[#allocation2 + $0x40] ss:$8 sps:$4 sm:$0xff]  }
  0xdd   :  { %v629_v11 = vunpack.c.l.s4 %v9777_v10  ;;  %v8589_v13 = vld [vmem:[#allocation2 + $0x54] ss:$8 sps:$4 sm:$0xff]   ;;  %v10049_v14 = vshrl.u32 %v602_v9, 7  ;;  %v8591_v16 = vld [vmem:[#allocation2 + $0x50] ss:$8 sps:$4 sm:$0xff]   ;;  %s10471_s21 = sld [smem:[#allocation35_spill]] }
  0xde   :  { %v8592_v17 = vld [vmem:[#allocation2 + $0x64] ss:$8 sps:$4 sm:$0xff]   ;;  %v8594_v20 = vld [vmem:[#allocation2 + $0x60] ss:$8 sps:$4 sm:$0xff]   ;;  %v8595_v22 = vld [vmem:[#allocation2 + $0x74] ss:$8 sps:$4 sm:$0xff]  }
  0xdf   :  { %2775 = vmatpush1.bf16.msra.mxu0 %v8579_v3  ;;  %v630_v15 = vunpack.c.0.s8 %v629_v11  ;;  %v8597_v25 = vld [vmem:[#allocation2 + $0x70] ss:$8 sps:$4 sm:$0xff]   ;;  %v8598_v27 = vld [vmem:[#allocation2 + $0x84] ss:$8 sps:$4 sm:$0xff]   ;;  %v8600_v29 = vld [vmem:[#allocation2 + $0x80] ss:$8 sps:$4 sm:$0xff]  }
  0xe0   :  { %2776 = vmatprep.subr.bf16.mxu0 %v8580_v4  ;;  %v8601_v30 = vld [vmem:[#allocation2 + $0x94] ss:$8 sps:$4 sm:$0xff]   ;;  %v8603_v31 = vld [vmem:[#allocation2 + $0x90] ss:$8 sps:$4 sm:$0xff]   ;;  %v8604_v32 = vld [vmem:[#allocation2 + $0xa4] ss:$8 sps:$4 sm:$0xff]  }
  0xe1   :  { %v10052_v18 = vsub.s32 %v630_v15, %v10049_v14  ;;  %v8606_v33 = vld [vmem:[#allocation2 + $0xa0] ss:$8 sps:$4 sm:$0xff]   ;;  %v8607_v34 = vld [vmem:[#allocation2 + $0xb4] ss:$8 sps:$4 sm:$0xff]   ;;  %v8609_v35 = vld [vmem:[#allocation2 + $0xb0] ss:$8 sps:$4 sm:$0xff]  }
  0xe2   :  { %v8610_v36 = vld [vmem:[#allocation2 + $0xc4] ss:$8 sps:$4 sm:$0xff]   ;;  %v8612_v37 = vld [vmem:[#allocation2 + $0xc0] ss:$8 sps:$4 sm:$0xff]   ;;  %v8613_v38 = vld [vmem:[#allocation2 + $0xd4] ss:$8 sps:$4 sm:$0xff]  }
  0xe3   :  { %2777 = vmatpush1.bf16.msra.mxu0 %v8582_v5  ;;  %v8622_v19 = vld [vmem:[%s10471_s21] ss:$24 sps:$4 sm:$0xff]   ;;  %v8625_v21 = vld [vmem:[%s10471_s21 + $0x30] ss:$24 sps:$4 sm:$0xff]   ;;  %v8616_v40 = vld [vmem:[#allocation2 + $0xe4] ss:$8 sps:$4 sm:$0xff]  }
  0xe4   :  { %2778 = vmatprep.subr.bf16.mxu0 %v8583_v6  ;;  %v634_v23 = vrot.slane %v8622_v19, %v10052_v18  ;;  %v648_v24 = vrot.slane %v8625_v21, %v10052_v18  ;;  %v8615_v39 = vld [vmem:[#allocation2 + $0xd0] ss:$8 sps:$4 sm:$0xff]   ;;  %v8618_v41 = vld [vmem:[#allocation2 + $0xe0] ss:$8 sps:$4 sm:$0xff]   ;;  %v8619_v42 = vld [vmem:[#allocation2 + $0xf4] ss:$8 sps:$4 sm:$0xff]  }
  0xe5   :  { %v8624_v43 = vld [vmem:[%s10471_s21 + $0x4] ss:$24 sps:$4 sm:$0xff]   ;;  %v8627_v44 = vld [vmem:[%s10471_s21 + $0x34] ss:$24 sps:$4 sm:$0xff]   ;;  %v8621_v46 = vld [vmem:[#allocation2 + $0xf0] ss:$8 sps:$4 sm:$0xff]  }
  0xe6   :  { %v657_v26 = vcombine.high %v634_v23, %v648_v24  ;;  %v656_v45 = vcombine.low %v634_v23, %v648_v24  ;;  %v8630_v47 = vld [vmem:[#allocation2 + $0x104] ss:$8 sps:$4 sm:$0xff]   ;;  %v10070_v48 = vrot.slane %v8624_v43, %v10052_v18  ;;  %v10073_v49 = vrot.slane %v8627_v44, %v10052_v18  ;;  %v8628_v52 = vld [vmem:[#allocation2 + $0x100] ss:$8 sps:$4 sm:$0xff]   ;;  %v8633_v54 = vld [vmem:[#allocation2 + $0x114] ss:$8 sps:$4 sm:$0xff]  }
  0xe7   :  { %2779 = vmatpush1.bf16.msra.mxu0 %v8585_v7  ;;  %v8631_v55 = vld [vmem:[#allocation2 + $0x110] ss:$8 sps:$4 sm:$0xff]   ;;  %v8636_v56 = vld [vmem:[#allocation2 + $0x124] ss:$8 sps:$4 sm:$0xff]   ;;  %v8634_v57 = vld [vmem:[#allocation2 + $0x120] ss:$8 sps:$4 sm:$0xff]  }
  0xe8   :  { %2780 = vmatprep.subr.bf16.mxu0 %v8586_v8  ;;  %v680_v28 = vrot.slane %v657_v26, %v10052_v18  ;;  %v10076_v50 = vrot.slane %v656_v45, %v10052_v18  ;;  %v658_v53 = vcombine.low %v10070_v48, %v10073_v49  ;;  %v8639_v58 = vld [vmem:[#allocation2 + $0x134] ss:$8 sps:$4 sm:$0xff]   ;;  %v8637_v59 = vld [vmem:[#allocation2 + $0x130] ss:$8 sps:$4 sm:$0xff]   ;;  %v8642_v60 = vld [vmem:[#allocation2 + $0x144] ss:$8 sps:$4 sm:$0xff]   ;;  %v659_v23 = vcombine.high %v10070_v48, %v10073_v49 }
  0xe9   :  { %v8640_v61 = vld [vmem:[#allocation2 + $0x140] ss:$8 sps:$4 sm:$0xff]   ;;  %v8645_v62 = vld [vmem:[#allocation2 + $0x154] ss:$8 sps:$4 sm:$0xff]   ;;  %v8643_v63 = vld [vmem:[#allocation2 + $0x150] ss:$8 sps:$4 sm:$0xff]  }
  0xea   :  { %2804 = vmatprep.mubr.bf16.mxu0 %v680_v28  ;;  %v690_v51 = vcombine.high %v680_v28, %v680_v28  ;;  %v8648_v0 = vld [vmem:[#allocation2 + $0x164] ss:$8 sps:$4 sm:$0xff]   ;;  %v8646_v1 = vld [vmem:[#allocation2 + $0x160] ss:$8 sps:$4 sm:$0xff]   ;;  %v8651_v2 = vld [vmem:[#allocation2 + $0x174] ss:$8 sps:$4 sm:$0xff]   ;;  %v688_v24 = vcombine.high %v10076_v50, %v10076_v50 }
  0xeb   :  { %2781 = vmatpush1.bf16.msra.mxu0 %v8588_v12  ;;  %v8649_v3 = vld [vmem:[#allocation2 + $0x170] ss:$8 sps:$4 sm:$0xff]   ;;  %v8654_v4 = vld [vmem:[#allocation2 + $0x184] ss:$8 sps:$4 sm:$0xff]   ;;  %v8652_v5 = vld [vmem:[#allocation2 + $0x180] ss:$8 sps:$4 sm:$0xff]  }
  0xec   :  { %2782 = vmatprep.subr.bf16.mxu0 %v8589_v13  ;;  %v8657_v6 = vld [vmem:[#allocation2 + $0x194] ss:$8 sps:$4 sm:$0xff]   ;;  %v8655_v7 = vld [vmem:[#allocation2 + $0x190] ss:$8 sps:$4 sm:$0xff]   ;;  %v8660_v8 = vld [vmem:[#allocation2 + $0x1a4] ss:$8 sps:$4 sm:$0xff]  }
  0xed   :  { %v8658_v9 = vld [vmem:[#allocation2 + $0x1a0] ss:$8 sps:$4 sm:$0xff]   ;;  %v8663_v10 = vld [vmem:[#allocation2 + $0x1b4] ss:$8 sps:$4 sm:$0xff]   ;;  %v8661_v11 = vld [vmem:[#allocation2 + $0x1b0] ss:$8 sps:$4 sm:$0xff]  }
  0xee   :  { %v8666_v12 = vld [vmem:[#allocation2 + $0x1c4] ss:$8 sps:$4 sm:$0xff]   ;;  %v8664_v13 = vld [vmem:[#allocation2 + $0x1c0] ss:$8 sps:$4 sm:$0xff]   ;;  %v8669_v15 = vld [vmem:[#allocation2 + $0x1d4] ss:$8 sps:$4 sm:$0xff]  }
  0xef   :  { %2783 = vmatpush1.bf16.msra.mxu0 %v8591_v16  ;;  %v8667_v16 = vld [vmem:[#allocation2 + $0x1d0] ss:$8 sps:$4 sm:$0xff]   ;;  %v8670_v19 = vld [vmem:[#allocation2 + $0x1e0] ss:$8 sps:$4 sm:$0xff]   ;;  %v8681_v26 = vld [vmem:[#allocation2 + $0x214] ss:$8 sps:$4 sm:$0xff]  }
  0xf0   :  { %2784 = vmatprep.subr.bf16.mxu0 %v8592_v17  ;;  %v8672_v17 = vld [vmem:[#allocation2 + $0x1e4] ss:$8 sps:$4 sm:$0xff]   ;;  %v8673_v21 = vld [vmem:[#allocation2 + $0x1f0] ss:$8 sps:$4 sm:$0xff]   ;;  %v8705_v43 = vld [vmem:[#allocation2 + $0x294] ss:$8 sps:$4 sm:$0xff]  }
  0xf1   :  { %v8679_v28 = vld [vmem:[#allocation2 + $0x210] ss:$8 sps:$4 sm:$0xff]   ;;  %v8708_v45 = vld [vmem:[#allocation2 + $0x2a4] ss:$8 sps:$4 sm:$0xff]   ;;  %v8730_v48 = vld [vmem:[#allocation2 + $0x320] ss:$8 sps:$4 sm:$0xff]  }
  0xf2   :  { %v8703_v44 = vld [vmem:[#allocation2 + $0x290] ss:$8 sps:$4 sm:$0xff]   ;;  %v8735_v49 = vld [vmem:[#allocation2 + $0x334] ss:$8 sps:$4 sm:$0xff]  }
  0xf3   :  { %2785 = vmatpush1.bf16.msra.mxu0 %v8594_v20  ;;  %v8675_v20 = vld [vmem:[#allocation2 + $0x1f4] ss:$8 sps:$4 sm:$0xff]  }
  0xf4   :  { %2786 = vmatprep.subr.bf16.mxu0 %v8595_v22  ;;  %v8678_v22 = vld [vmem:[#allocation2 + $0x204] ss:$8 sps:$4 sm:$0xff]  }
  0xf7   :  { %2787 = vmatpush1.bf16.msra.mxu0 %v8597_v25  ;;  %v8676_v25 = vld [vmem:[#allocation2 + $0x200] ss:$8 sps:$4 sm:$0xff]  }
  0xf8   :  { %2788 = vmatprep.subr.bf16.mxu0 %v8598_v27  ;;  %v10086_v27 = vrot.slane %v659_v23, %v10052_v18  ;;  %v8754_v23 = vld [vmem:[#allocation2 + $0x3a0] ss:$8 sps:$4 sm:$0xff]  }
  0xfb   :  { %2789 = vmatpush1.bf16.msra.mxu0 %v8600_v29  ;;  %v8684_v29 = vld [vmem:[#allocation2 + $0x224] ss:$8 sps:$4 sm:$0xff]  }
  0xfc   :  { %2790 = vmatprep.subr.bf16.mxu0 %v8601_v30  ;;  %v8682_v30 = vld [vmem:[#allocation2 + $0x220] ss:$8 sps:$4 sm:$0xff]  }
  0xff   :  { %2791 = vmatpush1.bf16.msra.mxu0 %v8603_v31  ;;  %v8687_v31 = vld [vmem:[#allocation2 + $0x234] ss:$8 sps:$4 sm:$0xff]  }
 0x100   :  { %2792 = vmatprep.subr.bf16.mxu0 %v8604_v32  ;;  %v8685_v32 = vld [vmem:[#allocation2 + $0x230] ss:$8 sps:$4 sm:$0xff]  }
 0x103   :  { %2793 = vmatpush1.bf16.msra.mxu0 %v8606_v33  ;;  %v8690_v33 = vld [vmem:[#allocation2 + $0x244] ss:$8 sps:$4 sm:$0xff]  }
 0x104   :  { %2794 = vmatprep.subr.bf16.mxu0 %v8607_v34  ;;  %v8688_v34 = vld [vmem:[#allocation2 + $0x240] ss:$8 sps:$4 sm:$0xff]  }
 0x107   :  { %2795 = vmatpush1.bf16.msra.mxu0 %v8609_v35  ;;  %v8693_v35 = vld [vmem:[#allocation2 + $0x254] ss:$8 sps:$4 sm:$0xff]  }
 0x108   :  { %2796 = vmatprep.subr.bf16.mxu0 %v8610_v36  ;;  %v8691_v36 = vld [vmem:[#allocation2 + $0x250] ss:$8 sps:$4 sm:$0xff]  }
 0x10b   :  { %2797 = vmatpush1.bf16.msra.mxu0 %v8612_v37  ;;  %v8696_v37 = vld [vmem:[#allocation2 + $0x264] ss:$8 sps:$4 sm:$0xff]  }
 0x10c   :  { %2798 = vmatprep.subr.bf16.mxu0 %v8613_v38  ;;  %v8694_v38 = vld [vmem:[#allocation2 + $0x260] ss:$8 sps:$4 sm:$0xff]  }
 0x10f   :  { %2799 = vmatpush1.bf16.msra.mxu0 %v8615_v39  ;;  %v8699_v39 = vld [vmem:[#allocation2 + $0x274] ss:$8 sps:$4 sm:$0xff]  }
 0x110   :  { %2800 = vmatprep.subr.bf16.mxu0 %v8616_v40  ;;  %v8697_v40 = vld [vmem:[#allocation2 + $0x270] ss:$8 sps:$4 sm:$0xff]  }
 0x113   :  { %2801 = vmatpush1.bf16.msra.mxu0 %v8618_v41  ;;  %v8702_v41 = vld [vmem:[#allocation2 + $0x284] ss:$8 sps:$4 sm:$0xff]  }
 0x114   :  { %2802 = vmatprep.subr.bf16.mxu0 %v8619_v42  ;;  %v8700_v42 = vld [vmem:[#allocation2 + $0x280] ss:$8 sps:$4 sm:$0xff]  }
 0x117   :  { %2803 = vmatpush1.bf16.msra.mxu0 %v8621_v46  ;;  %v8706_v46 = vld [vmem:[#allocation2 + $0x2a0] ss:$8 sps:$4 sm:$0xff]  }
 0x118   :  { %2813 = vmatprep.subr.bf16.mxu0 %v8630_v47  ;;  %v8711_v47 = vld [vmem:[#allocation2 + $0x2b4] ss:$8 sps:$4 sm:$0xff]  }
 0x11a   :  { %2805 = vmatmul.mubr.bf16.vlgmr.msra.gmra.mrb[0].mxu0 %v10076_v50  ;;  %v8709_v50 = vld [vmem:[#allocation2 + $0x2b0] ss:$8 sps:$4 sm:$0xff]  }
 0x11b   :  { %2814 = vmatpush1.bf16.msra.mxu0 %v8628_v52  ;;  %2845 = vmatprep.mubr.bf16.mxu0 %v690_v51  ;;  %v8714_v51 = vld [vmem:[#allocation2 + $0x2c4] ss:$8 sps:$4 sm:$0xff]   ;;  %v8712_v52 = vld [vmem:[#allocation2 + $0x2c0] ss:$8 sps:$4 sm:$0xff]  }
 0x11c   :  { %2815 = vmatprep.subr.bf16.mxu0 %v8633_v54  ;;  %v8717_v54 = vld [vmem:[#allocation2 + $0x2d4] ss:$8 sps:$4 sm:$0xff]  }
 0x11f   :  { %2816 = vmatpush1.bf16.msra.mxu0 %v8631_v55  ;;  %v8715_v55 = vld [vmem:[#allocation2 + $0x2d0] ss:$8 sps:$4 sm:$0xff]  }
 0x120   :  { %2817 = vmatprep.subr.bf16.mxu0 %v8636_v56  ;;  %v8720_v56 = vld [vmem:[#allocation2 + $0x2e4] ss:$8 sps:$4 sm:$0xff]  }
 0x123   :  { %2818 = vmatpush1.bf16.msra.mxu0 %v8634_v57  ;;  %v8718_v57 = vld [vmem:[#allocation2 + $0x2e0] ss:$8 sps:$4 sm:$0xff]  }
 0x124   :  { %2819 = vmatprep.subr.bf16.mxu0 %v8639_v58  ;;  %v8723_v58 = vld [vmem:[#allocation2 + $0x2f4] ss:$8 sps:$4 sm:$0xff]  }
 0x127   :  { %2820 = vmatpush1.bf16.msra.mxu0 %v8637_v59  ;;  %v8820_v59 = vld [vmem:[%s10471_s21 + $0x8] ss:$24 sps:$4 sm:$0xff]  }
 0x128   :  { %2821 = vmatprep.subr.bf16.mxu0 %v8642_v60  ;;  %v8822_v60 = vld [vmem:[%s10471_s21 + $0x38] ss:$24 sps:$4 sm:$0xff]  }
 0x12b   :  { %2822 = vmatpush1.bf16.msra.mxu0 %v8640_v61  ;;  %v8721_v61 = vld [vmem:[#allocation2 + $0x2f0] ss:$8 sps:$4 sm:$0xff]  }
 0x12c   :  { %2823 = vmatprep.subr.bf16.mxu0 %v8645_v62  ;;  %v8726_v62 = vld [vmem:[#allocation2 + $0x304] ss:$8 sps:$4 sm:$0xff]  }
 0x12f   :  { %2824 = vmatpush1.bf16.msra.mxu0 %v8643_v63  ;;  %v10096_v63 = vrot.slane %v8820_v59, %v10052_v18  ;;  %v8799_v59 = vld [vmem:[#allocation2 + $0x490] ss:$8 sps:$4 sm:$0xff]  }
 0x130   :  { %2825 = vmatprep.subr.bf16.mxu0 %v8648_v0  ;;  %v10099_v0 = vrot.slane %v8822_v60, %v10052_v18  ;;  %v8804_v60 = vld [vmem:[#allocation2 + $0x4a4] ss:$8 sps:$4 sm:$0xff]  }
 0x133   :  { %2826 = vmatpush1.bf16.msra.mxu0 %v8646_v1  ;;  %v10105_v1 = vrot.slane %v658_v53, %v10052_v18  ;;  %v8733_v53 = vld [vmem:[#allocation2 + $0x330] ss:$8 sps:$4 sm:$0xff]  }
 0x134   :  { %2827 = vmatprep.subr.bf16.mxu0 %v8651_v2  ;;  %v8724_v2 = vld [vmem:[#allocation2 + $0x300] ss:$8 sps:$4 sm:$0xff]  }
 0x137   :  { %2828 = vmatpush1.bf16.msra.mxu0 %v8649_v3  ;;  %v8729_v3 = vld [vmem:[#allocation2 + $0x314] ss:$8 sps:$4 sm:$0xff]  }
 0x138   :  { %2829 = vmatprep.subr.bf16.mxu0 %v8654_v4  ;;  %v691_v4 = vcombine.high %v10086_v27, %v10086_v27 }
 0x13b   :  { %2830 = vmatpush1.bf16.msra.mxu0 %v8652_v5  ;;  %v724_v5 = vcombine.low %v10096_v63, %v10099_v0 }
 0x13c   :  { %2831 = vmatprep.subr.bf16.mxu0 %v8657_v6  ;;  %v8727_v6 = vld [vmem:[#allocation2 + $0x310] ss:$8 sps:$4 sm:$0xff]  }
 0x13f   :  { %2832 = vmatpush1.bf16.msra.mxu0 %v8655_v7  ;;  %v8732_v7 = vld [vmem:[#allocation2 + $0x324] ss:$8 sps:$4 sm:$0xff]  }
 0x140   :  { %2833 = vmatprep.subr.bf16.mxu0 %v8660_v8  ;;  %v8738_v8 = vld [vmem:[#allocation2 + $0x344] ss:$8 sps:$4 sm:$0xff]  }
 0x143   :  { %2834 = vmatpush1.bf16.msra.mxu0 %v8658_v9  ;;  %v8736_v9 = vld [vmem:[#allocation2 + $0x340] ss:$8 sps:$4 sm:$0xff]  }
 0x144   :  { %2835 = vmatprep.subr.bf16.mxu0 %v8663_v10  ;;  %v8741_v10 = vld [vmem:[#allocation2 + $0x354] ss:$8 sps:$4 sm:$0xff]  }
 0x147   :  { %2836 = vmatpush1.bf16.msra.mxu0 %v8661_v11  ;;  %v8739_v11 = vld [vmem:[#allocation2 + $0x350] ss:$8 sps:$4 sm:$0xff]  }
 0x148   :  { %2837 = vmatprep.subr.bf16.mxu0 %v8666_v12  ;;  %v8744_v12 = vld [vmem:[#allocation2 + $0x364] ss:$8 sps:$4 sm:$0xff]  }
 0x14b   :  { %2838 = vmatpush1.bf16.msra.mxu0 %v8664_v13  ;;  %v8742_v13 = vld [vmem:[#allocation2 + $0x360] ss:$8 sps:$4 sm:$0xff]  }
 0x14c   :  { %2839 = vmatprep.subr.bf16.mxu0 %v8669_v15  ;;  %v8747_v15 = vld [vmem:[#allocation2 + $0x374] ss:$8 sps:$4 sm:$0xff]  }
 0x14f   :  { %2840 = vmatpush1.bf16.msra.mxu0 %v8667_v16  ;;  %v8745_v16 = vld [vmem:[#allocation2 + $0x370] ss:$8 sps:$4 sm:$0xff]  }
 0x150   :  { %2841 = vmatprep.subr.bf16.mxu0 %v8672_v17  ;;  %v8750_v17 = vld [vmem:[#allocation2 + $0x384] ss:$8 sps:$4 sm:$0xff]  }
 0x153   :  { %2842 = vmatpush1.bf16.msra.mxu0 %v8670_v19  ;;  %v8748_v19 = vld [vmem:[#allocation2 + $0x380] ss:$8 sps:$4 sm:$0xff]  }
 0x154   :  { %2843 = vmatprep.subr.bf16.mxu0 %v8675_v20  ;;  %v8753_v20 = vld [vmem:[#allocation2 + $0x394] ss:$8 sps:$4 sm:$0xff]  }
 0x157   :  { %2844 = vmatpush1.bf16.msra.mxu0 %v8673_v21  ;;  %v8751_v21 = vld [vmem:[#allocation2 + $0x390] ss:$8 sps:$4 sm:$0xff]  }
 0x158   :  { %2854 = vmatprep.subr.bf16.mxu0 %v8678_v22  ;;  %v8756_v22 = vld [vmem:[#allocation2 + $0x3a4] ss:$8 sps:$4 sm:$0xff]  }
 0x15a   :  { %2846 = vmatmul.mubr.bf16.vlgmr.msra.gmra.mrb[0].mxu0 %v688_v24  ;;  %v8759_v24 = vld [vmem:[#allocation2 + $0x3b4] ss:$8 sps:$4 sm:$0xff]  }
 0x15b   :  { %2855 = vmatpush1.bf16.msra.mxu0 %v8676_v25  ;;  %2886 = vmatprep.mubr.bf16.mxu0 %v10086_v27  ;;  %v8757_v25 = vld [vmem:[#allocation2 + $0x3b0] ss:$8 sps:$4 sm:$0xff]   ;;  %v8760_v27 = vld [vmem:[#allocation2 + $0x3c0] ss:$8 sps:$4 sm:$0xff]  }
 0x15c   :  { %2856 = vmatprep.subr.bf16.mxu0 %v8681_v26  ;;  %v8762_v26 = vld [vmem:[#allocation2 + $0x3c4] ss:$8 sps:$4 sm:$0xff]  }
 0x15f   :  { %2857 = vmatpush1.bf16.msra.mxu0 %v8679_v28  ;;  %v8765_v28 = vld [vmem:[#allocation2 + $0x3d4] ss:$8 sps:$4 sm:$0xff]  }
 0x160   :  { %2858 = vmatprep.subr.bf16.mxu0 %v8684_v29  ;;  %v8763_v29 = vld [vmem:[#allocation2 + $0x3d0] ss:$8 sps:$4 sm:$0xff]  }
 0x163   :  { %2859 = vmatpush1.bf16.msra.mxu0 %v8682_v30  ;;  %v8768_v30 = vld [vmem:[#allocation2 + $0x3e4] ss:$8 sps:$4 sm:$0xff]  }
 0x164   :  { %2860 = vmatprep.subr.bf16.mxu0 %v8687_v31  ;;  %v8766_v31 = vld [vmem:[#allocation2 + $0x3e0] ss:$8 sps:$4 sm:$0xff]  }
 0x167   :  { %2861 = vmatpush1.bf16.msra.mxu0 %v8685_v32  ;;  %v8771_v32 = vld [vmem:[#allocation2 + $0x3f4] ss:$8 sps:$4 sm:$0xff]  }
 0x168   :  { %2862 = vmatprep.subr.bf16.mxu0 %v8690_v33  ;;  %v8769_v33 = vld [vmem:[#allocation2 + $0x3f0] ss:$8 sps:$4 sm:$0xff]  }
 0x16b   :  { %2863 = vmatpush1.bf16.msra.mxu0 %v8688_v34  ;;  %v725_v34 = vcombine.high %v10096_v63, %v10099_v0  ;;  %v8830_v63 = vld [vmem:[#allocation2 + $0x520] ss:$8 sps:$4 sm:$0xff]   ;;  %v8835_v0 = vld [vmem:[#allocation2 + $0x534] ss:$8 sps:$4 sm:$0xff]  }
 0x16c   :  { %2864 = vmatprep.subr.bf16.mxu0 %v8693_v35  ;;  %v8774_v35 = vld [vmem:[#allocation2 + $0x404] ss:$8 sps:$4 sm:$0xff]  }
 0x16f   :  { %2865 = vmatpush1.bf16.msra.mxu0 %v8691_v36  ;;  %v689_v36 = vcombine.high %v10105_v1, %v10105_v1 }
 0x170   :  { %2866 = vmatprep.subr.bf16.mxu0 %v8696_v37  ;;  %v8772_v37 = vld [vmem:[#allocation2 + $0x400] ss:$8 sps:$4 sm:$0xff]  }
 0x173   :  { %2867 = vmatpush1.bf16.msra.mxu0 %v8694_v38  ;;  %v10117_v38 = vrot.slane %v725_v34, %v10052_v18  ;;  %v8856_v34 = vld [vmem:[#allocation2 + $0x5a4] ss:$8 sps:$4 sm:$0xff]  }
 0x174   :  { %2868 = vmatprep.subr.bf16.mxu0 %v8699_v39  ;;  %v8777_v39 = vld [vmem:[#allocation2 + $0x414] ss:$8 sps:$4 sm:$0xff]  }
 0x177   :  { %2869 = vmatpush1.bf16.msra.mxu0 %v8697_v40  ;;  %v8775_v40 = vld [vmem:[#allocation2 + $0x410] ss:$8 sps:$4 sm:$0xff]  }
 0x178   :  { %2870 = vmatprep.subr.bf16.mxu0 %v8702_v41  ;;  %v8780_v41 = vld [vmem:[#allocation2 + $0x424] ss:$8 sps:$4 sm:$0xff]  }
 0x17b   :  { %2871 = vmatpush1.bf16.msra.mxu0 %v8700_v42  ;;  %v8778_v42 = vld [vmem:[#allocation2 + $0x420] ss:$8 sps:$4 sm:$0xff]  }
 0x17c   :  { %2872 = vmatprep.subr.bf16.mxu0 %v8705_v43  ;;  %v8783_v43 = vld [vmem:[#allocation2 + $0x434] ss:$8 sps:$4 sm:$0xff]  }
 0x17f   :  { %2873 = vmatpush1.bf16.msra.mxu0 %v8703_v44  ;;  %v8781_v44 = vld [vmem:[#allocation2 + $0x430] ss:$8 sps:$4 sm:$0xff]  }
 0x180   :  { %2874 = vmatprep.subr.bf16.mxu0 %v8708_v45  ;;  %v8786_v45 = vld [vmem:[#allocation2 + $0x444] ss:$8 sps:$4 sm:$0xff]  }
 0x183   :  { %2875 = vmatpush1.bf16.msra.mxu0 %v8706_v46  ;;  %v8784_v46 = vld [vmem:[#allocation2 + $0x440] ss:$8 sps:$4 sm:$0xff]  }
 0x184   :  { %2876 = vmatprep.subr.bf16.mxu0 %v8711_v47  ;;  %v8789_v47 = vld [vmem:[#allocation2 + $0x454] ss:$8 sps:$4 sm:$0xff]  }
 0x187   :  { %2877 = vmatpush1.bf16.msra.mxu0 %v8709_v50  ;;  %v8787_v50 = vld [vmem:[#allocation2 + $0x450] ss:$8 sps:$4 sm:$0xff]  }
 0x188   :  { %2878 = vmatprep.subr.bf16.mxu0 %v8714_v51  ;;  %v8792_v51 = vld [vmem:[#allocation2 + $0x464] ss:$8 sps:$4 sm:$0xff]  }
 0x18b   :  { %2879 = vmatpush1.bf16.msra.mxu0 %v8712_v52  ;;  %v8790_v52 = vld [vmem:[#allocation2 + $0x460] ss:$8 sps:$4 sm:$0xff]  }
 0x18c   :  { %2880 = vmatprep.subr.bf16.mxu0 %v8717_v54  ;;  %v8795_v54 = vld [vmem:[#allocation2 + $0x474] ss:$8 sps:$4 sm:$0xff]  }
 0x18f   :  { %2881 = vmatpush1.bf16.msra.mxu0 %v8715_v55  ;;  %v8793_v55 = vld [vmem:[#allocation2 + $0x470] ss:$8 sps:$4 sm:$0xff]  }
 0x190   :  { %2882 = vmatprep.subr.bf16.mxu0 %v8720_v56  ;;  %v8798_v56 = vld [vmem:[#allocation2 + $0x484] ss:$8 sps:$4 sm:$0xff]  }
 0x193   :  { %2883 = vmatpush1.bf16.msra.mxu0 %v8718_v57  ;;  %v8796_v57 = vld [vmem:[#allocation2 + $0x480] ss:$8 sps:$4 sm:$0xff]  }
 0x194   :  { %2884 = vmatprep.subr.bf16.mxu0 %v8723_v58  ;;  %v8801_v58 = vld [vmem:[#allocation2 + $0x494] ss:$8 sps:$4 sm:$0xff]  }
 0x197   :  { %2885 = vmatpush1.bf16.msra.mxu0 %v8721_v61  ;;  %v8802_v61 = vld [vmem:[#allocation2 + $0x4a0] ss:$8 sps:$4 sm:$0xff]  }
 0x198   :  { %2895 = vmatprep.subr.bf16.mxu0 %v8726_v62  ;;  %v8807_v62 = vld [vmem:[#allocation2 + $0x4b4] ss:$8 sps:$4 sm:$0xff]  }
 0x19a   :  { %2887 = vmatmul.mubr.bf16.vlgmr.msra.gmra.mrb[0].mxu0 %v10105_v1  ;;  %v8805_v1 = vld [vmem:[#allocation2 + $0x4b0] ss:$8 sps:$4 sm:$0xff]  }
 0x19b   :  { %2896 = vmatpush1.bf16.msra.mxu0 %v8724_v2  ;;  %2927 = vmatprep.mubr.bf16.mxu0 %v691_v4  ;;  %v8810_v2 = vld [vmem:[#allocation2 + $0x4c4] ss:$8 sps:$4 sm:$0xff]   ;;  %v8813_v4 = vld [vmem:[#allocation2 + $0x4d4] ss:$8 sps:$4 sm:$0xff]  }
 0x19c   :  { %2897 = vmatprep.subr.bf16.mxu0 %v8729_v3  ;;  %v8808_v3 = vld [vmem:[#allocation2 + $0x4c0] ss:$8 sps:$4 sm:$0xff]  }
 0x19f   :  { %2898 = vmatpush1.bf16.msra.mxu0 %v8727_v6  ;;  %v8811_v6 = vld [vmem:[#allocation2 + $0x4d0] ss:$8 sps:$4 sm:$0xff]  }
 0x1a0   :  { %2899 = vmatprep.subr.bf16.mxu0 %v8732_v7  ;;  %v8816_v7 = vld [vmem:[#allocation2 + $0x4e4] ss:$8 sps:$4 sm:$0xff]  }
 0x1a3   :  { %2900 = vmatpush1.bf16.msra.mxu0 %v8730_v48  ;;  %v8814_v48 = vld [vmem:[#allocation2 + $0x4e0] ss:$8 sps:$4 sm:$0xff]  }
 0x1a4   :  { %2901 = vmatprep.subr.bf16.mxu0 %v8735_v49  ;;  %v8819_v49 = vld [vmem:[#allocation2 + $0x4f4] ss:$8 sps:$4 sm:$0xff]  }
 0x1a7   :  { %2902 = vmatpush1.bf16.msra.mxu0 %v8733_v53  ;;  %v8920_v53 = vld [vmem:[%s10471_s21 + $0xc] ss:$24 sps:$4 sm:$0xff]  }
 0x1a8   :  { %2903 = vmatprep.subr.bf16.mxu0 %v8738_v8  ;;  %v8921_v8 = vld [vmem:[%s10471_s21 + $0x3c] ss:$24 sps:$4 sm:$0xff]  }
 0x1ab   :  { %2904 = vmatpush1.bf16.msra.mxu0 %v8736_v9  ;;  %v8817_v9 = vld [vmem:[#allocation2 + $0x4f0] ss:$8 sps:$4 sm:$0xff]  }
 0x1ac   :  { %2905 = vmatprep.subr.bf16.mxu0 %v8741_v10  ;;  %v8826_v10 = vld [vmem:[#allocation2 + $0x504] ss:$8 sps:$4 sm:$0xff]  }
 0x1af   :  { %2906 = vmatpush1.bf16.msra.mxu0 %v8739_v11  ;;  %v10127_v11 = vrot.slane %v8920_v53, %v10052_v18  ;;  %v8899_v53 = vld [vmem:[#allocation2 + $0x690] ss:$8 sps:$4 sm:$0xff]  }
 0x1b0   :  { %2907 = vmatprep.subr.bf16.mxu0 %v8744_v12  ;;  %v10130_v12 = vrot.slane %v8921_v8, %v10052_v18  ;;  %v8904_v8 = vld [vmem:[#allocation2 + $0x6a4] ss:$8 sps:$4 sm:$0xff]  }
 0x1b3   :  { %2908 = vmatpush1.bf16.msra.mxu0 %v8742_v13  ;;  %v10136_v13 = vrot.slane %v724_v5, %v10052_v18  ;;  %v8833_v5 = vld [vmem:[#allocation2 + $0x530] ss:$8 sps:$4 sm:$0xff]  }
 0x1b4   :  { %2909 = vmatprep.subr.bf16.mxu0 %v8747_v15  ;;  %v8824_v15 = vld [vmem:[#allocation2 + $0x500] ss:$8 sps:$4 sm:$0xff]  }
 0x1b7   :  { %2910 = vmatpush1.bf16.msra.mxu0 %v8745_v16  ;;  %v758_v16 = vcombine.high %v10117_v38, %v10117_v38 }
 0x1b8   :  { %2911 = vmatprep.subr.bf16.mxu0 %v8750_v17  ;;  %v726_v17 = vcombine.low %v10127_v11, %v10130_v12 }
 0x1bb   :  { %2912 = vmatpush1.bf16.msra.mxu0 %v8748_v19  ;;  %v8829_v19 = vld [vmem:[#allocation2 + $0x514] ss:$8 sps:$4 sm:$0xff]  }
 0x1bc   :  { %2913 = vmatprep.subr.bf16.mxu0 %v8753_v20  ;;  %v8827_v20 = vld [vmem:[#allocation2 + $0x510] ss:$8 sps:$4 sm:$0xff]  }
 0x1bf   :  { %2914 = vmatpush1.bf16.msra.mxu0 %v8751_v21  ;;  %v8832_v21 = vld [vmem:[#allocation2 + $0x524] ss:$8 sps:$4 sm:$0xff]  }
 0x1c0   :  { %2915 = vmatprep.subr.bf16.mxu0 %v8756_v22  ;;  %v8838_v22 = vld [vmem:[#allocation2 + $0x544] ss:$8 sps:$4 sm:$0xff]  }
 0x1c3   :  { %2916 = vmatpush1.bf16.msra.mxu0 %v8754_v23  ;;  %v8836_v23 = vld [vmem:[#allocation2 + $0x540] ss:$8 sps:$4 sm:$0xff]  }
 0x1c4   :  { %2917 = vmatprep.subr.bf16.mxu0 %v8759_v24  ;;  %v8841_v24 = vld [vmem:[#allocation2 + $0x554] ss:$8 sps:$4 sm:$0xff]  }
 0x1c7   :  { %2918 = vmatpush1.bf16.msra.mxu0 %v8757_v25  ;;  %v8839_v25 = vld [vmem:[#allocation2 + $0x550] ss:$8 sps:$4 sm:$0xff]  }
 0x1c8   :  { %2919 = vmatprep.subr.bf16.mxu0 %v8762_v26  ;;  %v8844_v26 = vld [vmem:[#allocation2 + $0x564] ss:$8 sps:$4 sm:$0xff]  }
 0x1cb   :  { %2920 = vmatpush1.bf16.msra.mxu0 %v8760_v27  ;;  %v8842_v27 = vld [vmem:[#allocation2 + $0x560] ss:$8 sps:$4 sm:$0xff]  }
 0x1cc   :  { %2921 = vmatprep.subr.bf16.mxu0 %v8765_v28  ;;  %v8847_v28 = vld [vmem:[#allocation2 + $0x574] ss:$8 sps:$4 sm:$0xff]  }
 0x1cf   :  { %2922 = vmatpush1.bf16.msra.mxu0 %v8763_v29  ;;  %v8845_v29 = vld [vmem:[#allocation2 + $0x570] ss:$8 sps:$4 sm:$0xff]  }
 0x1d0   :  { %2923 = vmatprep.subr.bf16.mxu0 %v8768_v30  ;;  %v8850_v30 = vld [vmem:[#allocation2 + $0x584] ss:$8 sps:$4 sm:$0xff]  }
 0x1d3   :  { %2924 = vmatpush1.bf16.msra.mxu0 %v8766_v31  ;;  %v8848_v31 = vld [vmem:[#allocation2 + $0x580] ss:$8 sps:$4 sm:$0xff]  }
 0x1d4   :  { %2925 = vmatprep.subr.bf16.mxu0 %v8771_v32  ;;  %v8853_v32 = vld [vmem:[#allocation2 + $0x594] ss:$8 sps:$4 sm:$0xff]  }
 0x1d7   :  { %2926 = vmatpush1.bf16.msra.mxu0 %v8769_v33  ;;  %v8851_v33 = vld [vmem:[#allocation2 + $0x590] ss:$8 sps:$4 sm:$0xff]  }
 0x1d8   :  { %2936 = vmatprep.subr.bf16.mxu0 %v8774_v35  ;;  %v8854_v35 = vld [vmem:[#allocation2 + $0x5a0] ss:$8 sps:$4 sm:$0xff]  }
 0x1da   :  { %2928 = vmatmul.mubr.bf16.vlgmr.msra.gmra.mrb[0].mxu0 %v689_v36  ;;  %v8859_v36 = vld [vmem:[#allocation2 + $0x5b4] ss:$8 sps:$4 sm:$0xff]  }
 0x1db   :  { %2937 = vmatpush1.bf16.msra.mxu0 %v8772_v37  ;;  %2968 = vmatprep.mubr.bf16.mxu0 %v10117_v38  ;;  %v8857_v37 = vld [vmem:[#allocation2 + $0x5b0] ss:$8 sps:$4 sm:$0xff]   ;;  %v8862_v38 = vld [vmem:[#allocation2 + $0x5c4] ss:$8 sps:$4 sm:$0xff]  }
 0x1dc   :  { %2938 = vmatprep.subr.bf16.mxu0 %v8777_v39  ;;  %v8860_v39 = vld [vmem:[#allocation2 + $0x5c0] ss:$8 sps:$4 sm:$0xff]  }
 0x1df   :  { %2939 = vmatpush1.bf16.msra.mxu0 %v8775_v40  ;;  %v8865_v40 = vld [vmem:[#allocation2 + $0x5d4] ss:$8 sps:$4 sm:$0xff]  }
 0x1e0   :  { %2940 = vmatprep.subr.bf16.mxu0 %v8780_v41  ;;  %v8863_v41 = vld [vmem:[#allocation2 + $0x5d0] ss:$8 sps:$4 sm:$0xff]  }
 0x1e3   :  { %2941 = vmatpush1.bf16.msra.mxu0 %v8778_v42  ;;  %v8868_v42 = vld [vmem:[#allocation2 + $0x5e4] ss:$8 sps:$4 sm:$0xff]  }
 0x1e4   :  { %2942 = vmatprep.subr.bf16.mxu0 %v8783_v43  ;;  %v8866_v43 = vld [vmem:[#allocation2 + $0x5e0] ss:$8 sps:$4 sm:$0xff]  }
 0x1e7   :  { %2943 = vmatpush1.bf16.msra.mxu0 %v8781_v44  ;;  %v8871_v44 = vld [vmem:[#allocation2 + $0x5f4] ss:$8 sps:$4 sm:$0xff]  }
 0x1e8   :  { %2944 = vmatprep.subr.bf16.mxu0 %v8786_v45  ;;  %v8869_v45 = vld [vmem:[#allocation2 + $0x5f0] ss:$8 sps:$4 sm:$0xff]  }
 0x1eb   :  { %2945 = vmatpush1.bf16.msra.mxu0 %v8784_v46  ;;  %v727_v46 = vcombine.high %v10127_v11, %v10130_v12  ;;  %v8928_v11 = vld [vmem:[#allocation2 + $0x720] ss:$8 sps:$4 sm:$0xff]   ;;  %v8933_v12 = vld [vmem:[#allocation2 + $0x734] ss:$8 sps:$4 sm:$0xff]  }
 0x1ec   :  { %2946 = vmatprep.subr.bf16.mxu0 %v8789_v47  ;;  %v8874_v47 = vld [vmem:[#allocation2 + $0x604] ss:$8 sps:$4 sm:$0xff]  }
 0x1ef   :  { %2947 = vmatpush1.bf16.msra.mxu0 %v8787_v50  ;;  %v756_v50 = vcombine.high %v10136_v13, %v10136_v13 }
 0x1f0   :  { %2948 = vmatprep.subr.bf16.mxu0 %v8792_v51  ;;  %v8872_v51 = vld [vmem:[#allocation2 + $0x600] ss:$8 sps:$4 sm:$0xff]  }
 0x1f3   :  { %2949 = vmatpush1.bf16.msra.mxu0 %v8790_v52  ;;  %v10148_v52 = vrot.slane %v727_v46, %v10052_v18  ;;  %v8954_v46 = vld [vmem:[#allocation2 + $0x7a4] ss:$8 sps:$4 sm:$0xff]  }
 0x1f4   :  { %2950 = vmatprep.subr.bf16.mxu0 %v8795_v54  ;;  %v8877_v54 = vld [vmem:[#allocation2 + $0x614] ss:$8 sps:$4 sm:$0xff]  }
 0x1f7   :  { %2951 = vmatpush1.bf16.msra.mxu0 %v8793_v55  ;;  %v8875_v55 = vld [vmem:[#allocation2 + $0x610] ss:$8 sps:$4 sm:$0xff]  }
 0x1f8   :  { %2952 = vmatprep.subr.bf16.mxu0 %v8798_v56  ;;  %v8880_v56 = vld [vmem:[#allocation2 + $0x624] ss:$8 sps:$4 sm:$0xff]  }
 0x1fb   :  { %2953 = vmatpush1.bf16.msra.mxu0 %v8796_v57  ;;  %v8878_v57 = vld [vmem:[#allocation2 + $0x620] ss:$8 sps:$4 sm:$0xff]  }
 0x1fc   :  { %2954 = vmatprep.subr.bf16.mxu0 %v8801_v58  ;;  %v8883_v58 = vld [vmem:[#allocation2 + $0x634] ss:$8 sps:$4 sm:$0xff]  }
 0x1ff   :  { %2955 = vmatpush1.bf16.msra.mxu0 %v8799_v59  ;;  %v8881_v59 = vld [vmem:[#allocation2 + $0x630] ss:$8 sps:$4 sm:$0xff]  }
 0x200   :  { %2956 = vmatprep.subr.bf16.mxu0 %v8804_v60  ;;  %v8886_v60 = vld [vmem:[#allocation2 + $0x644] ss:$8 sps:$4 sm:$0xff]  }
 0x203   :  { %2957 = vmatpush1.bf16.msra.mxu0 %v8802_v61  ;;  %v8884_v61 = vld [vmem:[#allocation2 + $0x640] ss:$8 sps:$4 sm:$0xff]  }
 0x204   :  { %2958 = vmatprep.subr.bf16.mxu0 %v8807_v62  ;;  %v8889_v62 = vld [vmem:[#allocation2 + $0x654] ss:$8 sps:$4 sm:$0xff]  }
 0x207   :  { %2959 = vmatpush1.bf16.msra.mxu0 %v8805_v1  ;;  %v8887_v1 = vld [vmem:[#allocation2 + $0x650] ss:$8 sps:$4 sm:$0xff]  }
 0x208   :  { %2960 = vmatprep.subr.bf16.mxu0 %v8810_v2  ;;  %v8892_v2 = vld [vmem:[#allocation2 + $0x664] ss:$8 sps:$4 sm:$0xff]  }
 0x20b   :  { %2961 = vmatpush1.bf16.msra.mxu0 %v8808_v3  ;;  %v8890_v3 = vld [vmem:[#allocation2 + $0x660] ss:$8 sps:$4 sm:$0xff]  }
 0x20c   :  { %2962 = vmatprep.subr.bf16.mxu0 %v8813_v4  ;;  %v8895_v4 = vld [vmem:[#allocation2 + $0x674] ss:$8 sps:$4 sm:$0xff]  }
 0x20f   :  { %2963 = vmatpush1.bf16.msra.mxu0 %v8811_v6  ;;  %v8893_v6 = vld [vmem:[#allocation2 + $0x670] ss:$8 sps:$4 sm:$0xff]  }
 0x210   :  { %2964 = vmatprep.subr.bf16.mxu0 %v8816_v7  ;;  %v8898_v7 = vld [vmem:[#allocation2 + $0x684] ss:$8 sps:$4 sm:$0xff]  }
 0x213   :  { %2965 = vmatpush1.bf16.msra.mxu0 %v8814_v48  ;;  %v8896_v48 = vld [vmem:[#allocation2 + $0x680] ss:$8 sps:$4 sm:$0xff]  }
 0x214   :  { %2966 = vmatprep.subr.bf16.mxu0 %v8819_v49  ;;  %v8901_v49 = vld [vmem:[#allocation2 + $0x694] ss:$8 sps:$4 sm:$0xff]  }
 0x217   :  { %2967 = vmatpush1.bf16.msra.mxu0 %v8817_v9  ;;  %v8902_v9 = vld [vmem:[#allocation2 + $0x6a0] ss:$8 sps:$4 sm:$0xff]  }
 0x218   :  { %2977 = vmatprep.subr.bf16.mxu0 %v8826_v10  ;;  %v8907_v10 = vld [vmem:[#allocation2 + $0x6b4] ss:$8 sps:$4 sm:$0xff]  }
 0x21a   :  { %2969 = vmatmul.mubr.bf16.vlgmr.msra.gmra.mrb[0].mxu0 %v10136_v13  ;;  %v8905_v13 = vld [vmem:[#allocation2 + $0x6b0] ss:$8 sps:$4 sm:$0xff]  }
 0x21b   :  { %2978 = vmatpush1.bf16.msra.mxu0 %v8824_v15  ;;  %3009 = vmatprep.mubr.bf16.mxu0 %v758_v16  ;;  %v8910_v15 = vld [vmem:[#allocation2 + $0x6c4] ss:$8 sps:$4 sm:$0xff]   ;;  %v8908_v16 = vld [vmem:[#allocation2 + $0x6c0] ss:$8 sps:$4 sm:$0xff]  }
 0x21c   :  { %2979 = vmatprep.subr.bf16.mxu0 %v8829_v19  ;;  %v8913_v19 = vld [vmem:[#allocation2 + $0x6d4] ss:$8 sps:$4 sm:$0xff]  }
 0x21f   :  { %2980 = vmatpush1.bf16.msra.mxu0 %v8827_v20  ;;  %v8911_v20 = vld [vmem:[#allocation2 + $0x6d0] ss:$8 sps:$4 sm:$0xff]  }
 0x220   :  { %2981 = vmatprep.subr.bf16.mxu0 %v8832_v21  ;;  %v8916_v21 = vld [vmem:[#allocation2 + $0x6e4] ss:$8 sps:$4 sm:$0xff]  }
 0x223   :  { %2982 = vmatpush1.bf16.msra.mxu0 %v8830_v63  ;;  %v8914_v63 = vld [vmem:[#allocation2 + $0x6e0] ss:$8 sps:$4 sm:$0xff]  }
 0x224   :  { %2983 = vmatprep.subr.bf16.mxu0 %v8835_v0  ;;  %v8919_v0 = vld [vmem:[#allocation2 + $0x6f4] ss:$8 sps:$4 sm:$0xff]  }
 0x227   :  { %2984 = vmatpush1.bf16.msra.mxu0 %v8833_v5  ;;  %v9018_v5 = vld [vmem:[%s10471_s21 + $0x10] ss:$24 sps:$4 sm:$0xff]  }
 0x228   :  { %2985 = vmatprep.subr.bf16.mxu0 %v8838_v22  ;;  %v9020_v22 = vld [vmem:[%s10471_s21 + $0x40] ss:$24 sps:$4 sm:$0xff]  }
 0x22b   :  { %2986 = vmatpush1.bf16.msra.mxu0 %v8836_v23  ;;  %v8917_v23 = vld [vmem:[#allocation2 + $0x6f0] ss:$8 sps:$4 sm:$0xff]  }
 0x22c   :  { %2987 = vmatprep.subr.bf16.mxu0 %v8841_v24  ;;  %v8924_v24 = vld [vmem:[#allocation2 + $0x704] ss:$8 sps:$4 sm:$0xff]  }
 0x22f   :  { %2988 = vmatpush1.bf16.msra.mxu0 %v8839_v25  ;;  %v10158_v25 = vrot.slane %v9018_v5, %v10052_v18  ;;  %v8997_v5 = vld [vmem:[#allocation2 + $0x890] ss:$8 sps:$4 sm:$0xff]  }
 0x230   :  { %2989 = vmatprep.subr.bf16.mxu0 %v8844_v26  ;;  %v10161_v26 = vrot.slane %v9020_v22, %v10052_v18  ;;  %v9002_v22 = vld [vmem:[#allocation2 + $0x8a4] ss:$8 sps:$4 sm:$0xff]  }
 0x233   :  { %2990 = vmatpush1.bf16.msra.mxu0 %v8842_v27  ;;  %v10167_v27 = vrot.slane %v726_v17, %v10052_v18  ;;  %v8931_v17 = vld [vmem:[#allocation2 + $0x730] ss:$8 sps:$4 sm:$0xff]  }
 0x234   :  { %2991 = vmatprep.subr.bf16.mxu0 %v8847_v28  ;;  %v8922_v28 = vld [vmem:[#allocation2 + $0x700] ss:$8 sps:$4 sm:$0xff]  }
 0x237   :  { %2992 = vmatpush1.bf16.msra.mxu0 %v8845_v29  ;;  %v759_v29 = vcombine.high %v10148_v52, %v10148_v52 }
 0x238   :  { %2993 = vmatprep.subr.bf16.mxu0 %v8850_v30  ;;  %v792_v30 = vcombine.low %v10158_v25, %v10161_v26 }
 0x23b   :  { %2994 = vmatpush1.bf16.msra.mxu0 %v8848_v31  ;;  %v8927_v31 = vld [vmem:[#allocation2 + $0x714] ss:$8 sps:$4 sm:$0xff]  }
 0x23c   :  { %2995 = vmatprep.subr.bf16.mxu0 %v8853_v32  ;;  %v8925_v32 = vld [vmem:[#allocation2 + $0x710] ss:$8 sps:$4 sm:$0xff]  }
 0x23f   :  { %2996 = vmatpush1.bf16.msra.mxu0 %v8851_v33  ;;  %v8930_v33 = vld [vmem:[#allocation2 + $0x724] ss:$8 sps:$4 sm:$0xff]  }
 0x240   :  { %2997 = vmatprep.subr.bf16.mxu0 %v8856_v34  ;;  %v8936_v34 = vld [vmem:[#allocation2 + $0x744] ss:$8 sps:$4 sm:$0xff]  }
 0x243   :  { %2998 = vmatpush1.bf16.msra.mxu0 %v8854_v35  ;;  %v8934_v35 = vld [vmem:[#allocation2 + $0x740] ss:$8 sps:$4 sm:$0xff]  }
 0x244   :  { %2999 = vmatprep.subr.bf16.mxu0 %v8859_v36  ;;  %v8939_v36 = vld [vmem:[#allocation2 + $0x754] ss:$8 sps:$4 sm:$0xff]  }
 0x247   :  { %3000 = vmatpush1.bf16.msra.mxu0 %v8857_v37  ;;  %v8937_v37 = vld [vmem:[#allocation2 + $0x750] ss:$8 sps:$4 sm:$0xff]  }
 0x248   :  { %3001 = vmatprep.subr.bf16.mxu0 %v8862_v38  ;;  %v8942_v38 = vld [vmem:[#allocation2 + $0x764] ss:$8 sps:$4 sm:$0xff]  }
 0x24b   :  { %3002 = vmatpush1.bf16.msra.mxu0 %v8860_v39  ;;  %v8940_v39 = vld [vmem:[#allocation2 + $0x760] ss:$8 sps:$4 sm:$0xff]  }
 0x24c   :  { %3003 = vmatprep.subr.bf16.mxu0 %v8865_v40  ;;  %v8945_v40 = vld [vmem:[#allocation2 + $0x774] ss:$8 sps:$4 sm:$0xff]  }
 0x24f   :  { %3004 = vmatpush1.bf16.msra.mxu0 %v8863_v41  ;;  %v8943_v41 = vld [vmem:[#allocation2 + $0x770] ss:$8 sps:$4 sm:$0xff]  }
 0x250   :  { %3005 = vmatprep.subr.bf16.mxu0 %v8868_v42  ;;  %v8948_v42 = vld [vmem:[#allocation2 + $0x784] ss:$8 sps:$4 sm:$0xff]  }
 0x253   :  { %3006 = vmatpush1.bf16.msra.mxu0 %v8866_v43  ;;  %v8946_v43 = vld [vmem:[#allocation2 + $0x780] ss:$8 sps:$4 sm:$0xff]  }
 0x254   :  { %3007 = vmatprep.subr.bf16.mxu0 %v8871_v44  ;;  %v8951_v44 = vld [vmem:[#allocation2 + $0x794] ss:$8 sps:$4 sm:$0xff]  }
 0x257   :  { %3008 = vmatpush1.bf16.msra.mxu0 %v8869_v45  ;;  %v8949_v45 = vld [vmem:[#allocation2 + $0x790] ss:$8 sps:$4 sm:$0xff]  }
 0x258   :  { %3018 = vmatprep.subr.bf16.mxu0 %v8874_v47  ;;  %v8952_v47 = vld [vmem:[#allocation2 + $0x7a0] ss:$8 sps:$4 sm:$0xff]  }
 0x25a   :  { %3010 = vmatmul.mubr.bf16.vlgmr.msra.gmra.mrb[0].mxu0 %v756_v50  ;;  %v8957_v50 = vld [vmem:[#allocation2 + $0x7b4] ss:$8 sps:$4 sm:$0xff]  }
 0x25b   :  { %3019 = vmatpush1.bf16.msra.mxu0 %v8872_v51  ;;  %3050 = vmatprep.mubr.bf16.mxu0 %v10148_v52  ;;  %v8955_v51 = vld [vmem:[#allocation2 + $0x7b0] ss:$8 sps:$4 sm:$0xff]   ;;  %v8960_v52 = vld [vmem:[#allocation2 + $0x7c4] ss:$8 sps:$4 sm:$0xff]  }
 0x25c   :  { %3020 = vmatprep.subr.bf16.mxu0 %v8877_v54  ;;  %v8958_v54 = vld [vmem:[#allocation2 + $0x7c0] ss:$8 sps:$4 sm:$0xff]  }
 0x25f   :  { %3021 = vmatpush1.bf16.msra.mxu0 %v8875_v55  ;;  %v8963_v55 = vld [vmem:[#allocation2 + $0x7d4] ss:$8 sps:$4 sm:$0xff]  }
 0x260   :  { %3022 = vmatprep.subr.bf16.mxu0 %v8880_v56  ;;  %v8961_v56 = vld [vmem:[#allocation2 + $0x7d0] ss:$8 sps:$4 sm:$0xff]  }
 0x263   :  { %3023 = vmatpush1.bf16.msra.mxu0 %v8878_v57  ;;  %v8966_v57 = vld [vmem:[#allocation2 + $0x7e4] ss:$8 sps:$4 sm:$0xff]  }
 0x264   :  { %3024 = vmatprep.subr.bf16.mxu0 %v8883_v58  ;;  %v8964_v58 = vld [vmem:[#allocation2 + $0x7e0] ss:$8 sps:$4 sm:$0xff]  }
 0x267   :  { %3025 = vmatpush1.bf16.msra.mxu0 %v8881_v59  ;;  %v8969_v59 = vld [vmem:[#allocation2 + $0x7f4] ss:$8 sps:$4 sm:$0xff]  }
 0x268   :  { %3026 = vmatprep.subr.bf16.mxu0 %v8886_v60  ;;  %v8967_v60 = vld [vmem:[#allocation2 + $0x7f0] ss:$8 sps:$4 sm:$0xff]  }
 0x26b   :  { %3027 = vmatpush1.bf16.msra.mxu0 %v8884_v61  ;;  %v793_v61 = vcombine.high %v10158_v25, %v10161_v26  ;;  %v9028_v25 = vld [vmem:[#allocation2 + $0x920] ss:$8 sps:$4 sm:$0xff]   ;;  %v9033_v26 = vld [vmem:[#allocation2 + $0x934] ss:$8 sps:$4 sm:$0xff]  }
 0x26c   :  { %3028 = vmatprep.subr.bf16.mxu0 %v8889_v62  ;;  %v8972_v62 = vld [vmem:[#allocation2 + $0x804] ss:$8 sps:$4 sm:$0xff]  }
 0x26f   :  { %3029 = vmatpush1.bf16.msra.mxu0 %v8887_v1  ;;  %v757_v1 = vcombine.high %v10167_v27, %v10167_v27 }
 0x270   :  { %3030 = vmatprep.subr.bf16.mxu0 %v8892_v2  ;;  %v8970_v2 = vld [vmem:[#allocation2 + $0x800] ss:$8 sps:$4 sm:$0xff]  }
 0x273   :  { %3031 = vmatpush1.bf16.msra.mxu0 %v8890_v3  ;;  %v10179_v3 = vrot.slane %v793_v61, %v10052_v18  ;;  %v9054_v61 = vld [vmem:[#allocation2 + $0x9a4] ss:$8 sps:$4 sm:$0xff]  }
 0x274   :  { %3032 = vmatprep.subr.bf16.mxu0 %v8895_v4  ;;  %v8975_v4 = vld [vmem:[#allocation2 + $0x814] ss:$8 sps:$4 sm:$0xff]  }
 0x277   :  { %3033 = vmatpush1.bf16.msra.mxu0 %v8893_v6  ;;  %v8973_v6 = vld [vmem:[#allocation2 + $0x810] ss:$8 sps:$4 sm:$0xff]  }
 0x278   :  { %3034 = vmatprep.subr.bf16.mxu0 %v8898_v7  ;;  %v8978_v7 = vld [vmem:[#allocation2 + $0x824] ss:$8 sps:$4 sm:$0xff]  }
 0x27b   :  { %3035 = vmatpush1.bf16.msra.mxu0 %v8896_v48  ;;  %v8976_v48 = vld [vmem:[#allocation2 + $0x820] ss:$8 sps:$4 sm:$0xff]  }
 0x27c   :  { %3036 = vmatprep.subr.bf16.mxu0 %v8901_v49  ;;  %v8981_v49 = vld [vmem:[#allocation2 + $0x834] ss:$8 sps:$4 sm:$0xff]  }
 0x27f   :  { %3037 = vmatpush1.bf16.msra.mxu0 %v8899_v53  ;;  %v8979_v53 = vld [vmem:[#allocation2 + $0x830] ss:$8 sps:$4 sm:$0xff]  }
 0x280   :  { %3038 = vmatprep.subr.bf16.mxu0 %v8904_v8  ;;  %v8984_v8 = vld [vmem:[#allocation2 + $0x844] ss:$8 sps:$4 sm:$0xff]  }
 0x283   :  { %3039 = vmatpush1.bf16.msra.mxu0 %v8902_v9  ;;  %v8982_v9 = vld [vmem:[#allocation2 + $0x840] ss:$8 sps:$4 sm:$0xff]  }
 0x284   :  { %3040 = vmatprep.subr.bf16.mxu0 %v8907_v10  ;;  %v8987_v10 = vld [vmem:[#allocation2 + $0x854] ss:$8 sps:$4 sm:$0xff]  }
 0x287   :  { %3041 = vmatpush1.bf16.msra.mxu0 %v8905_v13  ;;  %v8985_v13 = vld [vmem:[#allocation2 + $0x850] ss:$8 sps:$4 sm:$0xff]  }
 0x288   :  { %3042 = vmatprep.subr.bf16.mxu0 %v8910_v15  ;;  %v8990_v15 = vld [vmem:[#allocation2 + $0x864] ss:$8 sps:$4 sm:$0xff]  }
 0x28b   :  { %3043 = vmatpush1.bf16.msra.mxu0 %v8908_v16  ;;  %v8988_v16 = vld [vmem:[#allocation2 + $0x860] ss:$8 sps:$4 sm:$0xff]  }
 0x28c   :  { %3044 = vmatprep.subr.bf16.mxu0 %v8913_v19  ;;  %v8993_v19 = vld [vmem:[#allocation2 + $0x874] ss:$8 sps:$4 sm:$0xff]  }
 0x28f   :  { %3045 = vmatpush1.bf16.msra.mxu0 %v8911_v20  ;;  %v8991_v20 = vld [vmem:[#allocation2 + $0x870] ss:$8 sps:$4 sm:$0xff]  }
 0x290   :  { %3046 = vmatprep.subr.bf16.mxu0 %v8916_v21  ;;  %v8996_v21 = vld [vmem:[#allocation2 + $0x884] ss:$8 sps:$4 sm:$0xff]  }
 0x293   :  { %3047 = vmatpush1.bf16.msra.mxu0 %v8914_v63  ;;  %v8994_v63 = vld [vmem:[#allocation2 + $0x880] ss:$8 sps:$4 sm:$0xff]  }
 0x294   :  { %3048 = vmatprep.subr.bf16.mxu0 %v8919_v0  ;;  %v8999_v0 = vld [vmem:[#allocation2 + $0x894] ss:$8 sps:$4 sm:$0xff]  }
 0x297   :  { %3049 = vmatpush1.bf16.msra.mxu0 %v8917_v23  ;;  %v9000_v23 = vld [vmem:[#allocation2 + $0x8a0] ss:$8 sps:$4 sm:$0xff]  }
 0x298   :  { %3059 = vmatprep.subr.bf16.mxu0 %v8924_v24  ;;  %v9005_v24 = vld [vmem:[#allocation2 + $0x8b4] ss:$8 sps:$4 sm:$0xff]  }
 0x29a   :  { %3051 = vmatmul.mubr.bf16.vlgmr.msra.gmra.mrb[0].mxu0 %v10167_v27  ;;  %v9003_v27 = vld [vmem:[#allocation2 + $0x8b0] ss:$8 sps:$4 sm:$0xff]  }
 0x29b   :  { %3060 = vmatpush1.bf16.msra.mxu0 %v8922_v28  ;;  %3091 = vmatprep.mubr.bf16.mxu0 %v759_v29  ;;  %v9008_v28 = vld [vmem:[#allocation2 + $0x8c4] ss:$8 sps:$4 sm:$0xff]   ;;  %v9006_v29 = vld [vmem:[#allocation2 + $0x8c0] ss:$8 sps:$4 sm:$0xff]  }
 0x29c   :  { %3061 = vmatprep.subr.bf16.mxu0 %v8927_v31  ;;  %v9011_v31 = vld [vmem:[#allocation2 + $0x8d4] ss:$8 sps:$4 sm:$0xff]  }
 0x29f   :  { %3062 = vmatpush1.bf16.msra.mxu0 %v8925_v32  ;;  %v9009_v32 = vld [vmem:[#allocation2 + $0x8d0] ss:$8 sps:$4 sm:$0xff]  }
 0x2a0   :  { %3063 = vmatprep.subr.bf16.mxu0 %v8930_v33  ;;  %v9014_v33 = vld [vmem:[#allocation2 + $0x8e4] ss:$8 sps:$4 sm:$0xff]  }
 0x2a3   :  { %3064 = vmatpush1.bf16.msra.mxu0 %v8928_v11  ;;  %v9012_v11 = vld [vmem:[#allocation2 + $0x8e0] ss:$8 sps:$4 sm:$0xff]  }
 0x2a4   :  { %3065 = vmatprep.subr.bf16.mxu0 %v8933_v12  ;;  %v9017_v12 = vld [vmem:[#allocation2 + $0x8f4] ss:$8 sps:$4 sm:$0xff]  }
 0x2a7   :  { %3066 = vmatpush1.bf16.msra.mxu0 %v8931_v17  ;;  %v9118_v17 = vld [vmem:[%s10471_s21 + $0x14] ss:$24 sps:$4 sm:$0xff]  }
 0x2a8   :  { %3067 = vmatprep.subr.bf16.mxu0 %v8936_v34  ;;  %v9119_v34 = vld [vmem:[%s10471_s21 + $0x44] ss:$24 sps:$4 sm:$0xff]  }
 0x2ab   :  { %3068 = vmatpush1.bf16.msra.mxu0 %v8934_v35  ;;  %v9015_v35 = vld [vmem:[#allocation2 + $0x8f0] ss:$8 sps:$4 sm:$0xff]  }
 0x2ac   :  { %3069 = vmatprep.subr.bf16.mxu0 %v8939_v36  ;;  %v9024_v36 = vld [vmem:[#allocation2 + $0x904] ss:$8 sps:$4 sm:$0xff]  }
 0x2af   :  { %3070 = vmatpush1.bf16.msra.mxu0 %v8937_v37  ;;  %v10189_v37 = vrot.slane %v9118_v17, %v10052_v18  ;;  %v9087_v17 = vld [vmem:[#allocation2 + $0xa54] ss:$8 sps:$4 sm:$0xff]  }
 0x2b0   :  { %3071 = vmatprep.subr.bf16.mxu0 %v8942_v38  ;;  %v10192_v38 = vrot.slane %v9119_v34, %v10052_v18  ;;  %v9182_v34 = vld [vmem:[#allocation7 + $0x40] ss:$8 sps:$4 sm:$0xff]  }
 0x2b3   :  { %3072 = vmatpush1.bf16.msra.mxu0 %v8940_v39  ;;  %v10198_v39 = vrot.slane %v792_v30, %v10052_v18  ;;  %v9031_v30 = vld [vmem:[#allocation2 + $0x930] ss:$8 sps:$4 sm:$0xff]  }
 0x2b4   :  { %3073 = vmatprep.subr.bf16.mxu0 %v8945_v40  ;;  %v9022_v40 = vld [vmem:[#allocation2 + $0x900] ss:$8 sps:$4 sm:$0xff]  }
 0x2b7   :  { %3074 = vmatpush1.bf16.msra.mxu0 %v8943_v41  ;;  %v826_v41 = vcombine.high %v10179_v3, %v10179_v3 }
 0x2b8   :  { %3075 = vmatprep.subr.bf16.mxu0 %v8948_v42  ;;  %v794_v42 = vcombine.low %v10189_v37, %v10192_v38 }
 0x2bb   :  { %3076 = vmatpush1.bf16.msra.mxu0 %v8946_v43  ;;  %v9027_v43 = vld [vmem:[#allocation2 + $0x914] ss:$8 sps:$4 sm:$0xff]  }
 0x2bc   :  { %3077 = vmatprep.subr.bf16.mxu0 %v8951_v44  ;;  %v9025_v44 = vld [vmem:[#allocation2 + $0x910] ss:$8 sps:$4 sm:$0xff]  }
 0x2bf   :  { %3078 = vmatpush1.bf16.msra.mxu0 %v8949_v45  ;;  %v9030_v45 = vld [vmem:[#allocation2 + $0x924] ss:$8 sps:$4 sm:$0xff]  }
 0x2c0   :  { %3079 = vmatprep.subr.bf16.mxu0 %v8954_v46  ;;  %v9036_v46 = vld [vmem:[#allocation2 + $0x944] ss:$8 sps:$4 sm:$0xff]  }
 0x2c3   :  { %3080 = vmatpush1.bf16.msra.mxu0 %v8952_v47  ;;  %v9034_v47 = vld [vmem:[#allocation2 + $0x940] ss:$8 sps:$4 sm:$0xff]  }
 0x2c4   :  { %3081 = vmatprep.subr.bf16.mxu0 %v8957_v50  ;;  %v9039_v50 = vld [vmem:[#allocation2 + $0x954] ss:$8 sps:$4 sm:$0xff]  }
 0x2c7   :  { %3082 = vmatpush1.bf16.msra.mxu0 %v8955_v51  ;;  %v9037_v51 = vld [vmem:[#allocation2 + $0x950] ss:$8 sps:$4 sm:$0xff]  }
 0x2c8   :  { %3083 = vmatprep.subr.bf16.mxu0 %v8960_v52  ;;  %v9042_v52 = vld [vmem:[#allocation2 + $0x964] ss:$8 sps:$4 sm:$0xff]  }
 0x2cb   :  { %3084 = vmatpush1.bf16.msra.mxu0 %v8958_v54  ;;  %v9040_v54 = vld [vmem:[#allocation2 + $0x960] ss:$8 sps:$4 sm:$0xff]  }
 0x2cc   :  { %3085 = vmatprep.subr.bf16.mxu0 %v8963_v55  ;;  %v9045_v55 = vld [vmem:[#allocation2 + $0x974] ss:$8 sps:$4 sm:$0xff]  }
 0x2cf   :  { %3086 = vmatpush1.bf16.msra.mxu0 %v8961_v56  ;;  %v9043_v56 = vld [vmem:[#allocation2 + $0x970] ss:$8 sps:$4 sm:$0xff]  }
 0x2d0   :  { %3087 = vmatprep.subr.bf16.mxu0 %v8966_v57  ;;  %v9048_v57 = vld [vmem:[#allocation2 + $0x984] ss:$8 sps:$4 sm:$0xff]  }
 0x2d3   :  { %3088 = vmatpush1.bf16.msra.mxu0 %v8964_v58  ;;  %v9046_v58 = vld [vmem:[#allocation2 + $0x980] ss:$8 sps:$4 sm:$0xff]  }
 0x2d4   :  { %3089 = vmatprep.subr.bf16.mxu0 %v8969_v59  ;;  %v9051_v59 = vld [vmem:[#allocation2 + $0x994] ss:$8 sps:$4 sm:$0xff]  }
 0x2d7   :  { %3090 = vmatpush1.bf16.msra.mxu0 %v8967_v60  ;;  %v9049_v60 = vld [vmem:[#allocation2 + $0x990] ss:$8 sps:$4 sm:$0xff]  }
 0x2d8   :  { %3100 = vmatprep.subr.bf16.mxu0 %v8972_v62  ;;  %v9052_v62 = vld [vmem:[#allocation2 + $0x9a0] ss:$8 sps:$4 sm:$0xff]  }
 0x2da   :  { %3092 = vmatmul.mubr.bf16.vlgmr.msra.gmra.mrb[0].mxu0 %v757_v1  ;;  %v9057_v1 = vld [vmem:[#allocation2 + $0x9b4] ss:$8 sps:$4 sm:$0xff]  }
 0x2db   :  { %3101 = vmatpush1.bf16.msra.mxu0 %v8970_v2  ;;  %3132 = vmatprep.mubr.bf16.mxu0 %v10179_v3  ;;  %v9055_v2 = vld [vmem:[#allocation2 + $0x9b0] ss:$8 sps:$4 sm:$0xff]   ;;  %v9060_v3 = vld [vmem:[#allocation2 + $0x9c4] ss:$8 sps:$4 sm:$0xff]  }
 0x2dc   :  { %3102 = vmatprep.subr.bf16.mxu0 %v8975_v4  ;;  %v9058_v4 = vld [vmem:[#allocation2 + $0x9c0] ss:$8 sps:$4 sm:$0xff]  }
 0x2df   :  { %3103 = vmatpush1.bf16.msra.mxu0 %v8973_v6  ;;  %v9063_v6 = vld [vmem:[#allocation2 + $0x9d4] ss:$8 sps:$4 sm:$0xff]  }
 0x2e0   :  { %3104 = vmatprep.subr.bf16.mxu0 %v8978_v7  ;;  %v9061_v7 = vld [vmem:[#allocation2 + $0x9d0] ss:$8 sps:$4 sm:$0xff]  }
 0x2e3   :  { %3105 = vmatpush1.bf16.msra.mxu0 %v8976_v48  ;;  %v9066_v48 = vld [vmem:[#allocation2 + $0x9e4] ss:$8 sps:$4 sm:$0xff]  }
 0x2e4   :  { %3106 = vmatprep.subr.bf16.mxu0 %v8981_v49  ;;  %v9064_v49 = vld [vmem:[#allocation2 + $0x9e0] ss:$8 sps:$4 sm:$0xff]  }
 0x2e7   :  { %3107 = vmatpush1.bf16.msra.mxu0 %v8979_v53  ;;  %v9069_v53 = vld [vmem:[#allocation2 + $0x9f4] ss:$8 sps:$4 sm:$0xff]  }
 0x2e8   :  { %3108 = vmatprep.subr.bf16.mxu0 %v8984_v8  ;;  %v9067_v8 = vld [vmem:[#allocation2 + $0x9f0] ss:$8 sps:$4 sm:$0xff]  }
 0x2eb   :  { %3109 = vmatpush1.bf16.msra.mxu0 %v8982_v9  ;;  %v795_v9 = vcombine.high %v10189_v37, %v10192_v38  ;;  %v9131_v37 = vld [vmem:[#allocation2 + $0xb34] ss:$8 sps:$4 sm:$0xff]   ;;  %v9134_v38 = vld [vmem:[#allocation2 + $0xb44] ss:$8 sps:$4 sm:$0xff]  }
 0x2ec   :  { %3110 = vmatprep.subr.bf16.mxu0 %v8987_v10  ;;  %v9072_v10 = vld [vmem:[#allocation2 + $0xa04] ss:$8 sps:$4 sm:$0xff]  }
 0x2ef   :  { %3111 = vmatpush1.bf16.msra.mxu0 %v8985_v13  ;;  %v824_v13 = vcombine.high %v10198_v39, %v10198_v39 }
 0x2f0   :  { %3112 = vmatprep.subr.bf16.mxu0 %v8990_v15  ;;  %v9070_v15 = vld [vmem:[#allocation2 + $0xa00] ss:$8 sps:$4 sm:$0xff]  }
 0x2f3   :  { %3113 = vmatpush1.bf16.msra.mxu0 %v8988_v16  ;;  %v10210_v16 = vrot.slane %v795_v9, %v10052_v18  ;;  %v9209_v9 = vld [vmem:[#allocation7 + $0xd0] ss:$8 sps:$4 sm:$0xff]  }
 0x2f4   :  { %3114 = vmatprep.subr.bf16.mxu0 %v8993_v19  ;;  %v9075_v19 = vld [vmem:[#allocation2 + $0xa14] ss:$8 sps:$4 sm:$0xff]  }
 0x2f7   :  { %3115 = vmatpush1.bf16.msra.mxu0 %v8991_v20  ;;  %v9168_v20 = vld [vmem:[#allocation7 + $0x4] ss:$8 sps:$4 sm:$0xff]  }
 0x2f8   :  { %3116 = vmatprep.subr.bf16.mxu0 %v8996_v21  ;;  %v9170_v21 = vld [vmem:[#allocation7] ss:$8 sps:$4 sm:$0xff]   ;;  %3472 = vmatprep.subr.bf16.mxu1 %v9168_v20  ;;  %v10217_v20 = vrot.slane %v794_v42, %v10052_v18  ;;  %v9129_v18 = vld [vmem:[#allocation2 + $0xb30] ss:$8 sps:$4 sm:$0xff]  }
 0x2f9   :  { %3473 = vmatpush1.bf16.msra.mxu1 %v9170_v21  ;;  %v9120_v21 = vld [vmem:[#allocation2 + $0xb00] ss:$8 sps:$4 sm:$0xff]  }
 0x2fa   :  { %v9132_v42 = vld [vmem:[#allocation2 + $0xb40] ss:$8 sps:$4 sm:$0xff]  }
 0x2fb   :  { %3117 = vmatpush1.bf16.msra.mxu0 %v8994_v63  ;;  %v9171_v63 = vld [vmem:[#allocation7 + $0x14] ss:$8 sps:$4 sm:$0xff]  }
 0x2fc   :  { %3118 = vmatprep.subr.bf16.mxu0 %v8999_v0  ;;  %v9073_v0 = vld [vmem:[#allocation2 + $0xa10] ss:$8 sps:$4 sm:$0xff]   ;;  %3474 = vmatprep.subr.bf16.mxu1 %v9171_v63  ;;  %v827_v63 = vcombine.high %v10210_v16, %v10210_v16 }
 0x2ff   :  { %3119 = vmatpush1.bf16.msra.mxu0 %v8997_v5  ;;  %v9078_v5 = vld [vmem:[#allocation2 + $0xa24] ss:$8 sps:$4 sm:$0xff]  }
 0x300   :  { %3120 = vmatprep.subr.bf16.mxu0 %v9002_v22  ;;  %v9173_v22 = vld [vmem:[#allocation7 + $0x10] ss:$8 sps:$4 sm:$0xff]  }
 0x301   :  { %3475 = vmatpush1.bf16.msra.mxu1 %v9173_v22  ;;  %v9128_v22 = vld [vmem:[#allocation2 + $0xb24] ss:$8 sps:$4 sm:$0xff]  }
 0x303   :  { %3121 = vmatpush1.bf16.msra.mxu0 %v9000_v23  ;;  %v9174_v23 = vld [vmem:[#allocation7 + $0x24] ss:$8 sps:$4 sm:$0xff]  }
 0x304   :  { %3122 = vmatprep.subr.bf16.mxu0 %v9005_v24  ;;  %v9076_v24 = vld [vmem:[#allocation2 + $0xa20] ss:$8 sps:$4 sm:$0xff]   ;;  %3476 = vmatprep.subr.bf16.mxu1 %v9174_v23 }
 0x305   :  { %v9126_v23 = vld [vmem:[#allocation2 + $0xb20] ss:$8 sps:$4 sm:$0xff]  }
 0x307   :  { %3123 = vmatpush1.bf16.msra.mxu0 %v9003_v27  ;;  %v9081_v27 = vld [vmem:[#allocation2 + $0xa34] ss:$8 sps:$4 sm:$0xff]  }
 0x308   :  { %3124 = vmatprep.subr.bf16.mxu0 %v9008_v28  ;;  %v9176_v28 = vld [vmem:[#allocation7 + $0x20] ss:$8 sps:$4 sm:$0xff]  }
 0x309   :  { %3477 = vmatpush1.bf16.msra.mxu1 %v9176_v28  ;;  %v9138_v28 = vld [vmem:[#allocation2 + $0xb60] ss:$8 sps:$4 sm:$0xff]  }
 0x30b   :  { %3125 = vmatpush1.bf16.msra.mxu0 %v9006_v29  ;;  %v9177_v29 = vld [vmem:[#allocation7 + $0x34] ss:$8 sps:$4 sm:$0xff]  }
 0x30c   :  { %3126 = vmatprep.subr.bf16.mxu0 %v9011_v31  ;;  %v9079_v31 = vld [vmem:[#allocation2 + $0xa30] ss:$8 sps:$4 sm:$0xff]   ;;  %3478 = vmatprep.subr.bf16.mxu1 %v9177_v29  ;;  %v9143_v29 = vld [vmem:[#allocation2 + $0xb74] ss:$8 sps:$4 sm:$0xff]  }
 0x30f   :  { %3127 = vmatpush1.bf16.msra.mxu0 %v9009_v32  ;;  %v9084_v32 = vld [vmem:[#allocation2 + $0xa44] ss:$8 sps:$4 sm:$0xff]  }
 0x310   :  { %3128 = vmatprep.subr.bf16.mxu0 %v9014_v33  ;;  %v9179_v33 = vld [vmem:[#allocation7 + $0x30] ss:$8 sps:$4 sm:$0xff]  }
 0x311   :  { %3479 = vmatpush1.bf16.msra.mxu1 %v9179_v33  ;;  %v9144_v33 = vld [vmem:[#allocation2 + $0xb80] ss:$8 sps:$4 sm:$0xff]  }
 0x313   :  { %3129 = vmatpush1.bf16.msra.mxu0 %v9012_v11  ;;  %v9180_v11 = vld [vmem:[#allocation7 + $0x44] ss:$8 sps:$4 sm:$0xff]  }
 0x314   :  { %3130 = vmatprep.subr.bf16.mxu0 %v9017_v12  ;;  %v9082_v12 = vld [vmem:[#allocation2 + $0xa40] ss:$8 sps:$4 sm:$0xff]   ;;  %3480 = vmatprep.subr.bf16.mxu1 %v9180_v11  ;;  %v9149_v11 = vld [vmem:[#allocation2 + $0xb94] ss:$8 sps:$4 sm:$0xff]  }
 0x315   :  { %3481 = vmatpush1.bf16.msra.mxu1 %v9182_v34  ;;  %v9150_v34 = vld [vmem:[#allocation2 + $0xba0] ss:$8 sps:$4 sm:$0xff]  }
 0x317   :  { %3131 = vmatpush1.bf16.msra.mxu0 %v9015_v35  ;;  %v9183_v35 = vld [vmem:[#allocation7 + $0x54] ss:$8 sps:$4 sm:$0xff]  }
 0x318   :  { %3141 = vmatprep.subr.bf16.mxu0 %v9024_v36  ;;  %v9085_v36 = vld [vmem:[#allocation2 + $0xa50] ss:$8 sps:$4 sm:$0xff]   ;;  %3482 = vmatprep.subr.bf16.mxu1 %v9183_v35  ;;  %v9155_v35 = vld [vmem:[#allocation2 + $0xbb4] ss:$8 sps:$4 sm:$0xff]  }
 0x31a   :  { %3133 = vmatmul.mubr.bf16.vlgmr.msra.gmra.mrb[0].mxu0 %v10198_v39  ;;  %v9090_v39 = vld [vmem:[#allocation2 + $0xa64] ss:$8 sps:$4 sm:$0xff]  }
 0x31b   :  { %3142 = vmatpush1.bf16.msra.mxu0 %v9022_v40  ;;  %3173 = vmatprep.mubr.bf16.mxu0 %v826_v41  ;;  %v9185_v40 = vld [vmem:[#allocation7 + $0x50] ss:$8 sps:$4 sm:$0xff]   ;;  %v9186_v41 = vld [vmem:[#allocation7 + $0x64] ss:$8 sps:$4 sm:$0xff]  }
 0x31c   :  { %3143 = vmatprep.subr.bf16.mxu0 %v9027_v43  ;;  %v9088_v43 = vld [vmem:[#allocation2 + $0xa60] ss:$8 sps:$4 sm:$0xff]   ;;  %3483 = vmatpush1.bf16.msra.mxu1 %v9185_v40 }
 0x31d   :  { %3484 = vmatprep.subr.bf16.mxu1 %v9186_v41  ;;  %v9156_v40 = vld [vmem:[#allocation2 + $0xbc0] ss:$8 sps:$4 sm:$0xff]   ;;  %v9161_v41 = vld [vmem:[#allocation2 + $0xbd4] ss:$8 sps:$4 sm:$0xff]  }
 0x31f   :  { %3144 = vmatpush1.bf16.msra.mxu0 %v9025_v44  ;;  %v9093_v44 = vld [vmem:[#allocation2 + $0xa74] ss:$8 sps:$4 sm:$0xff]  }
 0x320   :  { %3145 = vmatprep.subr.bf16.mxu0 %v9030_v45  ;;  %v9188_v45 = vld [vmem:[#allocation7 + $0x60] ss:$8 sps:$4 sm:$0xff]  }
 0x321   :  { %3485 = vmatpush1.bf16.msra.mxu1 %v9188_v45  ;;  %v9162_v45 = vld [vmem:[#allocation2 + $0xbe0] ss:$8 sps:$4 sm:$0xff]  }
 0x323   :  { %3146 = vmatpush1.bf16.msra.mxu0 %v9028_v25  ;;  %v9189_v25 = vld [vmem:[#allocation7 + $0x74] ss:$8 sps:$4 sm:$0xff]  }
 0x324   :  { %3147 = vmatprep.subr.bf16.mxu0 %v9033_v26  ;;  %v9091_v26 = vld [vmem:[#allocation2 + $0xa70] ss:$8 sps:$4 sm:$0xff]   ;;  %3486 = vmatprep.subr.bf16.mxu1 %v9189_v25  ;;  %v9167_v25 = vld [vmem:[#allocation2 + $0xbf4] ss:$8 sps:$4 sm:$0xff]  }
 0x327   :  { %3148 = vmatpush1.bf16.msra.mxu0 %v9031_v30  ;;  %v9096_v30 = vld [vmem:[#allocation2 + $0xa84] ss:$8 sps:$4 sm:$0xff]  }
 0x328   :  { %3149 = vmatprep.subr.bf16.mxu0 %v9036_v46  ;;  %v9191_v46 = vld [vmem:[#allocation7 + $0x70] ss:$8 sps:$4 sm:$0xff]  }
 0x329   :  { %3487 = vmatpush1.bf16.msra.mxu1 %v9191_v46  ;;  %v9210_v46 = vld [vmem:[#allocation7 + $0xe4] ss:$8 sps:$4 sm:$0xff]  }
 0x32b   :  { %3150 = vmatpush1.bf16.msra.mxu0 %v9034_v47  ;;  %v9192_v47 = vld [vmem:[#allocation7 + $0x84] ss:$8 sps:$4 sm:$0xff]  }
 0x32c   :  { %3151 = vmatprep.subr.bf16.mxu0 %v9039_v50  ;;  %v9094_v50 = vld [vmem:[#allocation2 + $0xa80] ss:$8 sps:$4 sm:$0xff]   ;;  %3488 = vmatprep.subr.bf16.mxu1 %v9192_v47 }
 0x32d   :  { %v9212_v47 = vld [vmem:[#allocation7 + $0xe0] ss:$8 sps:$4 sm:$0xff]  }
 0x32f   :  { %3152 = vmatpush1.bf16.msra.mxu0 %v9037_v51  ;;  %v9099_v51 = vld [vmem:[#allocation2 + $0xa94] ss:$8 sps:$4 sm:$0xff]  }
 0x330   :  { %3153 = vmatprep.subr.bf16.mxu0 %v9042_v52  ;;  %v9194_v52 = vld [vmem:[#allocation7 + $0x80] ss:$8 sps:$4 sm:$0xff]  }
 0x331   :  { %3489 = vmatpush1.bf16.msra.mxu1 %v9194_v52  ;;  %v9218_v52 = vld [vmem:[#allocation10 + $0x4] ss:$8 sps:$4 sm:$0xff]  }
 0x333   :  { %3154 = vmatpush1.bf16.msra.mxu0 %v9040_v54  ;;  %v9195_v54 = vld [vmem:[#allocation7 + $0x94] ss:$8 sps:$4 sm:$0xff]  }
 0x334   :  { %3155 = vmatprep.subr.bf16.mxu0 %v9045_v55  ;;  %v9097_v55 = vld [vmem:[#allocation2 + $0xa90] ss:$8 sps:$4 sm:$0xff]   ;;  %3490 = vmatprep.subr.bf16.mxu1 %v9195_v54  ;;  %v10225_v54 = vsub.s32 0, %v10049_v14 }
 0x337   :  { %3156 = vmatpush1.bf16.msra.mxu0 %v9043_v56  ;;  %v9102_v56 = vld [vmem:[#allocation2 + $0xaa4] ss:$8 sps:$4 sm:$0xff]  }
 0x338   :  { %3157 = vmatprep.subr.bf16.mxu0 %v9048_v57  ;;  %v9197_v57 = vld [vmem:[#allocation7 + $0x90] ss:$8 sps:$4 sm:$0xff]  }
 0x339   :  { %3491 = vmatpush1.bf16.msra.mxu1 %v9197_v57 }
 0x33b   :  { %3158 = vmatpush1.bf16.msra.mxu0 %v9046_v58  ;;  %v9198_v58 = vld [vmem:[#allocation7 + $0xa4] ss:$8 sps:$4 sm:$0xff]  }
 0x33c   :  { %3159 = vmatprep.subr.bf16.mxu0 %v9051_v59  ;;  %v9100_v59 = vld [vmem:[#allocation2 + $0xaa0] ss:$8 sps:$4 sm:$0xff]   ;;  %3492 = vmatprep.subr.bf16.mxu1 %v9198_v58 }
 0x33f   :  { %3160 = vmatpush1.bf16.msra.mxu0 %v9049_v60  ;;  %v9105_v60 = vld [vmem:[#allocation2 + $0xab4] ss:$8 sps:$4 sm:$0xff]  }
 0x340   :  { %3161 = vmatprep.subr.bf16.mxu0 %v9054_v61  ;;  %v9200_v61 = vld [vmem:[#allocation7 + $0xa0] ss:$8 sps:$4 sm:$0xff]  }
 0x341   :  { %3493 = vmatpush1.bf16.msra.mxu1 %v9200_v61 }
 0x343   :  { %3162 = vmatpush1.bf16.msra.mxu0 %v9052_v62  ;;  %v9201_v62 = vld [vmem:[#allocation7 + $0xb4] ss:$8 sps:$4 sm:$0xff]  }
 0x344   :  { %3163 = vmatprep.subr.bf16.mxu0 %v9057_v1  ;;  %v9103_v1 = vld [vmem:[#allocation2 + $0xab0] ss:$8 sps:$4 sm:$0xff]   ;;  %3494 = vmatprep.subr.bf16.mxu1 %v9201_v62 }
 0x347   :  { %3164 = vmatpush1.bf16.msra.mxu0 %v9055_v2  ;;  %v9108_v2 = vld [vmem:[#allocation2 + $0xac4] ss:$8 sps:$4 sm:$0xff]  }
 0x348   :  { %3165 = vmatprep.subr.bf16.mxu0 %v9060_v3  ;;  %v9203_v3 = vld [vmem:[#allocation7 + $0xb0] ss:$8 sps:$4 sm:$0xff]  }
 0x349   :  { %3495 = vmatpush1.bf16.msra.mxu1 %v9203_v3 }
 0x34b   :  { %3166 = vmatpush1.bf16.msra.mxu0 %v9058_v4  ;;  %v9204_v4 = vld [vmem:[#allocation7 + $0xc4] ss:$8 sps:$4 sm:$0xff]  }
 0x34c   :  { %3167 = vmatprep.subr.bf16.mxu0 %v9063_v6  ;;  %v9106_v6 = vld [vmem:[#allocation2 + $0xac0] ss:$8 sps:$4 sm:$0xff]   ;;  %3496 = vmatprep.subr.bf16.mxu1 %v9204_v4 }
 0x34f   :  { %3168 = vmatpush1.bf16.msra.mxu0 %v9061_v7  ;;  %v9111_v7 = vld [vmem:[#allocation2 + $0xad4] ss:$8 sps:$4 sm:$0xff]  }
 0x350   :  { %3169 = vmatprep.subr.bf16.mxu0 %v9066_v48  ;;  %v9206_v48 = vld [vmem:[#allocation7 + $0xc0] ss:$8 sps:$4 sm:$0xff]  }
 0x351   :  { %3497 = vmatpush1.bf16.msra.mxu1 %v9206_v48 }
 0x353   :  { %3170 = vmatpush1.bf16.msra.mxu0 %v9064_v49  ;;  %v9207_v49 = vld [vmem:[#allocation7 + $0xd4] ss:$8 sps:$4 sm:$0xff]  }
 0x354   :  { %3171 = vmatprep.subr.bf16.mxu0 %v9069_v53  ;;  %v9109_v53 = vld [vmem:[#allocation2 + $0xad0] ss:$8 sps:$4 sm:$0xff]   ;;  %3498 = vmatprep.subr.bf16.mxu1 %v9207_v49 }
 0x355   :  { %3499 = vmatpush1.bf16.msra.mxu1 %v9209_v9  ;;  %v9221_v49 = vld [vmem:[#allocation10 + $0x14] ss:$8 sps:$4 sm:$0xff]   ;;  %v9222_v9 = vld [vmem:[#allocation10 + $0x20] ss:$8 sps:$4 sm:$0xff]  }
 0x356   :  { %3500 = vmatprep.subr.bf16.mxu1 %v9210_v46 }
 0x357   :  { %3172 = vmatpush1.bf16.msra.mxu0 %v9067_v8  ;;  %v9114_v8 = vld [vmem:[#allocation2 + $0xae4] ss:$8 sps:$4 sm:$0xff]  }
 0x358   :  { %3182 = vmatprep.subr.bf16.mxu0 %v9072_v10  ;;  %v9112_v10 = vld [vmem:[#allocation2 + $0xae0] ss:$8 sps:$4 sm:$0xff]  }
 0x359   :  { %3501 = vmatpush1.bf16.msra.mxu1 %v9212_v47  ;;  %v9264_v47 = vld [vmem:[#allocation13] ss:$8 sps:$4 sm:$0xff]  }
 0x35a   :  { %3174 = vmatmul.mubr.bf16.vlgmr.msra.gmra.mrb[0].mxu0 %v824_v13  ;;  %v9117_v13 = vld [vmem:[#allocation2 + $0xaf4] ss:$8 sps:$4 sm:$0xff]  }
 0x35b   :  { %3183 = vmatpush1.bf16.msra.mxu0 %v9070_v15  ;;  %3214 = vmatprep.mubr.bf16.mxu0 %v10210_v16  ;;  %v9115_v15 = vld [vmem:[#allocation2 + $0xaf0] ss:$8 sps:$4 sm:$0xff]   ;;  %v9137_v16 = vld [vmem:[#allocation2 + $0xb54] ss:$8 sps:$4 sm:$0xff]  }
 0x35c   :  { %3184 = vmatprep.subr.bf16.mxu0 %v9075_v19  ;;  %v9122_v19 = vld [vmem:[#allocation2 + $0xb04] ss:$8 sps:$4 sm:$0xff]  }
 0x35f   :  { %3185 = vmatpush1.bf16.msra.mxu0 %v9073_v0  ;;  %v9125_v0 = vld [vmem:[#allocation2 + $0xb14] ss:$8 sps:$4 sm:$0xff]  }
 0x360   :  { %3186 = vmatprep.subr.bf16.mxu0 %v9078_v5  ;;  %v9123_v5 = vld [vmem:[#allocation2 + $0xb10] ss:$8 sps:$4 sm:$0xff]  }
 0x363   :  { %3187 = vmatpush1.bf16.msra.mxu0 %v9076_v24  ;;  %v9135_v24 = vld [vmem:[#allocation2 + $0xb50] ss:$8 sps:$4 sm:$0xff]  }
 0x364   :  { %3188 = vmatprep.subr.bf16.mxu0 %v9081_v27  ;;  %v9140_v27 = vld [vmem:[#allocation2 + $0xb64] ss:$8 sps:$4 sm:$0xff]  }
 0x367   :  { %3189 = vmatpush1.bf16.msra.mxu0 %v9079_v31  ;;  %v9141_v31 = vld [vmem:[#allocation2 + $0xb70] ss:$8 sps:$4 sm:$0xff]  }
 0x368   :  { %3190 = vmatprep.subr.bf16.mxu0 %v9084_v32  ;;  %v9146_v32 = vld [vmem:[#allocation2 + $0xb84] ss:$8 sps:$4 sm:$0xff]  }
 0x36b   :  { %3191 = vmatpush1.bf16.msra.mxu0 %v9082_v12  ;;  %v9147_v12 = vld [vmem:[#allocation2 + $0xb90] ss:$8 sps:$4 sm:$0xff]  }
 0x36c   :  { %3192 = vmatprep.subr.bf16.mxu0 %v9087_v17  ;;  %v9152_v17 = vld [vmem:[#allocation2 + $0xba4] ss:$8 sps:$4 sm:$0xff]  }
 0x36f   :  { %3193 = vmatpush1.bf16.msra.mxu0 %v9085_v36  ;;  %v9153_v36 = vld [vmem:[#allocation2 + $0xbb0] ss:$8 sps:$4 sm:$0xff]  }
 0x370   :  { %3194 = vmatprep.subr.bf16.mxu0 %v9090_v39  ;;  %v9158_v39 = vld [vmem:[#allocation2 + $0xbc4] ss:$8 sps:$4 sm:$0xff]  }
 0x373   :  { %3195 = vmatpush1.bf16.msra.mxu0 %v9088_v43  ;;  %v9159_v43 = vld [vmem:[#allocation2 + $0xbd0] ss:$8 sps:$4 sm:$0xff]  }
 0x374   :  { %3196 = vmatprep.subr.bf16.mxu0 %v9093_v44  ;;  %v9164_v44 = vld [vmem:[#allocation2 + $0xbe4] ss:$8 sps:$4 sm:$0xff]  }
 0x377   :  { %3197 = vmatpush1.bf16.msra.mxu0 %v9091_v26  ;;  %v9165_v26 = vld [vmem:[#allocation2 + $0xbf0] ss:$8 sps:$4 sm:$0xff]  }
 0x378   :  { %3198 = vmatprep.subr.bf16.mxu0 %v9096_v30  ;;  %v825_v30 = vcombine.high %v10217_v20, %v10217_v20 }
 0x37b   :  { %3199 = vmatpush1.bf16.msra.mxu0 %v9094_v50  ;;  %v9213_v50 = vld [vmem:[#allocation7 + $0xf4] ss:$8 sps:$4 sm:$0xff]  }
 0x37c   :  { %3200 = vmatprep.subr.bf16.mxu0 %v9099_v51  ;;  %v9215_v51 = vld [vmem:[#allocation7 + $0xf0] ss:$8 sps:$4 sm:$0xff]   ;;  %3502 = vmatprep.subr.bf16.mxu1 %v9213_v50 }
 0x37d   :  { %3503 = vmatpush1.bf16.msra.mxu1 %v9215_v51  ;;  %v9269_v51 = vld [vmem:[#allocation13 + $0x14] ss:$8 sps:$4 sm:$0xff]  }
 0x37e   :  { %3721 = vmatprep.subr.bf16.mxu1 %v9218_v52  ;;  %v9267_v52 = vld [vmem:[#allocation13 + $0x10] ss:$8 sps:$4 sm:$0xff]  }
 0x37f   :  { %3201 = vmatpush1.bf16.msra.mxu0 %v9097_v55  ;;  %v600_v55 = vld [vmem:[#allocation5] sm:$0x3] }
 0x380   :  { %3202 = vmatprep.subr.bf16.mxu0 %v9102_v56  ;;  %v10228_v56 = vsub.s32 1, %v10049_v14  ;;  %v605_v57 = vrot.slane %v600_v55, %v10225_v54 }
 0x382   :  { %v609_v58 = vrot.slane %v600_v55, %v10228_v56  ;;  %v9272_v55 = vld [vmem:[#allocation13 + $0x24] ss:$8 sps:$4 sm:$0xff]  }
 0x383   :  { %3203 = vmatpush1.bf16.msra.mxu0 %v9100_v59 }
 0x384   :  { %3204 = vmatprep.subr.bf16.mxu0 %v9105_v60 }
 0x387   :  { %3205 = vmatpush1.bf16.msra.mxu0 %v9103_v1 }
 0x388   :  { %3206 = vmatprep.subr.bf16.mxu0 %v9108_v2 }
 0x38b   :  { %3207 = vmatpush1.bf16.msra.mxu0 %v9106_v6 }
 0x38c   :  { %3208 = vmatprep.subr.bf16.mxu0 %v9111_v7  ;;  %v9216_v7 = vld [vmem:[#allocation10] ss:$8 sps:$4 sm:$0xff]  }
 0x38f   :  { %3209 = vmatpush1.bf16.msra.mxu0 %v9109_v53  ;;  %v9219_v53 = vld [vmem:[#allocation10 + $0x10] ss:$8 sps:$4 sm:$0xff]  }
 0x390   :  { %3210 = vmatprep.subr.bf16.mxu0 %v9114_v8  ;;  %v9224_v8 = vld [vmem:[#allocation10 + $0x24] ss:$8 sps:$4 sm:$0xff]  }
 0x393   :  { %3211 = vmatpush1.bf16.msra.mxu0 %v9112_v10  ;;  %v9227_v10 = vld [vmem:[#allocation10 + $0x34] ss:$8 sps:$4 sm:$0xff]  }
 0x394   :  { %3212 = vmatprep.subr.bf16.mxu0 %v9117_v13  ;;  %v9225_v13 = vld [vmem:[#allocation10 + $0x30] ss:$8 sps:$4 sm:$0xff]  }
 0x397   :  { %3213 = vmatpush1.bf16.msra.mxu0 %v9115_v15  ;;  %v9230_v15 = vld [vmem:[#allocation10 + $0x44] ss:$8 sps:$4 sm:$0xff]  }
 0x398   :  { %3223 = vmatprep.subr.bf16.mxu0 %v9122_v19  ;;  %v9228_v19 = vld [vmem:[#allocation10 + $0x40] ss:$8 sps:$4 sm:$0xff]  }
 0x39a   :  { %3215 = vmatmul.mubr.bf16.vlgmr.msra.gmra.mrb[0].mxu0 %v10217_v20  ;;  %v9233_v20 = vld [vmem:[#allocation10 + $0x54] ss:$8 sps:$4 sm:$0xff]  }
 0x39b   :  { %3224 = vmatpush1.bf16.msra.mxu0 %v9120_v21  ;;  %3255 = vmatprep.mubr.bf16.mxu0 %v827_v63  ;;  %v9231_v21 = vld [vmem:[#allocation10 + $0x50] ss:$8 sps:$4 sm:$0xff]   ;;  %v9236_v63 = vld [vmem:[#allocation10 + $0x64] ss:$8 sps:$4 sm:$0xff]  }
 0x39c   :  { %3225 = vmatprep.subr.bf16.mxu0 %v9125_v0  ;;  %v9234_v0 = vld [vmem:[#allocation10 + $0x60] ss:$8 sps:$4 sm:$0xff]  }
 0x39f   :  { %3226 = vmatpush1.bf16.msra.mxu0 %v9123_v5  ;;  %v9239_v5 = vld [vmem:[#allocation10 + $0x74] ss:$8 sps:$4 sm:$0xff]  }
 0x3a0   :  { %3227 = vmatprep.subr.bf16.mxu0 %v9128_v22  ;;  %v9237_v22 = vld [vmem:[#allocation10 + $0x70] ss:$8 sps:$4 sm:$0xff]  }
 0x3a3   :  { %3228 = vmatpush1.bf16.msra.mxu0 %v9126_v23  ;;  %v9242_v23 = vld [vmem:[#allocation10 + $0x84] ss:$8 sps:$4 sm:$0xff]  }
 0x3a4   :  { %3229 = vmatprep.subr.bf16.mxu0 %v9131_v37  ;;  %v9240_v37 = vld [vmem:[#allocation10 + $0x80] ss:$8 sps:$4 sm:$0xff]  }
 0x3a7   :  { %3230 = vmatpush1.bf16.msra.mxu0 %v9129_v18  ;;  %v9245_v18 = vld [vmem:[#allocation10 + $0x94] ss:$8 sps:$4 sm:$0xff]  }
 0x3a8   :  { %3231 = vmatprep.subr.bf16.mxu0 %v9134_v38  ;;  %v9243_v38 = vld [vmem:[#allocation10 + $0x90] ss:$8 sps:$4 sm:$0xff]  }
 0x3ab   :  { %3232 = vmatpush1.bf16.msra.mxu0 %v9132_v42  ;;  %v9248_v42 = vld [vmem:[#allocation10 + $0xa4] ss:$8 sps:$4 sm:$0xff]  }
 0x3ac   :  { %3233 = vmatprep.subr.bf16.mxu0 %v9137_v16  ;;  %v9246_v16 = vld [vmem:[#allocation10 + $0xa0] ss:$8 sps:$4 sm:$0xff]  }
 0x3af   :  { %3234 = vmatpush1.bf16.msra.mxu0 %v9135_v24  ;;  %v9251_v24 = vld [vmem:[#allocation10 + $0xb4] ss:$8 sps:$4 sm:$0xff]  }
 0x3b0   :  { %3235 = vmatprep.subr.bf16.mxu0 %v9140_v27  ;;  %v9249_v27 = vld [vmem:[#allocation10 + $0xb0] ss:$8 sps:$4 sm:$0xff]  }
 0x3b3   :  { %3236 = vmatpush1.bf16.msra.mxu0 %v9138_v28  ;;  %v9254_v28 = vld [vmem:[#allocation10 + $0xc4] ss:$8 sps:$4 sm:$0xff]  }
 0x3b4   :  { %3237 = vmatprep.subr.bf16.mxu0 %v9143_v29  ;;  %v9252_v29 = vld [vmem:[#allocation10 + $0xc0] ss:$8 sps:$4 sm:$0xff]  }
 0x3b7   :  { %3238 = vmatpush1.bf16.msra.mxu0 %v9141_v31  ;;  %v9257_v31 = vld [vmem:[#allocation10 + $0xd4] ss:$8 sps:$4 sm:$0xff]  }
 0x3b8   :  { %3239 = vmatprep.subr.bf16.mxu0 %v9146_v32  ;;  %v9255_v32 = vld [vmem:[#allocation10 + $0xd0] ss:$8 sps:$4 sm:$0xff]  }
 0x3bb   :  { %3240 = vmatpush1.bf16.msra.mxu0 %v9144_v33  ;;  %v9260_v33 = vld [vmem:[#allocation10 + $0xe4] ss:$8 sps:$4 sm:$0xff]  }
 0x3bc   :  { %3241 = vmatprep.subr.bf16.mxu0 %v9149_v11  ;;  %v9258_v11 = vld [vmem:[#allocation10 + $0xe0] ss:$8 sps:$4 sm:$0xff]  }
 0x3bf   :  { %3242 = vmatpush1.bf16.msra.mxu0 %v9147_v12  ;;  %v9263_v12 = vld [vmem:[#allocation10 + $0xf4] ss:$8 sps:$4 sm:$0xff]  }
 0x3c0   :  { %3243 = vmatprep.subr.bf16.mxu0 %v9152_v17  ;;  %v9261_v17 = vld [vmem:[#allocation10 + $0xf0] ss:$8 sps:$4 sm:$0xff]  }
 0x3c3   :  { %3244 = vmatpush1.bf16.msra.mxu0 %v9150_v34  ;;  %v9266_v34 = vld [vmem:[#allocation13 + $0x4] ss:$8 sps:$4 sm:$0xff]  }
 0x3c4   :  { %3245 = vmatprep.subr.bf16.mxu0 %v9155_v35  ;;  %v3300_v35 = vld [vmem:[#allocation8] sm:$0x3] }
 0x3c7   :  { %3246 = vmatpush1.bf16.msra.mxu0 %v9153_v36  ;;  %v3305_v36 = vrot.slane %v3300_v35, %v10225_v54 }
 0x3c8   :  { %3247 = vmatprep.subr.bf16.mxu0 %v9158_v39  ;;  %v3309_v39 = vrot.slane %v3300_v35, %v10228_v56  ;;  %v9314_v35 = vld [vmem:[#allocation16 + $0x84] ss:$8 sps:$4 sm:$0xff]  }
 0x3cb   :  { %3248 = vmatpush1.bf16.msra.mxu0 %v9156_v40 }
 0x3cc   :  { %3249 = vmatprep.subr.bf16.mxu0 %v9161_v41 }
 0x3cf   :  { %3250 = vmatpush1.bf16.msra.mxu0 %v9159_v43 }
 0x3d0   :  { %3251 = vmatprep.subr.bf16.mxu0 %v9164_v44 }
 0x3d3   :  { %3252 = vmatpush1.bf16.msra.mxu0 %v9162_v45 }
 0x3d4   :  { %3253 = vmatprep.subr.bf16.mxu0 %v9167_v25 }
 0x3d7   :  { %3254 = vmatpush1.bf16.msra.mxu0 %v9165_v26 }
 0x3da   :  { %3256 = vmatmul.mubr.bf16.vlgmr.msra.gmra.mrb[0].mxu0 %v825_v30 }
 0x4ad   :  { %v3257_v59 = vpop.f32.mrb[0].mxu0 }
 0x4ae   :  { %v8505_v60 = vadd.f32 %v3257_v59, %v605_v57  ;;  %v3259_v61 = vpop.f32.mrb[1].mxu0  ;;  %v9270_v57 = vld [vmem:[#allocation13 + $0x20] ss:$8 sps:$4 sm:$0xff]   ;;  %v9273_v59 = vld [vmem:[#allocation13 + $0x30] ss:$8 sps:$4 sm:$0xff]  }
 0x4af   :  { %v8506_v62 = vadd.f32 %v3259_v61, %v609_v58  ;;  %v3261_v1 = vpop.f32.mrb[2].mxu0  ;;  %v9275_v58 = vld [vmem:[#allocation13 + $0x34] ss:$8 sps:$4 sm:$0xff]   ;;  %v9276_v61 = vld [vmem:[#allocation13 + $0x40] ss:$8 sps:$4 sm:$0xff]  }
 0x4b0   :  { %v3264_v2 = vmax.f32 %v8505_v60, 0.0  ;;  %v3262_v3 = vpop.f32.mrb[3].mxu0  ;;  %v9278_v60 = vld [vmem:[#allocation13 + $0x44] ss:$8 sps:$4 sm:$0xff]   ;;  %v9279_v1 = vld [vmem:[#allocation13 + $0x50] ss:$8 sps:$4 sm:$0xff]  }
 0x4b1   :  { %v3265_v4 = vmax.f32 %v8506_v62, 0.0  ;;  %v9281_v62 = vld [vmem:[#allocation13 + $0x54] ss:$8 sps:$4 sm:$0xff]   ;;  %v9778_v3 = vmov 0  }
 0x4b2   :  { %v3266_v48 = vpack.c.bf16 %v3264_v2, %v3264_v2  ;;  %v9284_v2 = vld [vmem:[#allocation13 + $0x64] ss:$8 sps:$4 sm:$0xff]  }
 0x4b3   :  { %v3267_v6 = vpack.c.bf16 %v3265_v4, %v3265_v4  ;;  %v9282_v4 = vld [vmem:[#allocation13 + $0x60] ss:$8 sps:$4 sm:$0xff]  }
 0x4b5   :  { %3504 = vmatprep.mubr.bf16.mxu1 %v3267_v6  ;;  %v9287_v6 = vld [vmem:[#allocation13 + $0x74] ss:$8 sps:$4 sm:$0xff]  }
 0x4b6   :  { %3505 = vmatmul.mubr.bf16.vlgmr.msra.gmra.mrb[0].mxu1 %v3266_v48  ;;  %v9290_v48 = vld [vmem:[#allocation16 + $0x4] ss:$8 sps:$4 sm:$0xff]  }
 0x4b7   :  { %3722 = vmatpush1.bf16.msra.mxu1 %v9216_v7  ;;  %v9285_v7 = vld [vmem:[#allocation13 + $0x70] ss:$8 sps:$4 sm:$0xff]  }
 0x4b8   :  { %3723 = vmatprep.subr.bf16.mxu1 %v9221_v49  ;;  %v3549_v49 = vld [vmem:[#allocation11] sm:$0x3] }
 0x4bb   :  { %3724 = vmatpush1.bf16.msra.mxu1 %v9219_v53  ;;  %v3554_v53 = vrot.slane %v3549_v49, %v10225_v54 }
 0x4bc   :  { %3725 = vmatprep.subr.bf16.mxu1 %v9224_v8  ;;  %v3558_v8 = vrot.slane %v3549_v49, %v10228_v56 }
 0x4bf   :  { %3726 = vmatpush1.bf16.msra.mxu1 %v9222_v9 }
 0x4c0   :  { %3727 = vmatprep.subr.bf16.mxu1 %v9227_v10 }
 0x4c3   :  { %3728 = vmatpush1.bf16.msra.mxu1 %v9225_v13 }
 0x4c4   :  { %3729 = vmatprep.subr.bf16.mxu1 %v9230_v15 }
 0x4c7   :  { %3730 = vmatpush1.bf16.msra.mxu1 %v9228_v19 }
 0x4c8   :  { %3731 = vmatprep.subr.bf16.mxu1 %v9233_v20 }
 0x4cb   :  { %3732 = vmatpush1.bf16.msra.mxu1 %v9231_v21 }
 0x4cc   :  { %3733 = vmatprep.subr.bf16.mxu1 %v9236_v63 }
 0x4cf   :  { %3734 = vmatpush1.bf16.msra.mxu1 %v9234_v0  ;;  %v3762_v0 = vld [vmem:[%s10453_s1] sm:$0xff] }
 0x4d0   :  { %3735 = vmatprep.subr.bf16.mxu1 %v9239_v5 }
 0x4d3   :  { %3736 = vmatpush1.bf16.msra.mxu1 %v9237_v22 }
 0x4d4   :  { %3737 = vmatprep.subr.bf16.mxu1 %v9242_v23 }
 0x4d7   :  { %3738 = vmatpush1.bf16.msra.mxu1 %v9240_v37  ;;  %v9288_v37 = vld [vmem:[#allocation16] ss:$8 sps:$4 sm:$0xff]  }
 0x4d8   :  { %3739 = vmatprep.subr.bf16.mxu1 %v9245_v18 }
 0x4db   :  { %3740 = vmatpush1.bf16.msra.mxu1 %v9243_v38  ;;  %v9293_v38 = vld [vmem:[#allocation16 + $0x14] ss:$8 sps:$4 sm:$0xff]  }
 0x4dc   :  { %3741 = vmatprep.subr.bf16.mxu1 %v9248_v42  ;;  %v9291_v42 = vld [vmem:[#allocation16 + $0x10] ss:$8 sps:$4 sm:$0xff]  }
 0x4df   :  { %3742 = vmatpush1.bf16.msra.mxu1 %v9246_v16  ;;  %v9296_v16 = vld [vmem:[#allocation16 + $0x24] ss:$8 sps:$4 sm:$0xff]  }
 0x4e0   :  { %3743 = vmatprep.subr.bf16.mxu1 %v9251_v24  ;;  %v9294_v24 = vld [vmem:[#allocation16 + $0x20] ss:$8 sps:$4 sm:$0xff]  }
 0x4e3   :  { %3744 = vmatpush1.bf16.msra.mxu1 %v9249_v27  ;;  %v9299_v27 = vld [vmem:[#allocation16 + $0x34] ss:$8 sps:$4 sm:$0xff]  }
 0x4e4   :  { %3745 = vmatprep.subr.bf16.mxu1 %v9254_v28  ;;  %v9297_v28 = vld [vmem:[#allocation16 + $0x30] ss:$8 sps:$4 sm:$0xff]  }
 0x4e7   :  { %3746 = vmatpush1.bf16.msra.mxu1 %v9252_v29  ;;  %v9302_v29 = vld [vmem:[#allocation16 + $0x44] ss:$8 sps:$4 sm:$0xff]  }
 0x4e8   :  { %3747 = vmatprep.subr.bf16.mxu1 %v9257_v31  ;;  %v9300_v31 = vld [vmem:[#allocation16 + $0x40] ss:$8 sps:$4 sm:$0xff]  }
 0x4eb   :  { %3748 = vmatpush1.bf16.msra.mxu1 %v9255_v32  ;;  %v9305_v32 = vld [vmem:[#allocation16 + $0x54] ss:$8 sps:$4 sm:$0xff]  }
 0x4ec   :  { %3749 = vmatprep.subr.bf16.mxu1 %v9260_v33  ;;  %v9303_v33 = vld [vmem:[#allocation16 + $0x50] ss:$8 sps:$4 sm:$0xff]  }
 0x4ef   :  { %3750 = vmatpush1.bf16.msra.mxu1 %v9258_v11  ;;  %v9308_v11 = vld [vmem:[#allocation16 + $0x64] ss:$8 sps:$4 sm:$0xff]  }
 0x4f0   :  { %3751 = vmatprep.subr.bf16.mxu1 %v9263_v12  ;;  %v9306_v12 = vld [vmem:[#allocation16 + $0x60] ss:$8 sps:$4 sm:$0xff]  }
 0x4f3   :  { %3752 = vmatpush1.bf16.msra.mxu1 %v9261_v17  ;;  %v9311_v17 = vld [vmem:[#allocation16 + $0x74] ss:$8 sps:$4 sm:$0xff]  }
 0x4f4   :  { %3877 = vmatprep.subr.bf16.mxu1 %v9266_v34  ;;  %v9309_v34 = vld [vmem:[#allocation16 + $0x70] ss:$8 sps:$4 sm:$0xff]  }
 0x589   :  { %v3506_v40 = vpop.f32.mrb[0].mxu1 }
 0x58a   :  { %v3507_v41 = vadd.f32 %v3506_v40, %v3305_v36  ;;  %v3508_v43 = vpop.f32.mrb[1].mxu1  ;;  %v9312_v36 = vld [vmem:[#allocation16 + $0x80] ss:$8 sps:$4 sm:$0xff]   ;;  %v9315_v40 = vld [vmem:[#allocation16 + $0x90] ss:$8 sps:$4 sm:$0xff]  }
 0x58b   :  { %v3509_v44 = vadd.f32 %v3508_v43, %v3309_v39  ;;  %v3510_v45 = vpop.f32.mrb[2].mxu1  ;;  %v9317_v39 = vld [vmem:[#allocation16 + $0x94] ss:$8 sps:$4 sm:$0xff]   ;;  %v9318_v43 = vld [vmem:[#allocation16 + $0xa0] ss:$8 sps:$4 sm:$0xff]  }
 0x58c   :  { %v3513_v25 = vmax.f32 %v3507_v41, 0.0  ;;  %v3511_v26 = vpop.f32.mrb[3].mxu1  ;;  %v9320_v41 = vld [vmem:[#allocation16 + $0xa4] ss:$8 sps:$4 sm:$0xff]   ;;  %v9321_v45 = vld [vmem:[#allocation16 + $0xb0] ss:$8 sps:$4 sm:$0xff]  }
 0x58d   :  { %v3514_v30 = vmax.f32 %v3509_v44, 0.0  ;;  %v9323_v44 = vld [vmem:[#allocation16 + $0xb4] ss:$8 sps:$4 sm:$0xff]   ;;  %v9324_v26 = vld [vmem:[#allocation16 + $0xc0] ss:$8 sps:$4 sm:$0xff]  }
 0x58e   :  { %v3515_v50 = vpack.c.bf16 %v3513_v25, %v3513_v25  ;;  %v9326_v25 = vld [vmem:[#allocation16 + $0xc4] ss:$8 sps:$4 sm:$0xff]  }
 0x58f   :  { %v3516_v46 = vpack.c.bf16 %v3514_v30, %v3514_v30  ;;  %v9329_v30 = vld [vmem:[#allocation16 + $0xd4] ss:$8 sps:$4 sm:$0xff]  }
 0x591   :  { %3753 = vmatprep.mubr.bf16.mxu1 %v3516_v46  ;;  %v9327_v46 = vld [vmem:[#allocation16 + $0xd0] ss:$8 sps:$4 sm:$0xff]  }
 0x592   :  { %3754 = vmatmul.mubr.bf16.vlgmr.msra.gmra.mrb[4].mxu1 %v3515_v50  ;;  %v9330_v50 = vld [vmem:[#allocation16 + $0xe0] ss:$8 sps:$4 sm:$0xff]  }
 0x593   :  { %3878 = vmatpush1.bf16.msra.mxu1 %v9264_v47  ;;  %3909 = vmatprep.mubr.bf16.mxu1 %v9778_v3  ;;  %v9332_v47 = vld [vmem:[#allocation16 + $0xe4] ss:$8 sps:$4 sm:$0xff]  }
 0x594   :  { %3879 = vmatprep.subr.bf16.mxu1 %v9269_v51  ;;  %v9335_v51 = vld [vmem:[#allocation16 + $0xf4] ss:$8 sps:$4 sm:$0xff]   ;;  %v4216_v3 = vld [vmem:[#allocation19 + $0x168] sm:$0xff] }
 0x597   :  { %3880 = vmatpush1.bf16.msra.mxu1 %v9267_v52  ;;  %v9333_v52 = vld [vmem:[#allocation16 + $0xf0] ss:$8 sps:$4 sm:$0xff]  }
 0x598   :  { %3881 = vmatprep.subr.bf16.mxu1 %v9272_v55  ;;  %v10239_v55 = vld [vmem:[#allocation19] sm:$0xff] }
 0x59b   :  { %3882 = vmatpush1.bf16.msra.mxu1 %v9270_v57  ;;  %v10241_v57 = vld [vmem:[#allocation19 + $0x60] sm:$0xff] }
 0x59c   :  { %3883 = vmatprep.subr.bf16.mxu1 %v9275_v58  ;;  %v4180_v58 = vld [vmem:[#allocation19 + $0x48] sm:$0xff] }
 0x59f   :  { %3884 = vmatpush1.bf16.msra.mxu1 %v9273_v59  ;;  %v8097_v59 = vcombine.low %v10239_v55, %v10241_v57 }
 0x5a0   :  { %3885 = vmatprep.subr.bf16.mxu1 %v9278_v60  ;;  %v8098_v60 = vcombine.high %v10239_v55, %v10241_v57 }
 0x5a3   :  { %3886 = vmatpush1.bf16.msra.mxu1 %v9276_v61  ;;  %v4192_v61 = vld [vmem:[#allocation19 + $0xa8] sm:$0xff] }
 0x5a4   :  { %3887 = vmatprep.subr.bf16.mxu1 %v9281_v62  ;;  %v8115_v62 = vcombine.low %v4180_v58, %v4192_v61 }
 0x5a7   :  { %3888 = vmatpush1.bf16.msra.mxu1 %v9279_v1  ;;  %v8116_v1 = vcombine.high %v4180_v58, %v4192_v61 }
 0x5a8   :  { %3889 = vmatprep.subr.bf16.mxu1 %v9284_v2  ;;  %v4204_v2 = vld [vmem:[#allocation19 + $0x108] sm:$0xff] }
 0x5a9   :  { %6970 = vmatprep.subr.bf16.mxu0 %v8116_v1 }
 0x5aa   :  { %6971 = vmatpush1.bf16.msra.mxu0 %v8115_v62 }
 0x5ab   :  { %3890 = vmatpush1.bf16.msra.mxu1 %v9282_v4  ;;  %v8140_v4 = vcombine.high %v4204_v2, %v4216_v3 }
 0x5ac   :  { %3891 = vmatprep.subr.bf16.mxu1 %v9287_v6  ;;  %v8139_v6 = vcombine.low %v4204_v2, %v4216_v3 }
 0x5ad   :  { %6972 = vmatprep.subr.bf16.mxu0 %v8140_v4 }
 0x5ae   :  { %6973 = vmatpush1.bf16.msra.mxu0 %v8139_v6 }
 0x5af   :  { %3892 = vmatpush1.bf16.msra.mxu1 %v9285_v7  ;;  %v4228_v7 = vld [vmem:[#allocation19 + $0x1c8] sm:$0xff] }
 0x5b0   :  { %4126 = vmatprep.subr.bf16.mxu1 %v9290_v48  ;;  %v4240_v48 = vld [vmem:[#allocation19 + $0x228] sm:$0xff] }
 0x5b1   :  { %v8164_v49 = vcombine.high %v4228_v7, %v4240_v48 }
 0x5b3   :  { %6974 = vmatprep.subr.bf16.mxu0 %v8164_v49  ;;  %v4207_v49 = vld [vmem:[#allocation19 + $0x120] sm:$0xff] }
 0x665   :  { %v3755_v9 = vpop.f32.mrb[4].mxu1 }
 0x666   :  { %v3756_v10 = vadd.f32 %v3755_v9, %v3554_v53  ;;  %v3757_v13 = vpop.f32.mrb[5].mxu1  ;;  %v8163_v53 = vcombine.low %v4228_v7, %v4240_v48  ;;  %v4264_v9 = vld [vmem:[#allocation19 + $0x2e8] sm:$0xff]  ;;  %v4195_v48 = vld [vmem:[#allocation19 + $0xc0] sm:$0xff] }
 0x667   :  { %v3758_v15 = vadd.f32 %v3757_v13, %v3558_v8  ;;  %v3759_v19 = vpop.f32.mrb[6].mxu1  ;;  %v4252_v8 = vld [vmem:[#allocation19 + $0x288] sm:$0xff] }
 0x668   :  { %7525 = vst [vmem:[#allocation23] sm:$0xff] %v3756_v10  ;;  %v3760_v20 = vpop.f32.mrb[7].mxu1  ;;  %6975 = vmatpush1.bf16.msra.mxu0 %v8163_v53  ;;  %v8187_v13 = vcombine.low %v4252_v8, %v4264_v9  ;;  %v4288_v19 = vld [vmem:[#allocation19 + $0x3a8] sm:$0xff] }
 0x669   :  { %v3763_v21 = vmul.f32 0.5, %v3758_v15  ;;  %7526 = vst [vmem:[#allocation24] sm:$0xff] %v3758_v15  ;;  %v4276_v15 = vld [vmem:[#allocation19 + $0x348] sm:$0xff] }
 0x66a   :  { %v8212_v20 = vcombine.high %v4276_v15, %v4288_v19 }
 0x66b   :  { %v3764_v63 = vmul.f32 1.442695, %v3763_v21  ;;  %v8211_v21 = vcombine.low %v4276_v15, %v4288_v19  ;;  %v8121_v15 = vcombine.low %v4195_v48, %v4207_v49 }
 0x66d   :  { %9336 = vpow2.f32 %v3764_v63  ;;  %v4300_v63 = vld [vmem:[#allocation19 + $0x408] sm:$0xff] }
 0x677   :  { %v9337_v5 = vpop.eup %9336 }
 0x678   :  { %v3766_v22 = vmul.f32 %v9337_v5, %v3762_v0  ;;  %v4312_v0 = vld [vmem:[#allocation19 + $0x468] sm:$0xff] }
 0x679   :  { %v8236_v5 = vcombine.high %v4300_v63, %v4312_v0 }
 0x67a   :  { %v3767_v23 = vadd.f32 %v3766_v22, %v3756_v10  ;;  %v8188_v10 = vcombine.high %v4252_v8, %v4264_v9  ;;  %v8235_v22 = vcombine.low %v4300_v63, %v4312_v0  ;;  %v8122_v9 = vcombine.high %v4195_v48, %v4207_v49  ;;  %v4531_v49 = vld [vmem:[#allocation19 + $0xb40] sm:$0xff] }
 0x67c   :  { %v3768_v18 = vpack.c.bf16 %v3767_v23, %v3767_v23  ;;  %6976 = vmatprep.subr.bf16.mxu0 %v8188_v10  ;;  %v4324_v23 = vld [vmem:[#allocation19 + $0x4c8] sm:$0xff]  ;;  %v4219_v10 = vld [vmem:[#allocation19 + $0x180] sm:$0xff] }
 0x67d   :  { %6977 = vmatpush1.bf16.msra.mxu0 %v8187_v13  ;;  %v4231_v13 = vld [vmem:[#allocation19 + $0x1e0] sm:$0xff] }
 0x67e   :  { %3910 = vmatmul.mubr.bf16.vlgmr.msra.gmra.mrb[8].mxu1 %v3768_v18  ;;  %6978 = vmatprep.subr.bf16.mxu0 %v8212_v20  ;;  %v8146_v19 = vcombine.high %v4219_v10, %v4231_v13  ;;  %v4243_v20 = vld [vmem:[#allocation19 + $0x240] sm:$0xff]  ;;  %v8145_v63 = vcombine.low %v4219_v10, %v4231_v13  ;;  %v4552_v10 = vld [vmem:[#allocation19 + $0xbe8] sm:$0xff] }
 0x67f   :  { %4127 = vmatpush1.bf16.msra.mxu1 %v9288_v37  ;;  %v4336_v37 = vld [vmem:[#allocation19 + $0x528] sm:$0xff] }
 0x680   :  { %4128 = vmatprep.subr.bf16.mxu1 %v9293_v38  ;;  %v8260_v18 = vcombine.high %v4324_v23, %v4336_v37  ;;  %v8259_v38 = vcombine.low %v4324_v23, %v4336_v37 }
 0x681   :  { %6979 = vmatpush1.bf16.msra.mxu0 %v8211_v21  ;;  %v4255_v21 = vld [vmem:[#allocation19 + $0x2a0] sm:$0xff] }
 0x682   :  { %6980 = vmatprep.subr.bf16.mxu0 %v8236_v5  ;;  %v8170_v0 = vcombine.high %v4243_v20, %v4255_v21  ;;  %v4267_v5 = vld [vmem:[#allocation19 + $0x300] sm:$0xff]  ;;  %v8169_v23 = vcombine.low %v4243_v20, %v4255_v21  ;;  %v4172_v20 = vld [vmem:[#allocation19 + $0x8] sm:$0xff] }
 0x683   :  { %4129 = vmatpush1.bf16.msra.mxu1 %v9291_v42  ;;  %v4348_v42 = vld [vmem:[#allocation19 + $0x588] sm:$0xff] }
 0x684   :  { %4130 = vmatprep.subr.bf16.mxu1 %v9296_v16  ;;  %v4360_v16 = vld [vmem:[#allocation19 + $0x5e8] sm:$0xff] }
 0x685   :  { %6981 = vmatpush1.bf16.msra.mxu0 %v8235_v22  ;;  %v4279_v22 = vld [vmem:[#allocation19 + $0x360] sm:$0xff]  ;;  %v4184_v21 = vld [vmem:[#allocation19 + $0x68] sm:$0xff] }
 0x686   :  { %6982 = vmatprep.subr.bf16.mxu0 %v8260_v18  ;;  %v8194_v37 = vcombine.high %v4267_v5, %v4279_v22  ;;  %v4291_v18 = vld [vmem:[#allocation19 + $0x3c0] sm:$0xff]  ;;  %v8193_v55 = vcombine.low %v4267_v5, %v4279_v22  ;;  %v4194_v5 = vld [vmem:[#allocation19 + $0xb8] sm:$0xff]  ;;  %v8099_v22 = vcombine.low %v4172_v20, %v4184_v21 }
 0x687   :  { %4131 = vmatpush1.bf16.msra.mxu1 %v9294_v24  ;;  %v8284_v24 = vcombine.high %v4348_v42, %v4360_v16 }
 0x688   :  { %4132 = vmatprep.subr.bf16.mxu1 %v9299_v27  ;;  %v8283_v27 = vcombine.low %v4348_v42, %v4360_v16  ;;  %v4327_v42 = vld [vmem:[#allocation19 + $0x4e0] sm:$0xff] }
 0x689   :  { %6983 = vmatpush1.bf16.msra.mxu0 %v8259_v38  ;;  %v4303_v38 = vld [vmem:[#allocation19 + $0x420] sm:$0xff] }
 0x68a   :  { %6984 = vmatprep.subr.bf16.mxu0 %v8284_v24  ;;  %v8218_v57 = vcombine.high %v4291_v18, %v4303_v38  ;;  %v8217_v16 = vcombine.low %v4291_v18, %v4303_v38  ;;  %v3954_v18 = vld [vmem:[#allocation17] sm:$0x3] }
 0x68b   :  { %4133 = vmatpush1.bf16.msra.mxu1 %v9297_v28  ;;  %v4372_v28 = vld [vmem:[#allocation19 + $0x648] sm:$0xff]  ;;  %v3959_v38 = vrot.slane %v3954_v18, %v10225_v54 }
 0x68c   :  { %4134 = vmatprep.subr.bf16.mxu1 %v9302_v29  ;;  %v4384_v29 = vld [vmem:[#allocation19 + $0x6a8] sm:$0xff] }
 0x68d   :  { %6985 = vmatpush1.bf16.msra.mxu0 %v8283_v27  ;;  %v4339_v27 = vld [vmem:[#allocation19 + $0x540] sm:$0xff] }
 0x68f   :  { %4135 = vmatpush1.bf16.msra.mxu1 %v9300_v31  ;;  %v8308_v31 = vcombine.high %v4372_v28, %v4384_v29 }
 0x690   :  { %4136 = vmatprep.subr.bf16.mxu1 %v9305_v32  ;;  %v8307_v32 = vcombine.low %v4372_v28, %v4384_v29  ;;  %v4351_v28 = vld [vmem:[#allocation19 + $0x5a0] sm:$0xff] }
 0x691   :  { %6986 = vmatprep.subr.bf16.mxu0 %v8308_v31  ;;  %v8266_v31 = vcombine.high %v4339_v27, %v4351_v28 }
 0x692   :  { %6987 = vmatpush1.bf16.msra.mxu0 %v8307_v32  ;;  %v4363_v32 = vld [vmem:[#allocation19 + $0x600] sm:$0xff] }
 0x693   :  { %4137 = vmatpush1.bf16.msra.mxu1 %v9303_v33  ;;  %v4396_v33 = vld [vmem:[#allocation19 + $0x708] sm:$0xff] }
 0x694   :  { %4138 = vmatprep.subr.bf16.mxu1 %v9308_v11  ;;  %v4408_v11 = vld [vmem:[#allocation19 + $0x768] sm:$0xff] }
 0x697   :  { %4139 = vmatpush1.bf16.msra.mxu1 %v9306_v12  ;;  %v8332_v12 = vcombine.high %v4396_v33, %v4408_v11 }
 0x698   :  { %4140 = vmatprep.subr.bf16.mxu1 %v9311_v17  ;;  %v8331_v17 = vcombine.low %v4396_v33, %v4408_v11  ;;  %v4375_v33 = vld [vmem:[#allocation19 + $0x660] sm:$0xff]  ;;  %v8265_v11 = vcombine.low %v4339_v27, %v4351_v28 }
 0x699   :  { %6988 = vmatprep.subr.bf16.mxu0 %v8332_v12  ;;  %v8290_v12 = vcombine.high %v4363_v32, %v4375_v33 }
 0x69a   :  { %6989 = vmatpush1.bf16.msra.mxu0 %v8331_v17  ;;  %v4387_v17 = vld [vmem:[#allocation19 + $0x6c0] sm:$0xff] }
 0x69b   :  { %4141 = vmatpush1.bf16.msra.mxu1 %v9309_v34  ;;  %v4420_v34 = vld [vmem:[#allocation19 + $0x7c8] sm:$0xff] }
 0x69c   :  { %4142 = vmatprep.subr.bf16.mxu1 %v9314_v35  ;;  %v4432_v35 = vld [vmem:[#allocation19 + $0x828] sm:$0xff] }
 0x69f   :  { %4143 = vmatpush1.bf16.msra.mxu1 %v9312_v36  ;;  %v8356_v36 = vcombine.high %v4420_v34, %v4432_v35 }
 0x6a0   :  { %4144 = vmatprep.subr.bf16.mxu1 %v9317_v39  ;;  %v8355_v39 = vcombine.low %v4420_v34, %v4432_v35  ;;  %v4399_v34 = vld [vmem:[#allocation19 + $0x720] sm:$0xff]  ;;  %v8289_v35 = vcombine.low %v4363_v32, %v4375_v33  ;;  %v4208_v32 = vld [vmem:[#allocation19 + $0x128] sm:$0xff]  ;;  %v4206_v33 = vld [vmem:[#allocation19 + $0x118] sm:$0xff] }
 0x6a1   :  { %6990 = vmatprep.subr.bf16.mxu0 %v8356_v36  ;;  %v8314_v36 = vcombine.high %v4387_v17, %v4399_v34 }
 0x6a2   :  { %6991 = vmatpush1.bf16.msra.mxu0 %v8355_v39  ;;  %v4411_v39 = vld [vmem:[#allocation19 + $0x780] sm:$0xff] }
 0x6a3   :  { %4145 = vmatpush1.bf16.msra.mxu1 %v9315_v40  ;;  %v4444_v40 = vld [vmem:[#allocation19 + $0x888] sm:$0xff] }
 0x6a4   :  { %4146 = vmatprep.subr.bf16.mxu1 %v9320_v41  ;;  %v4456_v41 = vld [vmem:[#allocation19 + $0x8e8] sm:$0xff] }
 0x6a7   :  { %4147 = vmatpush1.bf16.msra.mxu1 %v9318_v43  ;;  %v8380_v43 = vcombine.high %v4444_v40, %v4456_v41 }
 0x6a8   :  { %4148 = vmatprep.subr.bf16.mxu1 %v9323_v44  ;;  %v8379_v44 = vcombine.low %v4444_v40, %v4456_v41  ;;  %v4423_v40 = vld [vmem:[#allocation19 + $0x7e0] sm:$0xff]  ;;  %v8313_v41 = vcombine.low %v4387_v17, %v4399_v34  ;;  %v4220_v34 = vld [vmem:[#allocation19 + $0x188] sm:$0xff] }
 0x6a9   :  { %6992 = vmatprep.subr.bf16.mxu0 %v8380_v43  ;;  %v8338_v43 = vcombine.high %v4411_v39, %v4423_v40 }
 0x6aa   :  { %6993 = vmatpush1.bf16.msra.mxu0 %v8379_v44  ;;  %v4435_v44 = vld [vmem:[#allocation19 + $0x840] sm:$0xff] }
 0x6ab   :  { %4149 = vmatpush1.bf16.msra.mxu1 %v9321_v45  ;;  %v4468_v45 = vld [vmem:[#allocation19 + $0x948] sm:$0xff] }
 0x6ac   :  { %4150 = vmatprep.subr.bf16.mxu1 %v9326_v25  ;;  %v4480_v25 = vld [vmem:[#allocation19 + $0x9a8] sm:$0xff] }
 0x6af   :  { %4151 = vmatpush1.bf16.msra.mxu1 %v9324_v26  ;;  %v8404_v26 = vcombine.high %v4468_v45, %v4480_v25 }
 0x6b0   :  { %4152 = vmatprep.subr.bf16.mxu1 %v9329_v30  ;;  %v8403_v30 = vcombine.low %v4468_v45, %v4480_v25  ;;  %v4447_v45 = vld [vmem:[#allocation19 + $0x8a0] sm:$0xff]  ;;  %v8337_v25 = vcombine.low %v4411_v39, %v4423_v40  ;;  %v4232_v39 = vld [vmem:[#allocation19 + $0x1e8] sm:$0xff]  ;;  %v4230_v40 = vld [vmem:[#allocation19 + $0x1d8] sm:$0xff] }
 0x6b1   :  { %6994 = vmatprep.subr.bf16.mxu0 %v8404_v26  ;;  %v8362_v26 = vcombine.high %v4435_v44, %v4447_v45 }
 0x6b2   :  { %6995 = vmatpush1.bf16.msra.mxu0 %v8403_v30  ;;  %v4459_v30 = vld [vmem:[#allocation19 + $0x900] sm:$0xff] }
 0x6b3   :  { %4153 = vmatpush1.bf16.msra.mxu1 %v9327_v46  ;;  %v4492_v46 = vld [vmem:[#allocation19 + $0xa08] sm:$0xff] }
 0x6b4   :  { %4154 = vmatprep.subr.bf16.mxu1 %v9332_v47  ;;  %v4504_v47 = vld [vmem:[#allocation19 + $0xa68] sm:$0xff] }
 0x6b7   :  { %4155 = vmatpush1.bf16.msra.mxu1 %v9330_v50  ;;  %v8428_v50 = vcombine.high %v4492_v46, %v4504_v47 }
 0x6b8   :  { %4156 = vmatprep.subr.bf16.mxu1 %v9335_v51  ;;  %v8427_v51 = vcombine.low %v4492_v46, %v4504_v47  ;;  %v4471_v46 = vld [vmem:[#allocation19 + $0x960] sm:$0xff]  ;;  %v8361_v47 = vcombine.low %v4435_v44, %v4447_v45  ;;  %v8148_v45 = vcombine.high %v4220_v34, %v4232_v39 }
 0x6b9   :  { %6996 = vmatprep.subr.bf16.mxu0 %v8428_v50  ;;  %v8386_v50 = vcombine.high %v4459_v30, %v4471_v46 }
 0x6ba   :  { %6997 = vmatpush1.bf16.msra.mxu0 %v8427_v51  ;;  %v4483_v51 = vld [vmem:[#allocation19 + $0x9c0] sm:$0xff] }
 0x6bb   :  { %4157 = vmatpush1.bf16.msra.mxu1 %v9333_v52  ;;  %v3785_v52 = vld [vmem:[#allocation14] sm:$0x3] }
 0x6bc   :  { %6601 = vmatprep.subr.bf16.mxu1 %v8098_v60  ;;  %v3790_v58 = vrot.slane %v3785_v52, %v10225_v54  ;;  %v3794_v60 = vrot.slane %v3785_v52, %v10228_v56  ;;  %v4495_v52 = vld [vmem:[#allocation19 + $0xa20] sm:$0xff] }
 0x751   :  { %v3911_v61 = vpop.f32.mrb[8].mxu1 }
 0x752   :  { %v3912_v62 = vadd.f32 %v3911_v61, %v3790_v58  ;;  %v3913_v1 = vpop.f32.mrb[9].mxu1  ;;  %v8385_v58 = vcombine.low %v4459_v30, %v4471_v46  ;;  %v8409_v61 = vcombine.low %v4483_v51, %v4495_v52  ;;  %v4256_v30 = vld [vmem:[#allocation19 + $0x2a8] sm:$0xff]  ;;  %v4254_v46 = vld [vmem:[#allocation19 + $0x298] sm:$0xff] }
 0x753   :  { %v3914_v2 = vadd.f32 %v3913_v1, %v3794_v60  ;;  %v3915_v3 = vpop.f32.mrb[10].mxu1  ;;  %v8410_v60 = vcombine.high %v4483_v51, %v4495_v52  ;;  %v4519_v1 = vld [vmem:[#allocation19 + $0xae0] sm:$0xff] }
 0x754   :  { %v3918_v4 = vmax.f32 %v3912_v62, 0.0  ;;  %v3916_v6 = vpop.f32.mrb[11].mxu1  ;;  %v4507_v62 = vld [vmem:[#allocation19 + $0xa80] sm:$0xff] }
 0x755   :  { %v3919_v7 = vmax.f32 %v3914_v2, 0.0  ;;  %v4516_v2 = vld [vmem:[#allocation19 + $0xac8] sm:$0xff]  ;;  %v8434_v3 = vcombine.high %v4507_v62, %v4519_v1  ;;  %v8433_v6 = vcombine.low %v4507_v62, %v4519_v1  ;;  %v4278_v62 = vld [vmem:[#allocation19 + $0x358] sm:$0xff] }
 0x756   :  { %v3920_v8 = vpack.c.bf16 %v3918_v4, %v3918_v4  ;;  %v4528_v4 = vld [vmem:[#allocation19 + $0xb28] sm:$0xff]  ;;  %v4290_v1 = vld [vmem:[#allocation19 + $0x3b8] sm:$0xff] }
 0x757   :  { %v3921_v53 = vpack.c.bf16 %v3919_v7, %v3919_v7  ;;  %v8451_v7 = vcombine.low %v4516_v2, %v4528_v4  ;;  %v8452_v48 = vcombine.high %v4516_v2, %v4528_v4 }
 0x759   :  { %4158 = vmatprep.mubr.bf16.mxu1 %v3921_v53  ;;  %6998 = vmatprep.subr.bf16.mxu0 %v8452_v48  ;;  %v4543_v53 = vld [vmem:[#allocation19 + $0xba0] sm:$0xff]  ;;  %v4304_v48 = vld [vmem:[#allocation19 + $0x428] sm:$0xff] }
 0x75a   :  { %4159 = vmatmul.mubr.bf16.vlgmr.msra.gmra.mrb[12].mxu1 %v3920_v8  ;;  %v4540_v8 = vld [vmem:[#allocation19 + $0xb88] sm:$0xff]  ;;  %6999 = vmatpush1.bf16.msra.mxu0 %v8451_v7  ;;  %v8457_v13 = vcombine.low %v4531_v49, %v4543_v53 }
 0x75b   :  { %6602 = vmatpush1.bf16.msra.mxu1 %v8097_v59  ;;  %v4315_v59 = vld [vmem:[#allocation19 + $0x480] sm:$0xff]  ;;  %v4292_v7 = vld [vmem:[#allocation19 + $0x3c8] sm:$0xff] }
 0x75c   :  { %6603 = vmatprep.subr.bf16.mxu1 %v8122_v9  ;;  %v8242_v24 = vcombine.high %v4315_v59, %v4327_v42  ;;  %v8241_v29 = vcombine.low %v4315_v59, %v4327_v42  ;;  %v8458_v9 = vcombine.high %v4531_v49, %v4543_v53  ;;  %v4302_v49 = vld [vmem:[#allocation19 + $0x418] sm:$0xff] }
 0x75d   :  { %v4314_v53 = vld [vmem:[#allocation19 + $0x478] sm:$0xff] }
 0x75f   :  { %6604 = vmatpush1.bf16.msra.mxu1 %v8121_v15  ;;  %v8475_v15 = vcombine.low %v4540_v8, %v4552_v10 }
 0x760   :  { %6605 = vmatprep.subr.bf16.mxu1 %v8146_v19  ;;  %v8476_v19 = vcombine.high %v4540_v8, %v4552_v10  ;;  %v8220_v10 = vcombine.high %v4292_v7, %v4304_v48 }
 0x762   :  { %7000 = vmatprep.subr.bf16.mxu0 %v8476_v19  ;;  %v4328_v19 = vld [vmem:[#allocation19 + $0x4e8] sm:$0xff] }
 0x763   :  { %6606 = vmatpush1.bf16.msra.mxu1 %v8145_v63  ;;  %v4182_v63 = vld [vmem:[#allocation19 + $0x58] sm:$0xff]  ;;  %7001 = vmatpush1.bf16.msra.mxu0 %v8475_v15  ;;  %v4316_v15 = vld [vmem:[#allocation19 + $0x488] sm:$0xff] }
 0x764   :  { %6607 = vmatprep.subr.bf16.mxu1 %v8170_v0  ;;  %v8100_v0 = vcombine.high %v4172_v20, %v4184_v21  ;;  %v4326_v20 = vld [vmem:[#allocation19 + $0x4d8] sm:$0xff] }
 0x765   :  { %v4338_v21 = vld [vmem:[#allocation19 + $0x538] sm:$0xff] }
 0x767   :  { %6608 = vmatpush1.bf16.msra.mxu1 %v8169_v23  ;;  %v8119_v23 = vcombine.low %v4182_v63, %v4194_v5 }
 0x768   :  { %6609 = vmatprep.subr.bf16.mxu1 %v8194_v37  ;;  %v8120_v37 = vcombine.high %v4182_v63, %v4194_v5  ;;  %v8219_v63 = vcombine.low %v4292_v7, %v4304_v48  ;;  %v8244_v5 = vcombine.high %v4316_v15, %v4328_v19  ;;  %v4482_v7 = vld [vmem:[#allocation19 + $0x9b8] sm:$0xff] }
 0x76a   :  { %7052 = vmatprep.subr.bf16.mxu0 %v8120_v37  ;;  %v4352_v37 = vld [vmem:[#allocation19 + $0x5a8] sm:$0xff] }
 0x76b   :  { %6610 = vmatpush1.bf16.msra.mxu1 %v8193_v55  ;;  %v3963_v55 = vrot.slane %v3954_v18, %v10228_v56  ;;  %v4350_v18 = vld [vmem:[#allocation19 + $0x598] sm:$0xff] }
 0x76c   :  { %6611 = vmatprep.subr.bf16.mxu1 %v8218_v57 }
 0x76f   :  { %6612 = vmatpush1.bf16.msra.mxu1 %v8217_v16 }
 0x770   :  { %6613 = vmatprep.subr.bf16.mxu1 %v8242_v24 }
 0x773   :  { %6614 = vmatpush1.bf16.msra.mxu1 %v8241_v29 }
 0x774   :  { %6615 = vmatprep.subr.bf16.mxu1 %v8266_v31  ;;  %v4196_v31 = vld [vmem:[#allocation19 + $0xc8] sm:$0xff] }
 0x777   :  { %6616 = vmatpush1.bf16.msra.mxu1 %v8265_v11  ;;  %v4218_v11 = vld [vmem:[#allocation19 + $0x178] sm:$0xff] }
 0x778   :  { %6617 = vmatprep.subr.bf16.mxu1 %v8290_v12  ;;  %v8143_v44 = vcombine.low %v4206_v33, %v4218_v11 }
 0x77b   :  { %6618 = vmatpush1.bf16.msra.mxu1 %v8289_v35  ;;  %v8124_v35 = vcombine.high %v4196_v31, %v4208_v32 }
 0x77c   :  { %6619 = vmatprep.subr.bf16.mxu1 %v8314_v36  ;;  %v8144_v36 = vcombine.high %v4206_v33, %v4218_v11  ;;  %v4388_v11 = vld [vmem:[#allocation19 + $0x6c8] sm:$0xff] }
 0x77f   :  { %6620 = vmatpush1.bf16.msra.mxu1 %v8313_v41  ;;  %v4242_v41 = vld [vmem:[#allocation19 + $0x238] sm:$0xff] }
 0x780   :  { %6621 = vmatprep.subr.bf16.mxu1 %v8338_v43  ;;  %v8123_v43 = vcombine.low %v4196_v31, %v4208_v32  ;;  %v8167_v51 = vcombine.low %v4230_v40, %v4242_v41 }
 0x783   :  { %6622 = vmatpush1.bf16.msra.mxu1 %v8337_v25  ;;  %v8168_v25 = vcombine.high %v4230_v40, %v4242_v41 }
 0x784   :  { %6623 = vmatprep.subr.bf16.mxu1 %v8362_v26  ;;  %v4244_v26 = vld [vmem:[#allocation19 + $0x248] sm:$0xff] }
 0x785   :  { %v8172_v52 = vcombine.high %v4244_v26, %v4256_v30  ;;  %v8171_v2 = vcombine.low %v4244_v26, %v4256_v30  ;;  %v4434_v26 = vld [vmem:[#allocation19 + $0x838] sm:$0xff] }
 0x787   :  { %6624 = vmatpush1.bf16.msra.mxu1 %v8361_v47  ;;  %v4266_v47 = vld [vmem:[#allocation19 + $0x2f8] sm:$0xff] }
 0x788   :  { %6625 = vmatprep.subr.bf16.mxu1 %v8386_v50  ;;  %v8147_v50 = vcombine.low %v4220_v34, %v4232_v39  ;;  %v4400_v34 = vld [vmem:[#allocation19 + $0x728] sm:$0xff] }
 0x789   :  { %v8316_v41 = vcombine.high %v4388_v11, %v4400_v34  ;;  %v8315_v30 = vcombine.low %v4388_v11, %v4400_v34 }
 0x78b   :  { %6626 = vmatpush1.bf16.msra.mxu1 %v8385_v58  ;;  %v8192_v58 = vcombine.high %v4254_v46, %v4266_v47 }
 0x78c   :  { %6627 = vmatprep.subr.bf16.mxu1 %v8410_v60  ;;  %v4268_v60 = vld [vmem:[#allocation19 + $0x308] sm:$0xff] }
 0x78f   :  { %6628 = vmatpush1.bf16.msra.mxu1 %v8409_v61  ;;  %v4280_v61 = vld [vmem:[#allocation19 + $0x368] sm:$0xff] }
 0x790   :  { %6629 = vmatprep.subr.bf16.mxu1 %v8434_v3  ;;  %v8191_v3 = vcombine.low %v4254_v46, %v4266_v47  ;;  %v8196_v4 = vcombine.high %v4268_v60, %v4280_v61  ;;  %v8195_v8 = vcombine.low %v4268_v60, %v4280_v61  ;;  %v4458_v60 = vld [vmem:[#allocation19 + $0x8f8] sm:$0xff] }
 0x793   :  { %6630 = vmatpush1.bf16.msra.mxu1 %v8433_v6  ;;  %v8216_v6 = vcombine.high %v4278_v62, %v4290_v1 }
 0x794   :  { %6631 = vmatprep.subr.bf16.mxu1 %v8458_v9  ;;  %v8215_v9 = vcombine.low %v4278_v62, %v4290_v1 }
 0x797   :  { %6632 = vmatpush1.bf16.msra.mxu1 %v8457_v13  ;;  %v8240_v13 = vcombine.high %v4302_v49, %v4314_v53 }
 0x798   :  { %6642 = vmatprep.subr.bf16.mxu1 %v8100_v0  ;;  %v8239_v0 = vcombine.low %v4302_v49, %v4314_v53 }
 0x82d   :  { %v4160_v57 = vpop.f32.mrb[12].mxu1 }
 0x82e   :  { %v4161_v59 = vadd.f32 %v4160_v57, %v3959_v38  ;;  %v4162_v42 = vpop.f32.mrb[13].mxu1  ;;  %v4362_v38 = vld [vmem:[#allocation19 + $0x5f8] sm:$0xff]  ;;  %v8263_v57 = vcombine.low %v4326_v20, %v4338_v21 }
 0x82f   :  { %v4163_v16 = vadd.f32 %v4162_v42, %v3963_v55  ;;  %v4164_v24 = vpop.f32.mrb[14].mxu1  ;;  %v8243_v55 = vcombine.low %v4316_v15, %v4328_v19  ;;  %v8288_v42 = vcombine.high %v4350_v18, %v4362_v38  ;;  %v8287_v31 = vcombine.low %v4350_v18, %v4362_v38  ;;  %v4506_v15 = vld [vmem:[#allocation19 + $0xa78] sm:$0xff] }
 0x830   :  { %v4167_v27 = vmax.f32 %v4161_v59, 0.0  ;;  %v4165_v28 = vpop.f32.mrb[15].mxu1  ;;  %v4376_v24 = vld [vmem:[#allocation19 + $0x668] sm:$0xff] }
 0x831   :  { %v4168_v29 = vmax.f32 %v4163_v16, 0.0  ;;  %v4364_v16 = vld [vmem:[#allocation19 + $0x608] sm:$0xff]  ;;  %v4386_v28 = vld [vmem:[#allocation19 + $0x6b8] sm:$0xff] }
 0x832   :  { %v10256_v17 = vpack.c.bf16 %v4167_v27, %v4167_v27  ;;  %v4374_v27 = vld [vmem:[#allocation19 + $0x658] sm:$0xff]  ;;  %v8292_v32 = vcombine.high %v4364_v16, %v4376_v24  ;;  %v8291_v39 = vcombine.low %v4364_v16, %v4376_v24 }
 0x833   :  { %v10254_v12 = vpack.c.bf16 %v4168_v29, %v4168_v29  ;;  %v8312_v33 = vcombine.high %v4374_v27, %v4386_v28  ;;  %v8311_v40 = vcombine.low %v4374_v27, %v4386_v28  ;;  %v4554_v16 = vld [vmem:[#allocation19 + $0xbf8] sm:$0xff] }
 0x835   :  { %6633 = vmatprep.mubr.bf16.mxu1 %v10254_v12  ;;  %7002 = vmatprep.mubr.bf16.mxu0 %v10254_v12 }
 0x836   :  { %6634 = vmatmul.mubr.bf16.vlgmr.msra.gmra.mrb[16].mxu1 %v10256_v17  ;;  %7003 = vmatmul.mubr.bf16.vlgmr.msra.gmra.mrb[4].mxu0 %v10256_v17 }
 0x837   :  { %6643 = vmatpush1.bf16.msra.mxu1 %v8099_v22  ;;  %7053 = vmatpush1.bf16.msra.mxu0 %v8119_v23  ;;  %v8264_v22 = vcombine.high %v4326_v20, %v4338_v21  ;;  %v4340_v23 = vld [vmem:[#allocation19 + $0x548] sm:$0xff] }
 0x838   :  { %6674 = vmatprep.mubr.bf16.mxu1 %v10254_v12  ;;  %7084 = vmatprep.mubr.bf16.mxu0 %v10254_v12  ;;  %v8268_v59 = vcombine.high %v4340_v23, %v4352_v37  ;;  %v8267_v29 = vcombine.low %v4340_v23, %v4352_v37  ;;  %v4530_v23 = vld [vmem:[#allocation19 + $0xb38] sm:$0xff] }
 0x839   :  { %6644 = vmatprep.subr.bf16.mxu1 %v8124_v35  ;;  %7054 = vmatprep.subr.bf16.mxu0 %v8144_v36  ;;  %v4398_v35 = vld [vmem:[#allocation19 + $0x718] sm:$0xff] }
 0x83a   :  { %v4410_v36 = vld [vmem:[#allocation19 + $0x778] sm:$0xff] }
 0x83b   :  { %6645 = vmatpush1.bf16.msra.mxu1 %v8123_v43  ;;  %7055 = vmatpush1.bf16.msra.mxu0 %v8143_v44  ;;  %v8336_v43 = vcombine.high %v4398_v35, %v4410_v36  ;;  %v4412_v44 = vld [vmem:[#allocation19 + $0x788] sm:$0xff]  ;;  %v8335_v46 = vcombine.low %v4398_v35, %v4410_v36  ;;  %v4197_v35 = vld [vmem:[#allocation19 + $0xd0] sm:$0xff] }
 0x83c   :  { %6646 = vmatprep.subr.bf16.mxu1 %v8148_v45  ;;  %7056 = vmatprep.subr.bf16.mxu0 %v8168_v25  ;;  %v4424_v45 = vld [vmem:[#allocation19 + $0x7e8] sm:$0xff]  ;;  %v4422_v25 = vld [vmem:[#allocation19 + $0x7d8] sm:$0xff]  ;;  %v4209_v36 = vld [vmem:[#allocation19 + $0x130] sm:$0xff] }
 0x83d   :  { %v8340_v47 = vcombine.high %v4412_v44, %v4424_v45  ;;  %v8339_v61 = vcombine.low %v4412_v44, %v4424_v45  ;;  %v8359_v62 = vcombine.low %v4422_v25, %v4434_v26  ;;  %v8125_v44 = vcombine.low %v4197_v35, %v4209_v36 }
 0x83f   :  { %6647 = vmatpush1.bf16.msra.mxu1 %v8147_v50  ;;  %7057 = vmatpush1.bf16.msra.mxu0 %v8167_v51  ;;  %v8360_v50 = vcombine.high %v4422_v25, %v4434_v26  ;;  %v4436_v51 = vld [vmem:[#allocation19 + $0x848] sm:$0xff]  ;;  %v4245_v25 = vld [vmem:[#allocation19 + $0x250] sm:$0xff] }
 0x840   :  { %6648 = vmatprep.subr.bf16.mxu1 %v8172_v52  ;;  %7058 = vmatprep.subr.bf16.mxu0 %v8192_v58  ;;  %v4448_v52 = vld [vmem:[#allocation19 + $0x8a8] sm:$0xff]  ;;  %v4446_v58 = vld [vmem:[#allocation19 + $0x898] sm:$0xff]  ;;  %v4257_v26 = vld [vmem:[#allocation19 + $0x2b0] sm:$0xff] }
 0x841   :  { %v8364_v1 = vcombine.high %v4436_v51, %v4448_v52  ;;  %v8363_v48 = vcombine.low %v4436_v51, %v4448_v52  ;;  %v8383_v49 = vcombine.low %v4446_v58, %v4458_v60  ;;  %v8173_v51 = vcombine.low %v4245_v25, %v4257_v26 }
 0x843   :  { %6649 = vmatpush1.bf16.msra.mxu1 %v8171_v2  ;;  %7059 = vmatpush1.bf16.msra.mxu0 %v8191_v3  ;;  %v8384_v2 = vcombine.high %v4446_v58, %v4458_v60  ;;  %v4460_v3 = vld [vmem:[#allocation19 + $0x908] sm:$0xff]  ;;  %v4293_v58 = vld [vmem:[#allocation19 + $0x3d0] sm:$0xff] }
 0x844   :  { %6650 = vmatprep.subr.bf16.mxu1 %v8196_v4  ;;  %7060 = vmatprep.subr.bf16.mxu0 %v8216_v6  ;;  %v4472_v4 = vld [vmem:[#allocation19 + $0x968] sm:$0xff]  ;;  %v4470_v6 = vld [vmem:[#allocation19 + $0x958] sm:$0xff]  ;;  %v4305_v60 = vld [vmem:[#allocation19 + $0x430] sm:$0xff] }
 0x845   :  { %v8388_v53 = vcombine.high %v4460_v3, %v4472_v4  ;;  %v8387_v19 = vcombine.low %v4460_v3, %v4472_v4  ;;  %v8407_v20 = vcombine.low %v4470_v6, %v4482_v7  ;;  %v8221_v3 = vcombine.low %v4293_v58, %v4305_v60 }
 0x847   :  { %6651 = vmatpush1.bf16.msra.mxu1 %v8195_v8  ;;  %7061 = vmatpush1.bf16.msra.mxu0 %v8215_v9  ;;  %v8408_v8 = vcombine.high %v4470_v6, %v4482_v7  ;;  %v4484_v9 = vld [vmem:[#allocation19 + $0x9c8] sm:$0xff]  ;;  %v4341_v6 = vld [vmem:[#allocation19 + $0x550] sm:$0xff] }
 0x848   :  { %6652 = vmatprep.subr.bf16.mxu1 %v8220_v10  ;;  %7062 = vmatprep.subr.bf16.mxu0 %v8240_v13  ;;  %v4496_v10 = vld [vmem:[#allocation19 + $0xa28] sm:$0xff]  ;;  %v4494_v13 = vld [vmem:[#allocation19 + $0xa18] sm:$0xff]  ;;  %v4353_v7 = vld [vmem:[#allocation19 + $0x5b0] sm:$0xff] }
 0x849   :  { %v8412_v21 = vcombine.high %v4484_v9, %v4496_v10  ;;  %v8411_v37 = vcombine.low %v4484_v9, %v4496_v10  ;;  %v8431_v18 = vcombine.low %v4494_v13, %v4506_v15  ;;  %v8269_v9 = vcombine.low %v4341_v6, %v4353_v7 }
 0x84b   :  { %6653 = vmatpush1.bf16.msra.mxu1 %v8219_v63  ;;  %7063 = vmatpush1.bf16.msra.mxu0 %v8239_v0  ;;  %v8432_v63 = vcombine.high %v4494_v13, %v4506_v15  ;;  %v4508_v0 = vld [vmem:[#allocation19 + $0xa88] sm:$0xff]  ;;  %v4389_v13 = vld [vmem:[#allocation19 + $0x6d0] sm:$0xff] }
 0x84c   :  { %6654 = vmatprep.subr.bf16.mxu1 %v8244_v5  ;;  %7064 = vmatprep.subr.bf16.mxu0 %v8264_v22  ;;  %v4520_v5 = vld [vmem:[#allocation19 + $0xae8] sm:$0xff]  ;;  %v4518_v22 = vld [vmem:[#allocation19 + $0xad8] sm:$0xff]  ;;  %v4401_v15 = vld [vmem:[#allocation19 + $0x730] sm:$0xff] }
 0x84d   :  { %v8436_v38 = vcombine.high %v4508_v0, %v4520_v5  ;;  %v8435_v24 = vcombine.low %v4508_v0, %v4520_v5  ;;  %v8455_v27 = vcombine.low %v4518_v22, %v4530_v23  ;;  %v8317_v0 = vcombine.low %v4389_v13, %v4401_v15 }
 0x84f   :  { %6655 = vmatpush1.bf16.msra.mxu1 %v8243_v55  ;;  %7065 = vmatpush1.bf16.msra.mxu0 %v8263_v57  ;;  %v8456_v55 = vcombine.high %v4518_v22, %v4530_v23  ;;  %v4532_v57 = vld [vmem:[#allocation19 + $0xb48] sm:$0xff]  ;;  %v4437_v22 = vld [vmem:[#allocation19 + $0x850] sm:$0xff] }
 0x850   :  { %6656 = vmatprep.subr.bf16.mxu1 %v8268_v59  ;;  %7066 = vmatprep.subr.bf16.mxu0 %v8288_v42  ;;  %v4544_v59 = vld [vmem:[#allocation19 + $0xba8] sm:$0xff]  ;;  %v4542_v42 = vld [vmem:[#allocation19 + $0xb98] sm:$0xff]  ;;  %v4449_v23 = vld [vmem:[#allocation19 + $0x8b0] sm:$0xff] }
 0x851   :  { %v8460_v28 = vcombine.high %v4532_v57, %v4544_v59  ;;  %v8479_v11 = vcombine.low %v4542_v42, %v4554_v16 }
 0x853   :  { %6657 = vmatpush1.bf16.msra.mxu1 %v8267_v29  ;;  %7067 = vmatpush1.bf16.msra.mxu0 %v8287_v31  ;;  %v8480_v29 = vcombine.high %v4542_v42, %v4554_v16  ;;  %v4173_v31 = vld [vmem:[#allocation19 + $0x10] sm:$0xff] }
 0x854   :  { %6658 = vmatprep.subr.bf16.mxu1 %v8292_v32  ;;  %7068 = vmatprep.subr.bf16.mxu0 %v8312_v33  ;;  %v4185_v32 = vld [vmem:[#allocation19 + $0x70] sm:$0xff]  ;;  %v8459_v33 = vcombine.low %v4532_v57, %v4544_v59  ;;  %v8365_v57 = vcombine.low %v4437_v22, %v4449_v23 }
 0x855   :  { %v8102_v34 = vcombine.high %v4173_v31, %v4185_v32  ;;  %v4485_v42 = vld [vmem:[#allocation19 + $0x9d0] sm:$0xff] }
 0x856   :  { %v4497_v16 = vld [vmem:[#allocation19 + $0xa30] sm:$0xff] }
 0x857   :  { %6659 = vmatpush1.bf16.msra.mxu1 %v8291_v39  ;;  %7069 = vmatpush1.bf16.msra.mxu0 %v8311_v40  ;;  %v8101_v39 = vcombine.low %v4173_v31, %v4185_v32  ;;  %v8126_v40 = vcombine.high %v4197_v35, %v4209_v36  ;;  %v8413_v31 = vcombine.low %v4485_v42, %v4497_v16  ;;  %v4174_v36 = vld [vmem:[#allocation19 + $0x18] sm:$0xff] }
 0x858   :  { %6660 = vmatprep.subr.bf16.mxu1 %v8316_v41  ;;  %7070 = vmatprep.subr.bf16.mxu0 %v8336_v43  ;;  %v4221_v41 = vld [vmem:[#allocation19 + $0x190] sm:$0xff] }
 0x859   :  { %v4233_v43 = vld [vmem:[#allocation19 + $0x1f0] sm:$0xff] }
 0x85a   :  { %v8150_v45 = vcombine.high %v4221_v41, %v4233_v43 }
 0x85b   :  { %6661 = vmatpush1.bf16.msra.mxu1 %v8315_v30  ;;  %7071 = vmatpush1.bf16.msra.mxu0 %v8335_v46  ;;  %v8149_v30 = vcombine.low %v4221_v41, %v4233_v43  ;;  %v8174_v46 = vcombine.high %v4245_v25, %v4257_v26  ;;  %v4198_v43 = vld [vmem:[#allocation19 + $0xd8] sm:$0xff] }
 0x85c   :  { %6662 = vmatprep.subr.bf16.mxu1 %v8340_v47  ;;  %7072 = vmatprep.subr.bf16.mxu0 %v8360_v50  ;;  %v4269_v47 = vld [vmem:[#allocation19 + $0x310] sm:$0xff]  ;;  %v4222_v26 = vld [vmem:[#allocation19 + $0x198] sm:$0xff] }
 0x85d   :  { %v4281_v50 = vld [vmem:[#allocation19 + $0x370] sm:$0xff] }
 0x85e   :  { %v8198_v52 = vcombine.high %v4269_v47, %v4281_v50 }
 0x85f   :  { %6663 = vmatpush1.bf16.msra.mxu1 %v8339_v61  ;;  %7073 = vmatpush1.bf16.msra.mxu0 %v8359_v62  ;;  %v8197_v61 = vcombine.low %v4269_v47, %v4281_v50  ;;  %v8222_v62 = vcombine.high %v4293_v58, %v4305_v60  ;;  %v4246_v50 = vld [vmem:[#allocation19 + $0x258] sm:$0xff] }
 0x860   :  { %6664 = vmatprep.subr.bf16.mxu1 %v8364_v1  ;;  %7074 = vmatprep.subr.bf16.mxu0 %v8384_v2  ;;  %v4317_v1 = vld [vmem:[#allocation19 + $0x490] sm:$0xff]  ;;  %v4270_v60 = vld [vmem:[#allocation19 + $0x318] sm:$0xff] }
 0x861   :  { %v4329_v2 = vld [vmem:[#allocation19 + $0x4f0] sm:$0xff] }
 0x862   :  { %v8246_v4 = vcombine.high %v4317_v1, %v4329_v2 }
 0x863   :  { %6665 = vmatpush1.bf16.msra.mxu1 %v8363_v48  ;;  %7075 = vmatpush1.bf16.msra.mxu0 %v8383_v49  ;;  %v8245_v48 = vcombine.low %v4317_v1, %v4329_v2  ;;  %v8270_v49 = vcombine.high %v4341_v6, %v4353_v7  ;;  %v4294_v2 = vld [vmem:[#allocation19 + $0x3d8] sm:$0xff] }
 0x864   :  { %6666 = vmatprep.subr.bf16.mxu1 %v8388_v53  ;;  %7076 = vmatprep.subr.bf16.mxu0 %v8408_v8  ;;  %v4365_v53 = vld [vmem:[#allocation19 + $0x610] sm:$0xff]  ;;  %v4318_v7 = vld [vmem:[#allocation19 + $0x498] sm:$0xff] }
 0x865   :  { %v4377_v8 = vld [vmem:[#allocation19 + $0x670] sm:$0xff] }
 0x866   :  { %v8294_v10 = vcombine.high %v4365_v53, %v4377_v8 }
 0x867   :  { %6667 = vmatpush1.bf16.msra.mxu1 %v8387_v19  ;;  %7077 = vmatpush1.bf16.msra.mxu0 %v8407_v20  ;;  %v8293_v19 = vcombine.low %v4365_v53, %v4377_v8  ;;  %v8318_v20 = vcombine.high %v4389_v13, %v4401_v15  ;;  %v4342_v8 = vld [vmem:[#allocation19 + $0x558] sm:$0xff] }
 0x868   :  { %6668 = vmatprep.subr.bf16.mxu1 %v8412_v21  ;;  %7078 = vmatprep.subr.bf16.mxu0 %v8432_v63  ;;  %v4413_v21 = vld [vmem:[#allocation19 + $0x790] sm:$0xff]  ;;  %v4366_v15 = vld [vmem:[#allocation19 + $0x618] sm:$0xff] }
 0x869   :  { %v4425_v63 = vld [vmem:[#allocation19 + $0x7f0] sm:$0xff] }
 0x86a   :  { %v8342_v5 = vcombine.high %v4413_v21, %v4425_v63 }
 0x86b   :  { %6669 = vmatpush1.bf16.msra.mxu1 %v8411_v37  ;;  %7079 = vmatpush1.bf16.msra.mxu0 %v8431_v18  ;;  %v8341_v37 = vcombine.low %v4413_v21, %v4425_v63  ;;  %v8366_v18 = vcombine.high %v4437_v22, %v4449_v23  ;;  %v4390_v63 = vld [vmem:[#allocation19 + $0x6d8] sm:$0xff] }
 0x86c   :  { %6670 = vmatprep.subr.bf16.mxu1 %v8436_v38  ;;  %7080 = vmatprep.subr.bf16.mxu0 %v8456_v55  ;;  %v4461_v38 = vld [vmem:[#allocation19 + $0x910] sm:$0xff]  ;;  %v4414_v23 = vld [vmem:[#allocation19 + $0x798] sm:$0xff] }
 0x86d   :  { %v4473_v55 = vld [vmem:[#allocation19 + $0x970] sm:$0xff] }
 0x86e   :  { %v8390_v59 = vcombine.high %v4461_v38, %v4473_v55 }
 0x86f   :  { %6671 = vmatpush1.bf16.msra.mxu1 %v8435_v24  ;;  %7081 = vmatpush1.bf16.msra.mxu0 %v8455_v27  ;;  %v8389_v24 = vcombine.low %v4461_v38, %v4473_v55  ;;  %v8414_v27 = vcombine.high %v4485_v42, %v4497_v16  ;;  %v4438_v55 = vld [vmem:[#allocation19 + $0x858] sm:$0xff] }
 0x870   :  { %6672 = vmatprep.subr.bf16.mxu1 %v8460_v28  ;;  %7082 = vmatprep.subr.bf16.mxu0 %v8480_v29  ;;  %v4509_v28 = vld [vmem:[#allocation19 + $0xa90] sm:$0xff]  ;;  %v4462_v16 = vld [vmem:[#allocation19 + $0x918] sm:$0xff] }
 0x871   :  { %v4521_v29 = vld [vmem:[#allocation19 + $0xaf0] sm:$0xff] }
 0x872   :  { %v8438_v32 = vcombine.high %v4509_v28, %v4521_v29 }
 0x873   :  { %6673 = vmatpush1.bf16.msra.mxu1 %v8459_v33  ;;  %7083 = vmatpush1.bf16.msra.mxu0 %v8479_v11  ;;  %v4533_v33 = vld [vmem:[#allocation19 + $0xb50] sm:$0xff] }
 0x874   :  { %6683 = vmatprep.subr.bf16.mxu1 %v8102_v34  ;;  %v4545_v11 = vld [vmem:[#allocation19 + $0xbb0] sm:$0xff]  ;;  %v8437_v34 = vcombine.low %v4509_v28, %v4521_v29  ;;  %v4486_v29 = vld [vmem:[#allocation19 + $0x9d8] sm:$0xff] }
 0x875   :  { %v8462_v35 = vcombine.high %v4533_v33, %v4545_v11 }
 0x876   :  { %6675 = vmatmul.mubr.bf16.vlgmr.msra.gmra.mrb[20].mxu1 %v10256_v17  ;;  %7085 = vmatmul.mubr.bf16.vlgmr.msra.gmra.mrb[8].mxu0 %v10256_v17 }
 0x877   :  { %6684 = vmatpush1.bf16.msra.mxu1 %v8101_v39  ;;  %6715 = vmatprep.mubr.bf16.mxu1 %v10254_v12  ;;  %v4186_v39 = vld [vmem:[#allocation19 + $0x78] sm:$0xff] }
 0x878   :  { %6685 = vmatprep.subr.bf16.mxu1 %v8126_v40  ;;  %v8461_v40 = vcombine.low %v4533_v33, %v4545_v11  ;;  %v8104_v41 = vcombine.high %v4174_v36, %v4186_v39  ;;  %v4510_v11 = vld [vmem:[#allocation19 + $0xa98] sm:$0xff] }
 0x87b   :  { %6686 = vmatpush1.bf16.msra.mxu1 %v8125_v44  ;;  %v4210_v44 = vld [vmem:[#allocation19 + $0x138] sm:$0xff] }
 0x87c   :  { %6687 = vmatprep.subr.bf16.mxu1 %v8150_v45  ;;  %v8103_v45 = vcombine.low %v4174_v36, %v4186_v39  ;;  %v8128_v25 = vcombine.high %v4198_v43, %v4210_v44  ;;  %v4534_v39 = vld [vmem:[#allocation19 + $0xb58] sm:$0xff] }
 0x87f   :  { %6688 = vmatpush1.bf16.msra.mxu1 %v8149_v30  ;;  %v4234_v30 = vld [vmem:[#allocation19 + $0x1f8] sm:$0xff] }
 0x880   :  { %6689 = vmatprep.subr.bf16.mxu1 %v8174_v46  ;;  %v8127_v46 = vcombine.low %v4198_v43, %v4210_v44  ;;  %v8152_v47 = vcombine.high %v4222_v26, %v4234_v30  ;;  %v4175_v44 = vld [vmem:[#allocation19 + $0x20] sm:$0xff] }
 0x883   :  { %6690 = vmatpush1.bf16.msra.mxu1 %v8173_v51  ;;  %v4258_v51 = vld [vmem:[#allocation19 + $0x2b8] sm:$0xff] }
 0x884   :  { %6691 = vmatprep.subr.bf16.mxu1 %v8198_v52  ;;  %v8151_v52 = vcombine.low %v4222_v26, %v4234_v30  ;;  %v8176_v58 = vcombine.high %v4246_v50, %v4258_v51  ;;  %v4199_v30 = vld [vmem:[#allocation19 + $0xe0] sm:$0xff] }
 0x887   :  { %6692 = vmatpush1.bf16.msra.mxu1 %v8197_v61  ;;  %v4282_v61 = vld [vmem:[#allocation19 + $0x378] sm:$0xff] }
 0x888   :  { %6693 = vmatprep.subr.bf16.mxu1 %v8222_v62  ;;  %v8175_v62 = vcombine.low %v4246_v50, %v4258_v51  ;;  %v8200_v1 = vcombine.high %v4270_v60, %v4282_v61  ;;  %v4223_v51 = vld [vmem:[#allocation19 + $0x1a0] sm:$0xff] }
 0x88b   :  { %6694 = vmatpush1.bf16.msra.mxu1 %v8221_v3  ;;  %v4306_v3 = vld [vmem:[#allocation19 + $0x438] sm:$0xff] }
 0x88c   :  { %6695 = vmatprep.subr.bf16.mxu1 %v8246_v4  ;;  %v8199_v4 = vcombine.low %v4270_v60, %v4282_v61  ;;  %v8224_v6 = vcombine.high %v4294_v2, %v4306_v3  ;;  %v4247_v61 = vld [vmem:[#allocation19 + $0x260] sm:$0xff] }
 0x88f   :  { %6696 = vmatpush1.bf16.msra.mxu1 %v8245_v48  ;;  %v4330_v48 = vld [vmem:[#allocation19 + $0x4f8] sm:$0xff] }
 0x890   :  { %6697 = vmatprep.subr.bf16.mxu1 %v8270_v49  ;;  %v8223_v49 = vcombine.low %v4294_v2, %v4306_v3  ;;  %v8248_v53 = vcombine.high %v4318_v7, %v4330_v48  ;;  %v4271_v3 = vld [vmem:[#allocation19 + $0x320] sm:$0xff] }
 0x893   :  { %6698 = vmatpush1.bf16.msra.mxu1 %v8269_v9  ;;  %v4354_v9 = vld [vmem:[#allocation19 + $0x5b8] sm:$0xff] }
 0x894   :  { %6699 = vmatprep.subr.bf16.mxu1 %v8294_v10  ;;  %v8247_v10 = vcombine.low %v4318_v7, %v4330_v48  ;;  %v8272_v13 = vcombine.high %v4342_v8, %v4354_v9  ;;  %v4295_v48 = vld [vmem:[#allocation19 + $0x3e0] sm:$0xff] }
 0x897   :  { %6700 = vmatpush1.bf16.msra.mxu1 %v8293_v19  ;;  %v4378_v19 = vld [vmem:[#allocation19 + $0x678] sm:$0xff] }
 0x898   :  { %6701 = vmatprep.subr.bf16.mxu1 %v8318_v20  ;;  %v8271_v20 = vcombine.low %v4342_v8, %v4354_v9  ;;  %v8296_v21 = vcombine.high %v4366_v15, %v4378_v19  ;;  %v10274_v9 = vld [vmem:[#allocation20] sm:$0xff] }
 0x89b   :  { %6702 = vmatpush1.bf16.msra.mxu1 %v8317_v0  ;;  %v4402_v0 = vld [vmem:[#allocation19 + $0x738] sm:$0xff] }
 0x89c   :  { %6703 = vmatprep.subr.bf16.mxu1 %v8342_v5  ;;  %v8295_v5 = vcombine.low %v4366_v15, %v4378_v19  ;;  %v8320_v22 = vcombine.high %v4390_v63, %v4402_v0  ;;  %v4319_v19 = vld [vmem:[#allocation19 + $0x4a0] sm:$0xff] }
 0x89f   :  { %6704 = vmatpush1.bf16.msra.mxu1 %v8341_v37  ;;  %v4426_v37 = vld [vmem:[#allocation19 + $0x7f8] sm:$0xff] }
 0x8a0   :  { %6705 = vmatprep.subr.bf16.mxu1 %v8366_v18  ;;  %v8319_v18 = vcombine.low %v4390_v63, %v4402_v0  ;;  %v8344_v38 = vcombine.high %v4414_v23, %v4426_v37 }
 0x8a3   :  { %6706 = vmatpush1.bf16.msra.mxu1 %v8365_v57  ;;  %v4450_v57 = vld [vmem:[#allocation19 + $0x8b8] sm:$0xff] }
 0x8a4   :  { %6707 = vmatprep.subr.bf16.mxu1 %v8390_v59  ;;  %v8343_v59 = vcombine.low %v4414_v23, %v4426_v37  ;;  %v8368_v42 = vcombine.high %v4438_v55, %v4450_v57 }
 0x8a7   :  { %6708 = vmatpush1.bf16.msra.mxu1 %v8389_v24  ;;  %v4474_v24 = vld [vmem:[#allocation19 + $0x978] sm:$0xff] }
 0x8a8   :  { %6709 = vmatprep.subr.bf16.mxu1 %v8414_v27  ;;  %v8367_v27 = vcombine.low %v4438_v55, %v4450_v57  ;;  %v8392_v28 = vcombine.high %v4462_v16, %v4474_v24  ;;  %v4355_v55 = vld [vmem:[#allocation19 + $0x5c0] sm:$0xff] }
 0x8ab   :  { %6710 = vmatpush1.bf16.msra.mxu1 %v8413_v31  ;;  %v4498_v31 = vld [vmem:[#allocation19 + $0xa38] sm:$0xff] }
 0x8ac   :  { %6711 = vmatprep.subr.bf16.mxu1 %v8438_v32  ;;  %v8391_v32 = vcombine.low %v4462_v16, %v4474_v24  ;;  %v8416_v33 = vcombine.high %v4486_v29, %v4498_v31 }
 0x8af   :  { %6712 = vmatpush1.bf16.msra.mxu1 %v8437_v34  ;;  %v4522_v34 = vld [vmem:[#allocation19 + $0xaf8] sm:$0xff] }
 0x8b0   :  { %6713 = vmatprep.subr.bf16.mxu1 %v8462_v35  ;;  %v8415_v35 = vcombine.low %v4486_v29, %v4498_v31  ;;  %v8440_v36 = vcombine.high %v4510_v11, %v4522_v34 }
 0x8b3   :  { %6714 = vmatpush1.bf16.msra.mxu1 %v8461_v40  ;;  %v4546_v40 = vld [vmem:[#allocation19 + $0xbb8] sm:$0xff] }
 0x8b4   :  { %6724 = vmatprep.subr.bf16.mxu1 %v8104_v41  ;;  %v8439_v41 = vcombine.low %v4510_v11, %v4522_v34  ;;  %v8464_v43 = vcombine.high %v4534_v39, %v4546_v40 }
 0x8b6   :  { %6716 = vmatmul.mubr.bf16.vlgmr.msra.gmra.mrb[24].mxu1 %v10256_v17 }
 0x8b7   :  { %6725 = vmatpush1.bf16.msra.mxu1 %v8103_v45  ;;  %6756 = vmatprep.mubr.bf16.mxu1 %v10254_v12  ;;  %v4187_v45 = vld [vmem:[#allocation19 + $0x80] sm:$0xff] }
 0x8b8   :  { %6726 = vmatprep.subr.bf16.mxu1 %v8128_v25  ;;  %v8463_v25 = vcombine.low %v4534_v39, %v4546_v40  ;;  %v8106_v26 = vcombine.high %v4175_v44, %v4187_v45  ;;  %v4367_v40 = vld [vmem:[#allocation19 + $0x620] sm:$0xff] }
 0x8bb   :  { %6727 = vmatpush1.bf16.msra.mxu1 %v8127_v46  ;;  %v4211_v46 = vld [vmem:[#allocation19 + $0x140] sm:$0xff] }
 0x8bc   :  { %6728 = vmatprep.subr.bf16.mxu1 %v8152_v47  ;;  %v8105_v47 = vcombine.low %v4175_v44, %v4187_v45  ;;  %v8130_v50 = vcombine.high %v4199_v30, %v4211_v46  ;;  %v4391_v45 = vld [vmem:[#allocation19 + $0x6e0] sm:$0xff] }
 0x8bf   :  { %6729 = vmatpush1.bf16.msra.mxu1 %v8151_v52  ;;  %v4235_v52 = vld [vmem:[#allocation19 + $0x200] sm:$0xff] }
 0x8c0   :  { %6730 = vmatprep.subr.bf16.mxu1 %v8176_v58  ;;  %v8129_v58 = vcombine.low %v4199_v30, %v4211_v46  ;;  %v8154_v60 = vcombine.high %v4223_v51, %v4235_v52  ;;  %v4415_v46 = vld [vmem:[#allocation19 + $0x7a0] sm:$0xff] }
 0x8c3   :  { %6731 = vmatpush1.bf16.msra.mxu1 %v8175_v62  ;;  %v4259_v62 = vld [vmem:[#allocation19 + $0x2c0] sm:$0xff] }
 0x8c4   :  { %6732 = vmatprep.subr.bf16.mxu1 %v8200_v1  ;;  %v8153_v1 = vcombine.low %v4223_v51, %v4235_v52  ;;  %v8178_v2 = vcombine.high %v4247_v61, %v4259_v62 }
 0x8c7   :  { %6733 = vmatpush1.bf16.msra.mxu1 %v8199_v4  ;;  %v4283_v4 = vld [vmem:[#allocation19 + $0x380] sm:$0xff] }
 0x8c8   :  { %6734 = vmatprep.subr.bf16.mxu1 %v8224_v6  ;;  %v8177_v6 = vcombine.low %v4247_v61, %v4259_v62  ;;  %v8202_v7 = vcombine.high %v4271_v3, %v4283_v4  ;;  %v8201_v8 = vcombine.low %v4271_v3, %v4283_v4  ;;  %v4439_v61 = vld [vmem:[#allocation19 + $0x860] sm:$0xff] }
 0x8c9   :  { %v4451_v62 = vld [vmem:[#allocation19 + $0x8c0] sm:$0xff] }
 0x8cb   :  { %6735 = vmatpush1.bf16.msra.mxu1 %v8223_v49  ;;  %v4307_v49 = vld [vmem:[#allocation19 + $0x440] sm:$0xff] }
 0x8cc   :  { %6736 = vmatprep.subr.bf16.mxu1 %v8248_v53  ;;  %v10272_v53 = vsub.s32 2, %v10049_v14  ;;  %v8226_v15 = vcombine.high %v4295_v48, %v4307_v49  ;;  %v8225_v0 = vcombine.low %v4295_v48, %v4307_v49  ;;  %v8370_v48 = vcombine.high %v4439_v61, %v4451_v62  ;;  %v4463_v49 = vld [vmem:[#allocation19 + $0x920] sm:$0xff] }
 0x8cf   :  { %6737 = vmatpush1.bf16.msra.mxu1 %v8247_v10  ;;  %v10276_v10 = vld [vmem:[#allocation20 + $0x10] sm:$0xff] }
 0x8d0   :  { %6738 = vmatprep.subr.bf16.mxu1 %v8272_v13  ;;  %v10279_v13 = vsub.s32 3, %v10049_v14  ;;  %v4636_v63 = vrot.slane %v10276_v10, %v10272_v53 }
 0x8d3   :  { %6739 = vmatpush1.bf16.msra.mxu1 %v8271_v20  ;;  %v4331_v20 = vld [vmem:[#allocation19 + $0x500] sm:$0xff] }
 0x8d4   :  { %6740 = vmatprep.subr.bf16.mxu1 %v8296_v21  ;;  %v4564_v21 = vrot.slane %v10274_v9, %v10225_v54  ;;  %v8250_v23 = vcombine.high %v4319_v19, %v4331_v20  ;;  %v8249_v31 = vcombine.low %v4319_v19, %v4331_v20  ;;  %v4487_v20 = vld [vmem:[#allocation19 + $0x9e0] sm:$0xff] }
 0x8d7   :  { %6741 = vmatpush1.bf16.msra.mxu1 %v8295_v5  ;;  %v4568_v5 = vrot.slane %v10274_v9, %v10228_v56 }
 0x8d8   :  { %6742 = vmatprep.subr.bf16.mxu1 %v8320_v22  ;;  %v4640_v22 = vrot.slane %v10276_v10, %v10279_v13 }
 0x8db   :  { %6743 = vmatpush1.bf16.msra.mxu1 %v8319_v18 }
 0x8dc   :  { %6744 = vmatprep.subr.bf16.mxu1 %v8344_v38  ;;  %v4343_v38 = vld [vmem:[#allocation19 + $0x560] sm:$0xff] }
 0x8df   :  { %6745 = vmatpush1.bf16.msra.mxu1 %v8343_v59 }
 0x8e0   :  { %6746 = vmatprep.subr.bf16.mxu1 %v8368_v42 }
 0x8e3   :  { %6747 = vmatpush1.bf16.msra.mxu1 %v8367_v27 }
 0x8e4   :  { %6748 = vmatprep.subr.bf16.mxu1 %v8392_v28 }
 0x8e7   :  { %6749 = vmatpush1.bf16.msra.mxu1 %v8391_v32 }
 0x8e8   :  { %6750 = vmatprep.subr.bf16.mxu1 %v8416_v33 }
 0x8eb   :  { %6751 = vmatpush1.bf16.msra.mxu1 %v8415_v35  ;;  %v8274_v35 = vcombine.high %v4343_v38, %v4355_v55 }
 0x8ec   :  { %6752 = vmatprep.subr.bf16.mxu1 %v8440_v36 }
 0x8ef   :  { %6753 = vmatpush1.bf16.msra.mxu1 %v8439_v41  ;;  %v4379_v41 = vld [vmem:[#allocation19 + $0x680] sm:$0xff] }
 0x8f0   :  { %6754 = vmatprep.subr.bf16.mxu1 %v8464_v43  ;;  %v8273_v43 = vcombine.low %v4343_v38, %v4355_v55  ;;  %v8298_v44 = vcombine.high %v4367_v40, %v4379_v41 }
 0x8f3   :  { %6755 = vmatpush1.bf16.msra.mxu1 %v8463_v25  ;;  %v4403_v25 = vld [vmem:[#allocation19 + $0x740] sm:$0xff] }
 0x8f4   :  { %6765 = vmatprep.subr.bf16.mxu1 %v8106_v26  ;;  %v8297_v26 = vcombine.low %v4367_v40, %v4379_v41  ;;  %v8322_v30 = vcombine.high %v4391_v45, %v4403_v25  ;;  %v4236_v40 = vld [vmem:[#allocation19 + $0x208] sm:$0xff] }
 0x8f6   :  { %6757 = vmatmul.mubr.bf16.vlgmr.msra.gmra.mrb[28].mxu1 %v10256_v17 }
 0x8f7   :  { %6766 = vmatpush1.bf16.msra.mxu1 %v8105_v47  ;;  %6797 = vmatprep.mubr.bf16.mxu1 %v10254_v12  ;;  %v4427_v47 = vld [vmem:[#allocation19 + $0x800] sm:$0xff] }
 0x8f8   :  { %6767 = vmatprep.subr.bf16.mxu1 %v8130_v50  ;;  %v8321_v50 = vcombine.low %v4391_v45, %v4403_v25  ;;  %v8346_v52 = vcombine.high %v4415_v46, %v4427_v47  ;;  %v4260_v45 = vld [vmem:[#allocation19 + $0x2c8] sm:$0xff] }
 0x8fb   :  { %6768 = vmatpush1.bf16.msra.mxu1 %v8129_v58 }
 0x8fc   :  { %6769 = vmatprep.subr.bf16.mxu1 %v8154_v60 }
 0x8ff   :  { %6770 = vmatpush1.bf16.msra.mxu1 %v8153_v1 }
 0x900   :  { %6771 = vmatprep.subr.bf16.mxu1 %v8178_v2 }
 0x903   :  { %6772 = vmatpush1.bf16.msra.mxu1 %v8177_v6  ;;  %v8345_v6 = vcombine.low %v4415_v46, %v4427_v47  ;;  %v4284_v46 = vld [vmem:[#allocation19 + $0x388] sm:$0xff] }
 0x904   :  { %6773 = vmatprep.subr.bf16.mxu1 %v8202_v7 }
 0x907   :  { %6774 = vmatpush1.bf16.msra.mxu1 %v8201_v8  ;;  %v4475_v8 = vld [vmem:[#allocation19 + $0x980] sm:$0xff] }
 0x908   :  { %6775 = vmatprep.subr.bf16.mxu1 %v8226_v15  ;;  %v8369_v15 = vcombine.low %v4439_v61, %v4451_v62  ;;  %v8394_v19 = vcombine.high %v4463_v49, %v4475_v8  ;;  %v10307_v61 = vsub.s32 7, %v10049_v14 }
 0x909   :  { %v6635_v37 = vpop.f32.mrb[16].mxu1  ;;  %v7004_v18 = vpop.f32.mrb[4].mxu0 }
 0x90a   :  { %v6636_v57 = vadd.f32 %v6635_v37, %v4564_v21  ;;  %v7005_v59 = vadd.f32 %v7004_v18, %v4636_v63  ;;  %v6637_v42 = vpop.f32.mrb[17].mxu1  ;;  %v7006_v16 = vpop.f32.mrb[5].mxu0  ;;  %v4499_v21 = vld [vmem:[#allocation19 + $0xa40] sm:$0xff]  ;;  %v8393_v63 = vcombine.low %v4463_v49, %v4475_v8 }
 0x90b   :  { %v6638_v24 = vadd.f32 %v6637_v42, %v4568_v5  ;;  %6776 = vmatpush1.bf16.msra.mxu1 %v8225_v0  ;;  %v7007_v27 = vadd.f32 %v7006_v16, %v4640_v22  ;;  %v6639_v28 = vpop.f32.mrb[18].mxu1  ;;  %v7008_v29 = vpop.f32.mrb[6].mxu0  ;;  %v8418_v0 = vcombine.high %v4487_v20, %v4499_v21  ;;  %v4511_v22 = vld [vmem:[#allocation19 + $0xaa0] sm:$0xff]  ;;  %v8417_v38 = vcombine.low %v4487_v20, %v4499_v21  ;;  %v4356_v20 = vld [vmem:[#allocation19 + $0x5c8] sm:$0xff] }
 0x90c   :  { %v8481_v32 = vmul.f32 -1.442695, %v6636_v57  ;;  %v8499_v33 = vmul.f32 -1.442695, %v7005_v59  ;;  %v6640_v11 = vpop.f32.mrb[19].mxu1  ;;  %v7009_v34 = vpop.f32.mrb[7].mxu0  ;;  %6777 = vmatprep.subr.bf16.mxu1 %v8250_v23 }
 0x90d   :  { %v8482_v36 = vmul.f32 -1.442695, %v6638_v24  ;;  %v8500_v39 = vmul.f32 -1.442695, %v7007_v27  ;;  %v4523_v23 = vld [vmem:[#allocation19 + $0xb00] sm:$0xff]  ;;  %v4176_v29 = vld [vmem:[#allocation19 + $0x28] sm:$0xff] }
 0x90e   :  { %9338 = vpow2.f32 %v8481_v32  ;;  %v8442_v59 = vcombine.high %v4511_v22, %v4523_v23  ;;  %v4535_v16 = vld [vmem:[#allocation19 + $0xb60] sm:$0xff]  ;;  %v8441_v27 = vcombine.low %v4511_v22, %v4523_v23  ;;  %v4200_v11 = vld [vmem:[#allocation19 + $0xe8] sm:$0xff] }
 0x90f   :  { %9340 = vpow2.f32 %v8499_v33  ;;  %6778 = vmatpush1.bf16.msra.mxu1 %v8249_v31  ;;  %v4547_v24 = vld [vmem:[#allocation19 + $0xbc0] sm:$0xff]  ;;  %v4188_v31 = vld [vmem:[#allocation19 + $0x88] sm:$0xff] }
 0x910   :  { %9342 = vpow2.f32 %v8482_v36  ;;  %6779 = vmatprep.subr.bf16.mxu1 %v8274_v35  ;;  %v8466_v28 = vcombine.high %v4535_v16, %v4547_v24  ;;  %v8465_v32 = vcombine.low %v4535_v16, %v4547_v24  ;;  %v8108_v33 = vcombine.high %v4176_v29, %v4188_v31  ;;  %v4212_v34 = vld [vmem:[#allocation19 + $0x148] sm:$0xff] }
 0x911   :  { %9344 = vpow2.f32 %v8500_v39  ;;  %v8107_v35 = vcombine.low %v4176_v29, %v4188_v31  ;;  %v8132_v36 = vcombine.high %v4200_v11, %v4212_v34  ;;  %v4224_v39 = vld [vmem:[#allocation19 + $0x1a8] sm:$0xff]  ;;  %v8131_v41 = vcombine.low %v4200_v11, %v4212_v34 }
 0x912   :  { %v8155_v25 = vcombine.low %v4224_v39, %v4236_v40  ;;  %v4368_v11 = vld [vmem:[#allocation19 + $0x628] sm:$0xff] }
 0x913   :  { %6780 = vmatpush1.bf16.msra.mxu1 %v8273_v43  ;;  %v8156_v43 = vcombine.high %v4224_v39, %v4236_v40  ;;  %v4380_v34 = vld [vmem:[#allocation19 + $0x688] sm:$0xff] }
 0x914   :  { %6781 = vmatprep.subr.bf16.mxu1 %v8298_v44  ;;  %v4248_v44 = vld [vmem:[#allocation19 + $0x268] sm:$0xff] }
 0x915   :  { %v8179_v47 = vcombine.low %v4248_v44, %v4260_v45  ;;  %v4392_v39 = vld [vmem:[#allocation19 + $0x6e8] sm:$0xff] }
 0x916   :  { %v4404_v40 = vld [vmem:[#allocation19 + $0x748] sm:$0xff] }
 0x917   :  { %6782 = vmatpush1.bf16.msra.mxu1 %v8297_v26  ;;  %v8180_v26 = vcombine.high %v4248_v44, %v4260_v45  ;;  %v4416_v44 = vld [vmem:[#allocation19 + $0x7a8] sm:$0xff] }
 0x918   :  { %v9339_v51 = vpop.eup %9338  ;;  %6783 = vmatprep.subr.bf16.mxu1 %v8322_v30  ;;  %v4272_v30 = vld [vmem:[#allocation19 + $0x328] sm:$0xff] }
 0x919   :  { %v9341_v58 = vpop.eup %9340  ;;  %v7165_v60 = vadd.f32 1.0, %v9339_v51  ;;  %v4296_v51 = vld [vmem:[#allocation19 + $0x3e8] sm:$0xff] }
 0x91a   :  { %v9343_v1 = vpop.eup %9342  ;;  %v7183_v2 = vadd.f32 1.0, %v9341_v58  ;;  %v10304_v58 = vsub.s32 6, %v10049_v14  ;;  %v4428_v45 = vld [vmem:[#allocation19 + $0x808] sm:$0xff] }
 0x91b   :  { %v9345_v3 = vpop.eup %9344  ;;  %9346 = vrcp.f32 %v7165_v60  ;;  %v7166_v4 = vadd.f32 1.0, %v9343_v1  ;;  %6784 = vmatpush1.bf16.msra.mxu1 %v8321_v50  ;;  %v8204_v50 = vcombine.high %v4272_v30, %v4284_v46  ;;  %v8203_v60 = vcombine.low %v4272_v30, %v4284_v46  ;;  %v4320_v1 = vld [vmem:[#allocation19 + $0x4a8] sm:$0xff] }
 0x91c   :  { %9348 = vrcp.f32 %v7183_v2  ;;  %v7184_v7 = vadd.f32 1.0, %v9345_v3  ;;  %6785 = vmatprep.subr.bf16.mxu1 %v8346_v52  ;;  %v4308_v52 = vld [vmem:[#allocation19 + $0x448] sm:$0xff]  ;;  %v4572_v3 = vrot.slane %v10274_v9, %v10272_v53  ;;  %v8348_v30 = vcombine.high %v4416_v44, %v4428_v45 }
 0x91d   :  { %9350 = vrcp.f32 %v7166_v4  ;;  %v8228_v62 = vcombine.high %v4296_v51, %v4308_v52  ;;  %v4332_v2 = vld [vmem:[#allocation19 + $0x508] sm:$0xff]  ;;  %v4652_v4 = vrot.slane %v10276_v10, %v10304_v58 }
 0x91e   :  { %9352 = vrcp.f32 %v7184_v7  ;;  %v8227_v7 = vcombine.low %v4296_v51, %v4308_v52  ;;  %v8252_v49 = vcombine.high %v4320_v1, %v4332_v2  ;;  %v8251_v24 = vcombine.low %v4320_v1, %v4332_v2  ;;  %v4452_v51 = vld [vmem:[#allocation19 + $0x8c8] sm:$0xff] }
 0x91f   :  { %6786 = vmatpush1.bf16.msra.mxu1 %v8345_v6  ;;  %v4576_v6 = vrot.slane %v10274_v9, %v10279_v13  ;;  %v8347_v2 = vcombine.low %v4416_v44, %v4428_v45  ;;  %v4201_v45 = vld [vmem:[#allocation19 + $0xf0] sm:$0xff] }
 0x920   :  { %6787 = vmatprep.subr.bf16.mxu1 %v8370_v48  ;;  %v4656_v48 = vrot.slane %v10276_v10, %v10307_v61 }
 0x923   :  { %6788 = vmatpush1.bf16.msra.mxu1 %v8369_v15 }
 0x924   :  { %6789 = vmatprep.subr.bf16.mxu1 %v8394_v19  ;;  %v4344_v19 = vld [vmem:[#allocation19 + $0x568] sm:$0xff] }
 0x925   :  { %v10289_v5 = vpop.eup %9346  ;;  %v8276_v31 = vcombine.high %v4344_v19, %v4356_v20 }
 0x926   :  { %v10291_v37 = vpop.eup %9348 }
 0x927   :  { %v10293_v18 = vpop.eup %9350  ;;  %6790 = vmatpush1.bf16.msra.mxu1 %v8393_v63 }
 0x928   :  { %v10295_v55 = vpop.eup %9352  ;;  %v7261_v57 = vcombine.low %v10289_v5, %v10293_v18  ;;  %6791 = vmatprep.subr.bf16.mxu1 %v8418_v0  ;;  %v4213_v5 = vld [vmem:[#allocation19 + $0x150] sm:$0xff] }
 0x929   :  { %v7407_v42 = vcombine.low %v10291_v37, %v10295_v55 }
 0x92b   :  { %6792 = vmatpush1.bf16.msra.mxu1 %v8417_v38 }
 0x92c   :  { %6793 = vmatprep.subr.bf16.mxu1 %v8442_v59 }
 0x92f   :  { %6794 = vmatpush1.bf16.msra.mxu1 %v8441_v27 }
 0x930   :  { %6795 = vmatprep.subr.bf16.mxu1 %v8466_v28 }
 0x933   :  { %6796 = vmatpush1.bf16.msra.mxu1 %v8465_v32 }
 0x934   :  { %6806 = vmatprep.subr.bf16.mxu1 %v8108_v33 }
 0x936   :  { %6798 = vmatmul.mubr.bf16.vlgmr.msra.gmra.mrb[32].mxu1 %v10256_v17 }
 0x937   :  { %6807 = vmatpush1.bf16.msra.mxu1 %v8107_v35  ;;  %6838 = vmatprep.mubr.bf16.mxu1 %v10254_v12  ;;  %v8275_v35 = vcombine.low %v4344_v19, %v4356_v20  ;;  %v4488_v19 = vld [vmem:[#allocation19 + $0x9e8] sm:$0xff] }
 0x938   :  { %6808 = vmatprep.subr.bf16.mxu1 %v8132_v36  ;;  %v8300_v36 = vcombine.high %v4368_v11, %v4380_v34  ;;  %v4500_v20 = vld [vmem:[#allocation19 + $0xa48] sm:$0xff] }
 0x93b   :  { %6809 = vmatpush1.bf16.msra.mxu1 %v8131_v41  ;;  %v8299_v41 = vcombine.low %v4368_v11, %v4380_v34 }
 0x93c   :  { %6810 = vmatprep.subr.bf16.mxu1 %v8156_v43  ;;  %v8324_v43 = vcombine.high %v4392_v39, %v4404_v40 }
 0x93f   :  { %6811 = vmatpush1.bf16.msra.mxu1 %v8155_v25  ;;  %v8323_v25 = vcombine.low %v4392_v39, %v4404_v40  ;;  %v4177_v40 = vld [vmem:[#allocation19 + $0x30] sm:$0xff] }
 0x940   :  { %6812 = vmatprep.subr.bf16.mxu1 %v8180_v26 }
 0x943   :  { %6813 = vmatpush1.bf16.msra.mxu1 %v8179_v47 }
 0x944   :  { %6814 = vmatprep.subr.bf16.mxu1 %v8204_v50  ;;  %v4440_v50 = vld [vmem:[#allocation19 + $0x868] sm:$0xff] }
 0x947   :  { %6815 = vmatpush1.bf16.msra.mxu1 %v8203_v60 }
 0x948   :  { %6816 = vmatprep.subr.bf16.mxu1 %v8228_v62 }
 0x949   :  { %v6676_v8 = vpop.f32.mrb[20].mxu1  ;;  %v7086_v15 = vpop.f32.mrb[8].mxu0 }
 0x94a   :  { %v6677_v21 = vadd.f32 %v6676_v8, %v4572_v3  ;;  %v7087_v63 = vadd.f32 %v7086_v15, %v4652_v4  ;;  %v6678_v0 = vpop.f32.mrb[21].mxu1  ;;  %v7088_v22 = vpop.f32.mrb[9].mxu0  ;;  %v8372_v4 = vcombine.high %v4440_v50, %v4452_v51  ;;  %v8371_v8 = vcombine.low %v4440_v50, %v4452_v51  ;;  %v4261_v50 = vld [vmem:[#allocation19 + $0x2d0] sm:$0xff] }
 0x94b   :  { %v6679_v23 = vadd.f32 %v6678_v0, %v4576_v6  ;;  %v7089_v38 = vadd.f32 %v7088_v22, %v4656_v48  ;;  %v6680_v59 = vpop.f32.mrb[22].mxu1  ;;  %6817 = vmatpush1.bf16.msra.mxu1 %v8227_v7  ;;  %v7090_v16 = vpop.f32.mrb[10].mxu0  ;;  %v4464_v6 = vld [vmem:[#allocation19 + $0x928] sm:$0xff]  ;;  %v9779_v48 = vmov 1983009808   ;;  %v8420_v0 = vcombine.high %v4488_v19, %v4500_v20 }
 0x94c   :  { %v8483_v27 = vmul.f32 -1.442695, %v6677_v21  ;;  %v8503_v28 = vmul.f32 -1.442695, %v7087_v63  ;;  %v6681_v29 = vpop.f32.mrb[23].mxu1  ;;  %v7091_v10 = vpop.f32.mrb[11].mxu0  ;;  %6818 = vmatprep.subr.bf16.mxu1 %v8252_v49  ;;  %v7266_v49 = vunpack.c.l.s4 %v9779_v48 }
 0x94d   :  { %v8484_v32 = vmul.f32 -1.442695, %v6679_v23  ;;  %v8504_v33 = vmul.f32 -1.442695, %v7089_v38  ;;  %v4476_v7 = vld [vmem:[#allocation19 + $0x988] sm:$0xff]  ;;  %v10340_v48 = vsub.s32 5, %v10049_v14 }
 0x94e   :  { %9354 = vpow2.f32 %v8483_v27  ;;  %v8396_v15 = vcombine.high %v4464_v6, %v4476_v7  ;;  %v7267_v21 = vunpack.c.0.s8 %v7266_v49  ;;  %v8395_v63 = vcombine.low %v4464_v6, %v4476_v7  ;;  %v4512_v23 = vld [vmem:[#allocation19 + $0xaa8] sm:$0xff] }
 0x94f   :  { %9356 = vpow2.f32 %v8503_v28  ;;  %6819 = vmatpush1.bf16.msra.mxu1 %v8251_v24  ;;  %v4524_v38 = vld [vmem:[#allocation19 + $0xb08] sm:$0xff]  ;;  %v8419_v27 = vcombine.low %v4488_v19, %v4500_v20  ;;  %v10337_v6 = vsub.s32 4, %v10049_v14  ;;  %v4584_v20 = vrot.slane %v10274_v9, %v10340_v48 }
 0x950   :  { %9358 = vpow2.f32 %v8484_v32  ;;  %6820 = vmatprep.subr.bf16.mxu1 %v8276_v31  ;;  %v10320_v16 = vsub.s32 %v7267_v21, %v10049_v14  ;;  %v8444_v10 = vcombine.high %v4512_v23, %v4524_v38  ;;  %v4536_v32 = vld [vmem:[#allocation19 + $0xb68] sm:$0xff] }
 0x951   :  { %9360 = vpow2.f32 %v8504_v33  ;;  %v4548_v33 = vld [vmem:[#allocation19 + $0xbc8] sm:$0xff]  ;;  %v4580_v19 = vrot.slane %v10274_v9, %v10337_v6 }
 0x952   :  { %v7271_v11 = vrot.slane %v7261_v57, %v10320_v16  ;;  %v8468_v39 = vcombine.high %v4536_v32, %v4548_v33  ;;  %v8134_v57 = vcombine.high %v4201_v45, %v4213_v5 }
 0x953   :  { %6821 = vmatpush1.bf16.msra.mxu1 %v8275_v35  ;;  %v8443_v35 = vcombine.low %v4512_v23, %v4524_v38  ;;  %v4357_v23 = vld [vmem:[#allocation19 + $0x5d0] sm:$0xff] }
 0x954   :  { %6822 = vmatprep.subr.bf16.mxu1 %v8300_v36 }
 0x957   :  { %6823 = vmatpush1.bf16.msra.mxu1 %v8299_v41  ;;  %v4189_v41 = vld [vmem:[#allocation19 + $0x90] sm:$0xff] }
 0x958   :  { %v9355_v26 = vpop.eup %9354  ;;  %6824 = vmatprep.subr.bf16.mxu1 %v8324_v43  ;;  %v8467_v43 = vcombine.low %v4536_v32, %v4548_v33  ;;  %v8110_v44 = vcombine.high %v4177_v40, %v4189_v41  ;;  %v8109_v18 = vcombine.low %v4177_v40, %v4189_v41  ;;  %v4393_v40 = vld [vmem:[#allocation19 + $0x6f0] sm:$0xff] }
 0x959   :  { %v9357_v46 = vpop.eup %9356  ;;  %v7167_v47 = vadd.f32 1.0, %v9355_v26  ;;  %v4237_v26 = vld [vmem:[#allocation19 + $0x210] sm:$0xff] }
 0x95a   :  { %v9359_v52 = vpop.eup %9358  ;;  %v7187_v60 = vadd.f32 1.0, %v9357_v46  ;;  %v4405_v41 = vld [vmem:[#allocation19 + $0x750] sm:$0xff] }
 0x95b   :  { %v9361_v62 = vpop.eup %9360  ;;  %9362 = vrcp.f32 %v7167_v47  ;;  %v7168_v1 = vadd.f32 1.0, %v9359_v52  ;;  %6825 = vmatpush1.bf16.msra.mxu1 %v8323_v25  ;;  %v4225_v25 = vld [vmem:[#allocation19 + $0x1b0] sm:$0xff] }
 0x95c   :  { %9364 = vrcp.f32 %v7187_v60  ;;  %v7188_v3 = vadd.f32 1.0, %v9361_v62  ;;  %6826 = vmatprep.subr.bf16.mxu1 %v8348_v30  ;;  %v8133_v30 = vcombine.low %v4201_v45, %v4213_v5  ;;  %v8158_v46 = vcombine.high %v4225_v25, %v4237_v26  ;;  %v4249_v47 = vld [vmem:[#allocation19 + $0x270] sm:$0xff] }
 0x95d   :  { %9366 = vrcp.f32 %v7168_v1  ;;  %v8157_v51 = vcombine.low %v4225_v25, %v4237_v26  ;;  %v8182_v52 = vcombine.high %v4249_v47, %v4261_v50  ;;  %v4273_v60 = vld [vmem:[#allocation19 + $0x330] sm:$0xff]  ;;  %v8181_v1 = vcombine.low %v4249_v47, %v4261_v50 }
 0x95e   :  { %9368 = vrcp.f32 %v7188_v3  ;;  %v4285_v62 = vld [vmem:[#allocation19 + $0x390] sm:$0xff] }
 0x95f   :  { %6827 = vmatpush1.bf16.msra.mxu1 %v8347_v2  ;;  %v8206_v2 = vcombine.high %v4273_v60, %v4285_v62  ;;  %v4297_v3 = vld [vmem:[#allocation19 + $0x3f0] sm:$0xff]  ;;  %v8205_v7 = vcombine.low %v4273_v60, %v4285_v62 }
 0x960   :  { %6828 = vmatprep.subr.bf16.mxu1 %v8372_v4  ;;  %v4309_v4 = vld [vmem:[#allocation19 + $0x450] sm:$0xff] }
 0x961   :  { %v8230_v49 = vcombine.high %v4297_v3, %v4309_v4  ;;  %v8229_v21 = vcombine.low %v4297_v3, %v4309_v4  ;;  %v4417_v45 = vld [vmem:[#allocation19 + $0x7b0] sm:$0xff] }
 0x962   :  { %v4429_v5 = vld [vmem:[#allocation19 + $0x810] sm:$0xff] }
 0x963   :  { %6829 = vmatpush1.bf16.msra.mxu1 %v8371_v8  ;;  %v4321_v8 = vld [vmem:[#allocation19 + $0x4b0] sm:$0xff]  ;;  %v8350_v25 = vcombine.high %v4417_v45, %v4429_v5 }
 0x964   :  { %6830 = vmatprep.subr.bf16.mxu1 %v8396_v15  ;;  %v4333_v15 = vld [vmem:[#allocation19 + $0x510] sm:$0xff] }
 0x965   :  { %v9363_v22 = vpop.eup %9362  ;;  %v4453_v47 = vld [vmem:[#allocation19 + $0x8d0] sm:$0xff] }
 0x966   :  { %v10317_v59 = vpop.eup %9364  ;;  %v4465_v60 = vld [vmem:[#allocation19 + $0x930] sm:$0xff] }
 0x967   :  { %v9367_v24 = vpop.eup %9366  ;;  %6831 = vmatpush1.bf16.msra.mxu1 %v8395_v63  ;;  %v8254_v63 = vcombine.high %v4321_v8, %v4333_v15  ;;  %v4477_v62 = vld [vmem:[#allocation19 + $0x990] sm:$0xff] }
 0x968   :  { %v10322_v28 = vpop.eup %9368  ;;  %v7263_v29 = vcombine.low %v9363_v22, %v9367_v24  ;;  %6832 = vmatprep.subr.bf16.mxu1 %v8420_v0  ;;  %v4345_v22 = vld [vmem:[#allocation19 + $0x570] sm:$0xff] }
 0x969   :  { %v7443_v31 = vcombine.low %v10317_v59, %v10322_v28  ;;  %v8278_v33 = vcombine.high %v4345_v22, %v4357_v23  ;;  %v4489_v3 = vld [vmem:[#allocation19 + $0x9f0] sm:$0xff] }
 0x96a   :  { %v7285_v34 = vrot.slane %v7263_v29, %v10320_v16  ;;  %v8253_v29 = vcombine.low %v4321_v8, %v4333_v15  ;;  %v4501_v4 = vld [vmem:[#allocation19 + $0xa50] sm:$0xff] }
 0x96b   :  { %6833 = vmatpush1.bf16.msra.mxu1 %v8419_v27  ;;  %v4513_v15 = vld [vmem:[#allocation19 + $0xab0] sm:$0xff] }
 0x96c   :  { %v7293_v36 = vcombine.low %v7271_v11, %v7285_v34  ;;  %6834 = vmatprep.subr.bf16.mxu1 %v8444_v10  ;;  %v4369_v34 = vld [vmem:[#allocation19 + $0x630] sm:$0xff] }
 0x96e   :  { %7542 = vst [vmem:[%s10466_s14] sm:$0xff] %v7293_v36  ;;  %v8277_v36 = vcombine.low %v4345_v22, %v4357_v23  ;;  %v4537_v22 = vld [vmem:[#allocation19 + $0xb70] sm:$0xff] }
 0x96f   :  { %6835 = vmatpush1.bf16.msra.mxu1 %v8443_v35  ;;  %v4381_v35 = vld [vmem:[#allocation19 + $0x690] sm:$0xff] }
 0x970   :  { %6836 = vmatprep.subr.bf16.mxu1 %v8468_v39  ;;  %v8302_v39 = vcombine.high %v4369_v34, %v4381_v35  ;;  %v4549_v23 = vld [vmem:[#allocation19 + $0xbd0] sm:$0xff] }
 0x973   :  { %6837 = vmatpush1.bf16.msra.mxu1 %v8467_v43  ;;  %v8301_v43 = vcombine.low %v4369_v34, %v4381_v35  ;;  %v4226_v35 = vld [vmem:[#allocation19 + $0x1b8] sm:$0xff] }
 0x974   :  { %6847 = vmatprep.subr.bf16.mxu1 %v8110_v44  ;;  %v8326_v44 = vcombine.high %v4393_v40, %v4405_v41 }
 0x976   :  { %6839 = vmatmul.mubr.bf16.vlgmr.msra.gmra.mrb[36].mxu1 %v10256_v17 }
 0x977   :  { %6848 = vmatpush1.bf16.msra.mxu1 %v8109_v18  ;;  %6879 = vmatprep.mubr.bf16.mxu1 %v10254_v12  ;;  %v8325_v18 = vcombine.low %v4393_v40, %v4405_v41  ;;  %v4250_v41 = vld [vmem:[#allocation19 + $0x278] sm:$0xff] }
 0x978   :  { %6849 = vmatprep.subr.bf16.mxu1 %v8134_v57 }
 0x97b   :  { %6850 = vmatpush1.bf16.msra.mxu1 %v8133_v30 }
 0x97c   :  { %6851 = vmatprep.subr.bf16.mxu1 %v8158_v46  ;;  %v4441_v46 = vld [vmem:[#allocation19 + $0x870] sm:$0xff] }
 0x97f   :  { %6852 = vmatpush1.bf16.msra.mxu1 %v8157_v51  ;;  %v8349_v51 = vcombine.low %v4417_v45, %v4429_v5  ;;  %v4274_v5 = vld [vmem:[#allocation19 + $0x338] sm:$0xff] }
 0x980   :  { %6853 = vmatprep.subr.bf16.mxu1 %v8182_v52  ;;  %v8374_v52 = vcombine.high %v4441_v46, %v4453_v47 }
 0x983   :  { %6854 = vmatpush1.bf16.msra.mxu1 %v8181_v1  ;;  %v8373_v1 = vcombine.low %v4441_v46, %v4453_v47 }
 0x984   :  { %6855 = vmatprep.subr.bf16.mxu1 %v8206_v2  ;;  %v8398_v2 = vcombine.high %v4465_v60, %v4477_v62 }
 0x987   :  { %6856 = vmatpush1.bf16.msra.mxu1 %v8205_v7  ;;  %v8397_v7 = vcombine.low %v4465_v60, %v4477_v62  ;;  %v4592_v60 = vrot.slane %v10274_v9, %v10307_v61 }
 0x988   :  { %6857 = vmatprep.subr.bf16.mxu1 %v8230_v49  ;;  %v8422_v49 = vcombine.high %v4489_v3, %v4501_v4 }
 0x989   :  { %v6717_v0 = vpop.f32.mrb[24].mxu1 }
 0x98a   :  { %v6718_v38 = vadd.f32 %v6717_v0, %v4580_v19  ;;  %v6719_v14 = vpop.f32.mrb[25].mxu1  ;;  %v4525_v19 = vld [vmem:[#allocation19 + $0xb10] sm:$0xff] }
 0x98b   :  { %v6720_v24 = vadd.f32 %v6719_v14, %v4584_v20  ;;  %v6721_v27 = vpop.f32.mrb[26].mxu1  ;;  %6858 = vmatpush1.bf16.msra.mxu1 %v8229_v21  ;;  %v8446_v0 = vcombine.high %v4513_v15, %v4525_v19  ;;  %v8470_v14 = vcombine.high %v4537_v22, %v4549_v23 }
 0x98c   :  { %v8485_v10 = vmul.f32 -1.442695, %v6718_v38  ;;  %v6722_v32 = vpop.f32.mrb[27].mxu1  ;;  %6859 = vmatprep.subr.bf16.mxu1 %v8254_v63  ;;  %v8421_v63 = vcombine.low %v4489_v3, %v4501_v4  ;;  %v8445_v38 = vcombine.low %v4513_v15, %v4525_v19  ;;  %v4190_v27 = vld [vmem:[#allocation19 + $0x98] sm:$0xff] }
 0x98d   :  { %v8486_v11 = vmul.f32 -1.442695, %v6720_v24  ;;  %v4178_v24 = vld [vmem:[#allocation19 + $0x38] sm:$0xff] }
 0x98e   :  { %9370 = vpow2.f32 %v8485_v10  ;;  %v8112_v10 = vcombine.high %v4178_v24, %v4190_v27  ;;  %v4202_v32 = vld [vmem:[#allocation19 + $0xf8] sm:$0xff] }
 0x98f   :  { %9372 = vpow2.f32 %v8486_v11  ;;  %6860 = vmatpush1.bf16.msra.mxu1 %v8253_v29  ;;  %v8469_v29 = vcombine.low %v4537_v22, %v4549_v23  ;;  %v8111_v11 = vcombine.low %v4178_v24, %v4190_v27  ;;  %v4346_v3 = vld [vmem:[#allocation19 + $0x578] sm:$0xff] }
 0x990   :  { %6861 = vmatprep.subr.bf16.mxu1 %v8278_v33  ;;  %v4214_v33 = vld [vmem:[#allocation19 + $0x158] sm:$0xff] }
 0x991   :  { %v8136_v34 = vcombine.high %v4202_v32, %v4214_v33  ;;  %v4358_v4 = vld [vmem:[#allocation19 + $0x5d8] sm:$0xff] }
 0x992   :  { %v8280_v23 = vcombine.high %v4346_v3, %v4358_v4  ;;  %v4382_v24 = vld [vmem:[#allocation19 + $0x698] sm:$0xff] }
 0x993   :  { %6862 = vmatpush1.bf16.msra.mxu1 %v8277_v36  ;;  %v4238_v36 = vld [vmem:[#allocation19 + $0x218] sm:$0xff] }
 0x994   :  { %6863 = vmatprep.subr.bf16.mxu1 %v8302_v39  ;;  %v8135_v39 = vcombine.low %v4202_v32, %v4214_v33  ;;  %v8160_v40 = vcombine.high %v4226_v35, %v4238_v36 }
 0x997   :  { %6864 = vmatpush1.bf16.msra.mxu1 %v8301_v43  ;;  %v4262_v43 = vld [vmem:[#allocation19 + $0x2d8] sm:$0xff] }
 0x998   :  { %v9371_v57 = vpop.eup %9370  ;;  %6865 = vmatprep.subr.bf16.mxu1 %v8326_v44  ;;  %v8159_v44 = vcombine.low %v4226_v35, %v4238_v36  ;;  %v8184_v45 = vcombine.high %v4250_v41, %v4262_v43 }
 0x999   :  { %v9373_v26 = vpop.eup %9372  ;;  %v7169_v30 = vadd.f32 1.0, %v9371_v57  ;;  %v8183_v57 = vcombine.low %v4250_v41, %v4262_v43  ;;  %v4442_v43 = vld [vmem:[#allocation19 + $0x878] sm:$0xff] }
 0x99a   :  { %v7170_v50 = vadd.f32 1.0, %v9373_v26  ;;  %v4298_v26 = vld [vmem:[#allocation19 + $0x3f8] sm:$0xff] }
 0x99b   :  { %9374 = vrcp.f32 %v7169_v30  ;;  %6866 = vmatpush1.bf16.msra.mxu1 %v8325_v18  ;;  %v4286_v18 = vld [vmem:[#allocation19 + $0x398] sm:$0xff] }
 0x99c   :  { %9376 = vrcp.f32 %v7170_v50  ;;  %6867 = vmatprep.subr.bf16.mxu1 %v8350_v25  ;;  %v8208_v25 = vcombine.high %v4274_v5, %v4286_v18  ;;  %v4310_v30 = vld [vmem:[#allocation19 + $0x458] sm:$0xff]  ;;  %v8207_v46 = vcombine.low %v4274_v5, %v4286_v18 }
 0x99d   :  { %v8232_v47 = vcombine.high %v4298_v26, %v4310_v30  ;;  %v4322_v50 = vld [vmem:[#allocation19 + $0x4b8] sm:$0xff]  ;;  %v8231_v62 = vcombine.low %v4298_v26, %v4310_v30 }
 0x99f   :  { %6868 = vmatpush1.bf16.msra.mxu1 %v8349_v51  ;;  %v4334_v51 = vld [vmem:[#allocation19 + $0x518] sm:$0xff] }
 0x9a0   :  { %6869 = vmatprep.subr.bf16.mxu1 %v8374_v52  ;;  %v4588_v52 = vrot.slane %v10274_v9, %v10304_v58  ;;  %v8279_v9 = vcombine.low %v4346_v3, %v4358_v4 }
 0x9a3   :  { %6870 = vmatpush1.bf16.msra.mxu1 %v8373_v1  ;;  %v8256_v1 = vcombine.high %v4322_v50, %v4334_v51 }
 0x9a4   :  { %6871 = vmatprep.subr.bf16.mxu1 %v8398_v2 }
 0x9a5   :  { %v10346_v8 = vpop.eup %9374 }
 0x9a6   :  { %v10348_v20 = vpop.eup %9376 }
 0x9a7   :  { %v7297_v21 = vcombine.low %v10346_v8, %v10348_v20  ;;  %6872 = vmatpush1.bf16.msra.mxu1 %v8397_v7  ;;  %v4203_v20 = vld [vmem:[#allocation19 + $0x100] sm:$0xff] }
 0x9a8   :  { %6873 = vmatprep.subr.bf16.mxu1 %v8422_v49 }
 0x9ab   :  { %6874 = vmatpush1.bf16.msra.mxu1 %v8421_v63  ;;  %v8255_v63 = vcombine.low %v4322_v50, %v4334_v51 }
 0x9ac   :  { %6875 = vmatprep.subr.bf16.mxu1 %v8446_v0 }
 0x9af   :  { %6876 = vmatpush1.bf16.msra.mxu1 %v8445_v38 }
 0x9b0   :  { %6877 = vmatprep.subr.bf16.mxu1 %v8470_v14  ;;  %v4370_v14 = vld [vmem:[#allocation19 + $0x638] sm:$0xff] }
 0x9b1   :  { %v8304_v27 = vcombine.high %v4370_v14, %v4382_v24  ;;  %v8303_v32 = vcombine.low %v4370_v14, %v4382_v24 }
 0x9b3   :  { %6878 = vmatpush1.bf16.msra.mxu1 %v8469_v29  ;;  %v4394_v29 = vld [vmem:[#allocation19 + $0x6f8] sm:$0xff] }
 0x9b4   :  { %6888 = vmatprep.subr.bf16.mxu1 %v8112_v10  ;;  %v4406_v10 = vld [vmem:[#allocation19 + $0x758] sm:$0xff] }
 0x9b5   :  { %v8328_v33 = vcombine.high %v4394_v29, %v4406_v10  ;;  %v8327_v35 = vcombine.low %v4394_v29, %v4406_v10  ;;  %v4239_v29 = vld [vmem:[#allocation19 + $0x220] sm:$0xff] }
 0x9b6   :  { %6880 = vmatmul.mubr.bf16.vlgmr.msra.gmra.mrb[40].mxu1 %v10256_v17 }
 0x9b7   :  { %6889 = vmatpush1.bf16.msra.mxu1 %v8111_v11  ;;  %6920 = vmatprep.mubr.bf16.mxu1 %v10254_v12  ;;  %v4418_v11 = vld [vmem:[#allocation19 + $0x7b8] sm:$0xff] }
 0x9b8   :  { %6890 = vmatprep.subr.bf16.mxu1 %v8136_v34  ;;  %v4430_v34 = vld [vmem:[#allocation19 + $0x818] sm:$0xff] }
 0x9b9   :  { %v8351_v5 = vcombine.low %v4418_v11, %v4430_v34 }
 0x9bb   :  { %6891 = vmatpush1.bf16.msra.mxu1 %v8135_v39  ;;  %v8352_v39 = vcombine.high %v4418_v11, %v4430_v34  ;;  %v4263_v11 = vld [vmem:[#allocation19 + $0x2e0] sm:$0xff] }
 0x9bc   :  { %6892 = vmatprep.subr.bf16.mxu1 %v8160_v40 }
 0x9bf   :  { %6893 = vmatpush1.bf16.msra.mxu1 %v8159_v44  ;;  %v4454_v44 = vld [vmem:[#allocation19 + $0x8d8] sm:$0xff] }
 0x9c0   :  { %6894 = vmatprep.subr.bf16.mxu1 %v8184_v45  ;;  %v8376_v18 = vcombine.high %v4442_v43, %v4454_v44  ;;  %v8375_v26 = vcombine.low %v4442_v43, %v4454_v44  ;;  %v4299_v43 = vld [vmem:[#allocation19 + $0x400] sm:$0xff] }
 0x9c1   :  { %v4311_v44 = vld [vmem:[#allocation19 + $0x460] sm:$0xff] }
 0x9c3   :  { %6895 = vmatpush1.bf16.msra.mxu1 %v8183_v57  ;;  %v4466_v57 = vld [vmem:[#allocation19 + $0x938] sm:$0xff] }
 0x9c4   :  { %6896 = vmatprep.subr.bf16.mxu1 %v8208_v25  ;;  %v4478_v25 = vld [vmem:[#allocation19 + $0x998] sm:$0xff] }
 0x9c5   :  { %v8400_v30 = vcombine.high %v4466_v57, %v4478_v25  ;;  %v8399_v50 = vcombine.low %v4466_v57, %v4478_v25  ;;  %v4323_v57 = vld [vmem:[#allocation19 + $0x4c0] sm:$0xff] }
 0x9c6   :  { %v4335_v25 = vld [vmem:[#allocation19 + $0x520] sm:$0xff] }
 0x9c7   :  { %6897 = vmatpush1.bf16.msra.mxu1 %v8207_v46  ;;  %v4490_v46 = vld [vmem:[#allocation19 + $0x9f8] sm:$0xff] }
 0x9c8   :  { %6898 = vmatprep.subr.bf16.mxu1 %v8232_v47  ;;  %v4502_v47 = vld [vmem:[#allocation19 + $0xa58] sm:$0xff] }
 0x9c9   :  { %v6758_v2 = vpop.f32.mrb[28].mxu1  ;;  %v8424_v51 = vcombine.high %v4490_v46, %v4502_v47  ;;  %v8423_v3 = vcombine.low %v4490_v46, %v4502_v47  ;;  %v8233_v46 = vcombine.low %v4299_v43, %v4311_v44  ;;  %v8258_v47 = vcombine.high %v4323_v57, %v4335_v25 }
 0x9ca   :  { %v6759_v7 = vadd.f32 %v6758_v2, %v4588_v52  ;;  %v6760_v49 = vpop.f32.mrb[29].mxu1 }
 0x9cb   :  { %v6761_v15 = vadd.f32 %v6760_v49, %v4592_v60  ;;  %v6762_v19 = vpop.f32.mrb[30].mxu1  ;;  %6899 = vmatpush1.bf16.msra.mxu1 %v8231_v62  ;;  %v4514_v60 = vld [vmem:[#allocation19 + $0xab8] sm:$0xff] }
 0x9cc   :  { %v8487_v0 = vmul.f32 -1.442695, %v6759_v7  ;;  %v6763_v22 = vpop.f32.mrb[31].mxu1  ;;  %6900 = vmatprep.subr.bf16.mxu1 %v8256_v1  ;;  %v4526_v62 = vld [vmem:[#allocation19 + $0xb18] sm:$0xff]  ;;  %v7307_v7 = vrot.slane %v7297_v21, %v10320_v16  ;;  %v4215_v21 = vld [vmem:[#allocation19 + $0x160] sm:$0xff] }
 0x9cd   :  { %v8488_v38 = vmul.f32 -1.442695, %v6761_v15  ;;  %v8448_v4 = vcombine.high %v4514_v60, %v4526_v62  ;;  %v4538_v15 = vld [vmem:[#allocation19 + $0xb78] sm:$0xff]  ;;  %v8137_v10 = vcombine.low %v4203_v20, %v4215_v21 }
 0x9ce   :  { %9378 = vpow2.f32 %v8487_v0  ;;  %v4550_v19 = vld [vmem:[#allocation19 + $0xbd8] sm:$0xff]  ;;  %v8447_v0 = vcombine.low %v4514_v60, %v4526_v62 }
 0x9cf   :  { %9380 = vpow2.f32 %v8488_v38  ;;  %6901 = vmatpush1.bf16.msra.mxu1 %v8255_v63  ;;  %v8472_v22 = vcombine.high %v4538_v15, %v4550_v19  ;;  %v4191_v38 = vld [vmem:[#allocation19 + $0xa0] sm:$0xff]  ;;  %v8471_v14 = vcombine.low %v4538_v15, %v4550_v19 }
 0x9d0   :  { %6902 = vmatprep.subr.bf16.mxu1 %v8280_v23  ;;  %v4179_v23 = vld [vmem:[#allocation19 + $0x40] sm:$0xff] }
 0x9d1   :  { %v8114_v8 = vcombine.high %v4179_v23, %v4191_v38  ;;  %v8113_v24 = vcombine.low %v4179_v23, %v4191_v38  ;;  %v4371_v19 = vld [vmem:[#allocation19 + $0x640] sm:$0xff] }
 0x9d2   :  { %v4395_v23 = vld [vmem:[#allocation19 + $0x700] sm:$0xff] }
 0x9d3   :  { %6903 = vmatpush1.bf16.msra.mxu1 %v8279_v9  ;;  %v8138_v9 = vcombine.high %v4203_v20, %v4215_v21  ;;  %v4407_v38 = vld [vmem:[#allocation19 + $0x760] sm:$0xff] }
 0x9d4   :  { %6904 = vmatprep.subr.bf16.mxu1 %v8304_v27  ;;  %v4227_v27 = vld [vmem:[#allocation19 + $0x1c0] sm:$0xff] }
 0x9d5   :  { %v8161_v34 = vcombine.low %v4227_v27, %v4239_v29  ;;  %v4419_v20 = vld [vmem:[#allocation19 + $0x7c0] sm:$0xff] }
 0x9d6   :  { %v4431_v21 = vld [vmem:[#allocation19 + $0x820] sm:$0xff] }
 0x9d7   :  { %6905 = vmatpush1.bf16.msra.mxu1 %v8303_v32  ;;  %v8162_v32 = vcombine.high %v4227_v27, %v4239_v29  ;;  %v8354_v27 = vcombine.high %v4419_v20, %v4431_v21 }
 0x9d8   :  { %v9379_v36 = vpop.eup %9378  ;;  %6906 = vmatprep.subr.bf16.mxu1 %v8328_v33  ;;  %v4251_v33 = vld [vmem:[#allocation19 + $0x280] sm:$0xff] }
 0x9d9   :  { %v9381_v40 = vpop.eup %9380  ;;  %v7171_v41 = vadd.f32 1.0, %v9379_v36  ;;  %v4275_v36 = vld [vmem:[#allocation19 + $0x340] sm:$0xff] }
 0x9da   :  { %v7172_v45 = vadd.f32 1.0, %v9381_v40  ;;  %v8185_v40 = vcombine.low %v4251_v33, %v4263_v11 }
 0x9db   :  { %9382 = vrcp.f32 %v7171_v41  ;;  %6907 = vmatpush1.bf16.msra.mxu1 %v8327_v35  ;;  %v8186_v35 = vcombine.high %v4251_v33, %v4263_v11  ;;  %v4455_v33 = vld [vmem:[#allocation19 + $0x8e0] sm:$0xff] }
 0x9dc   :  { %9384 = vrcp.f32 %v7172_v45  ;;  %6908 = vmatprep.subr.bf16.mxu1 %v8352_v39  ;;  %v4287_v39 = vld [vmem:[#allocation19 + $0x3a0] sm:$0xff] }
 0x9dd   :  { %v8210_v41 = vcombine.high %v4275_v36, %v4287_v39  ;;  %v8209_v45 = vcombine.low %v4275_v36, %v4287_v39  ;;  %v4467_v36 = vld [vmem:[#allocation19 + $0x940] sm:$0xff] }
 0x9de   :  { %v4479_v39 = vld [vmem:[#allocation19 + $0x9a0] sm:$0xff] }
 0x9df   :  { %6909 = vmatpush1.bf16.msra.mxu1 %v8351_v5  ;;  %v10368_v5 = vld [vmem:[#allocation20 + $0x8] sm:$0xff] }
 0x9e0   :  { %6910 = vmatprep.subr.bf16.mxu1 %v8376_v18  ;;  %v8234_v18 = vcombine.high %v4299_v43, %v4311_v44  ;;  %v4491_v43 = vld [vmem:[#allocation19 + $0xa00] sm:$0xff] }
 0x9e1   :  { %v4503_v44 = vld [vmem:[#allocation19 + $0xa60] sm:$0xff] }
 0x9e3   :  { %6911 = vmatpush1.bf16.msra.mxu1 %v8375_v26  ;;  %v4596_v26 = vrot.slane %v10368_v5, %v10225_v54 }
 0x9e4   :  { %6912 = vmatprep.subr.bf16.mxu1 %v8400_v30  ;;  %v4600_v30 = vrot.slane %v10368_v5, %v10228_v56 }
 0x9e5   :  { %v9383_v52 = vpop.eup %9382 }
 0x9e6   :  { %v9385_v1 = vpop.eup %9384 }
 0x9e7   :  { %v7299_v2 = vcombine.low %v9383_v52, %v9385_v1  ;;  %6913 = vmatpush1.bf16.msra.mxu1 %v8399_v50  ;;  %v4359_v52 = vld [vmem:[#allocation19 + $0x5e0] sm:$0xff] }
 0x9e8   :  { %6914 = vmatprep.subr.bf16.mxu1 %v8424_v51  ;;  %v4347_v51 = vld [vmem:[#allocation19 + $0x580] sm:$0xff] }
 0x9e9   :  { %v7321_v49 = vrot.slane %v7299_v2, %v10320_v16 }
 0x9eb   :  { %v7329_v63 = vcombine.low %v7307_v7, %v7321_v49  ;;  %6915 = vmatpush1.bf16.msra.mxu1 %v8423_v3  ;;  %v8257_v3 = vcombine.low %v4323_v57, %v4335_v25  ;;  %v8282_v49 = vcombine.high %v4347_v51, %v4359_v52  ;;  %v4515_v25 = vld [vmem:[#allocation19 + $0xac0] sm:$0xff] }
 0x9ec   :  { %6916 = vmatprep.subr.bf16.mxu1 %v8448_v4 }
 0x9ed   :  { %7544 = vst [vmem:[%s10466_s14 + $0x8] sm:$0xff] %v7329_v63  ;;  %v4383_v63 = vld [vmem:[#allocation19 + $0x6a0] sm:$0xff] }
 0x9ef   :  { %6917 = vmatpush1.bf16.msra.mxu1 %v8447_v0  ;;  %v8281_v0 = vcombine.low %v4347_v51, %v4359_v52  ;;  %v4539_v51 = vld [vmem:[#allocation19 + $0xb80] sm:$0xff] }
 0x9f0   :  { %6918 = vmatprep.subr.bf16.mxu1 %v8472_v22  ;;  %v8306_v22 = vcombine.high %v4371_v19, %v4383_v63  ;;  %v4551_v52 = vld [vmem:[#allocation19 + $0xbe0] sm:$0xff] }
 0x9f3   :  { %6919 = vmatpush1.bf16.msra.mxu1 %v8471_v14  ;;  %v8305_v14 = vcombine.low %v4371_v19, %v4383_v63  ;;  %v4229_v63 = vld [vmem:[#allocation19 + $0x1d0] sm:$0xff] }
 0x9f4   :  { %6929 = vmatprep.subr.bf16.mxu1 %v8114_v8  ;;  %v8330_v8 = vcombine.high %v4395_v23, %v4407_v38 }
 0x9f6   :  { %6921 = vmatmul.mubr.bf16.vlgmr.msra.gmra.mrb[44].mxu1 %v10256_v17 }
 0x9f7   :  { %6930 = vmatpush1.bf16.msra.mxu1 %v8113_v24  ;;  %6961 = vmatprep.mubr.bf16.mxu1 %v10254_v12  ;;  %v8329_v24 = vcombine.low %v4395_v23, %v4407_v38  ;;  %v4253_v38 = vld [vmem:[#allocation19 + $0x290] sm:$0xff] }
 0x9f8   :  { %6931 = vmatprep.subr.bf16.mxu1 %v8138_v9 }
 0x9fb   :  { %6932 = vmatpush1.bf16.msra.mxu1 %v8137_v10 }
 0x9fc   :  { %6933 = vmatprep.subr.bf16.mxu1 %v8162_v32  ;;  %v4443_v32 = vld [vmem:[#allocation19 + $0x880] sm:$0xff] }
 0x9ff   :  { %6934 = vmatpush1.bf16.msra.mxu1 %v8161_v34  ;;  %v8353_v34 = vcombine.low %v4419_v20, %v4431_v21  ;;  %v4277_v21 = vld [vmem:[#allocation19 + $0x350] sm:$0xff] }
 0xa00   :  { %6935 = vmatprep.subr.bf16.mxu1 %v8186_v35  ;;  %v8378_v35 = vcombine.high %v4443_v32, %v4455_v33 }
 0xa03   :  { %6936 = vmatpush1.bf16.msra.mxu1 %v8185_v40  ;;  %v8377_v40 = vcombine.low %v4443_v32, %v4455_v33  ;;  %v4325_v33 = vld [vmem:[#allocation19 + $0x4d0] sm:$0xff] }
 0xa04   :  { %6937 = vmatprep.subr.bf16.mxu1 %v8210_v41  ;;  %v8402_v41 = vcombine.high %v4467_v36, %v4479_v39 }
 0xa07   :  { %6938 = vmatpush1.bf16.msra.mxu1 %v8209_v45  ;;  %v8401_v45 = vcombine.low %v4467_v36, %v4479_v39 }
 0xa08   :  { %6939 = vmatprep.subr.bf16.mxu1 %v8234_v18  ;;  %v8426_v18 = vcombine.high %v4491_v43, %v4503_v44 }
 0xa09   :  { %v6799_v50 = vpop.f32.mrb[32].mxu1 }
 0xa0a   :  { %v6800_v60 = vadd.f32 %v6799_v50, %v4596_v26  ;;  %v6801_v62 = vpop.f32.mrb[33].mxu1  ;;  %v4527_v26 = vld [vmem:[#allocation19 + $0xb20] sm:$0xff] }
 0xa0b   :  { %v6802_v1 = vadd.f32 %v6801_v62, %v4600_v30  ;;  %v6803_v2 = vpop.f32.mrb[34].mxu1  ;;  %6940 = vmatpush1.bf16.msra.mxu1 %v8233_v46  ;;  %v8450_v50 = vcombine.high %v4515_v25, %v4527_v26  ;;  %v8474_v62 = vcombine.high %v4539_v51, %v4551_v52 }
 0xa0c   :  { %v8489_v4 = vmul.f32 -1.442695, %v6800_v60  ;;  %v6804_v7 = vpop.f32.mrb[35].mxu1  ;;  %6941 = vmatprep.subr.bf16.mxu1 %v8258_v47  ;;  %v8425_v47 = vcombine.low %v4491_v43, %v4503_v44  ;;  %v8449_v60 = vcombine.low %v4515_v25, %v4527_v26  ;;  %v4193_v2 = vld [vmem:[#allocation19 + $0xb0] sm:$0xff] }
 0xa0d   :  { %v8490_v15 = vmul.f32 -1.442695, %v6802_v1  ;;  %v4181_v1 = vld [vmem:[#allocation19 + $0x50] sm:$0xff] }
 0xa0e   :  { %9386 = vpow2.f32 %v8489_v4  ;;  %v8118_v4 = vcombine.high %v4181_v1, %v4193_v2  ;;  %v4205_v7 = vld [vmem:[#allocation19 + $0x110] sm:$0xff] }
 0xa0f   :  { %9388 = vpow2.f32 %v8490_v15  ;;  %6942 = vmatpush1.bf16.msra.mxu1 %v8257_v3  ;;  %v8473_v3 = vcombine.low %v4539_v51, %v4551_v52  ;;  %v8117_v15 = vcombine.low %v4181_v1, %v4193_v2  ;;  %v4361_v43 = vld [vmem:[#allocation19 + $0x5f0] sm:$0xff] }
 0xa10   :  { %6943 = vmatprep.subr.bf16.mxu1 %v8282_v49  ;;  %v4217_v49 = vld [vmem:[#allocation19 + $0x170] sm:$0xff] }
 0xa11   :  { %v8142_v19 = vcombine.high %v4205_v7, %v4217_v49  ;;  %v4373_v52 = vld [vmem:[#allocation19 + $0x650] sm:$0xff] }
 0xa12   :  { %v4397_v1 = vld [vmem:[#allocation19 + $0x710] sm:$0xff] }
 0xa13   :  { %6944 = vmatpush1.bf16.msra.mxu1 %v8281_v0  ;;  %v4241_v0 = vld [vmem:[#allocation19 + $0x230] sm:$0xff] }
 0xa14   :  { %6945 = vmatprep.subr.bf16.mxu1 %v8306_v22  ;;  %v8141_v22 = vcombine.low %v4205_v7, %v4217_v49  ;;  %v8166_v23 = vcombine.high %v4229_v63, %v4241_v0  ;;  %v4409_v2 = vld [vmem:[#allocation19 + $0x770] sm:$0xff] }
 0xa15   :  { %v4421_v7 = vld [vmem:[#allocation19 + $0x7d0] sm:$0xff] }
 0xa16   :  { %v4433_v49 = vld [vmem:[#allocation19 + $0x830] sm:$0xff] }
 0xa17   :  { %6946 = vmatpush1.bf16.msra.mxu1 %v8305_v14  ;;  %v4265_v14 = vld [vmem:[#allocation19 + $0x2f0] sm:$0xff] }
 0xa18   :  { %v9387_v9 = vpop.eup %9386  ;;  %6947 = vmatprep.subr.bf16.mxu1 %v8330_v8  ;;  %v8165_v8 = vcombine.low %v4229_v63, %v4241_v0  ;;  %v8190_v20 = vcombine.high %v4253_v38, %v4265_v14  ;;  %v8358_v63 = vcombine.high %v4421_v7, %v4433_v49 }
 0xa19   :  { %v9389_v29 = vpop.eup %9388  ;;  %v7173_v10 = vadd.f32 1.0, %v9387_v9  ;;  %v8189_v9 = vcombine.low %v4253_v38, %v4265_v14  ;;  %v4457_v38 = vld [vmem:[#allocation19 + $0x8f0] sm:$0xff] }
 0xa1a   :  { %v7174_v11 = vadd.f32 1.0, %v9389_v29  ;;  %v4301_v29 = vld [vmem:[#allocation19 + $0x410] sm:$0xff] }
 0xa1b   :  { %9390 = vrcp.f32 %v7173_v10  ;;  %6948 = vmatpush1.bf16.msra.mxu1 %v8329_v24  ;;  %v4289_v24 = vld [vmem:[#allocation19 + $0x3b0] sm:$0xff] }
 0xa1c   :  { %9392 = vrcp.f32 %v7174_v11  ;;  %6949 = vmatprep.subr.bf16.mxu1 %v8354_v27  ;;  %v8214_v27 = vcombine.high %v4277_v21, %v4289_v24  ;;  %v4313_v10 = vld [vmem:[#allocation19 + $0x470] sm:$0xff]  ;;  %v8213_v32 = vcombine.low %v4277_v21, %v4289_v24 }
 0xa1d   :  { %v4337_v11 = vld [vmem:[#allocation19 + $0x530] sm:$0xff]  ;;  %v8237_v36 = vcombine.low %v4301_v29, %v4313_v10 }
 0xa1e   :  { %v8262_v39 = vcombine.high %v4325_v33, %v4337_v11  ;;  %v8261_v26 = vcombine.low %v4325_v33, %v4337_v11  ;;  %v4469_v21 = vld [vmem:[#allocation19 + $0x950] sm:$0xff] }
 0xa1f   :  { %6950 = vmatpush1.bf16.msra.mxu1 %v8353_v34  ;;  %v4604_v34 = vrot.slane %v10368_v5, %v10272_v53  ;;  %v4481_v24 = vld [vmem:[#allocation19 + $0x9b0] sm:$0xff] }
 0xa20   :  { %6951 = vmatprep.subr.bf16.mxu1 %v8378_v35  ;;  %v4608_v35 = vrot.slane %v10368_v5, %v10279_v13  ;;  %v4517_v11 = vld [vmem:[#allocation19 + $0xad0] sm:$0xff] }
 0xa23   :  { %6952 = vmatpush1.bf16.msra.mxu1 %v8377_v40 }
 0xa24   :  { %6953 = vmatprep.subr.bf16.mxu1 %v8402_v41  ;;  %v4349_v41 = vld [vmem:[#allocation19 + $0x590] sm:$0xff] }
 0xa25   :  { %v10374_v57 = vpop.eup %9390  ;;  %v8286_v53 = vcombine.high %v4349_v41, %v4361_v43  ;;  %v8285_v13 = vcombine.low %v4349_v41, %v4361_v43 }
 0xa26   :  { %v10376_v30 = vpop.eup %9392 }
 0xa27   :  { %v7333_v46 = vcombine.low %v10374_v57, %v10376_v30  ;;  %6954 = vmatpush1.bf16.msra.mxu1 %v8401_v45  ;;  %v4612_v57 = vrot.slane %v10368_v5, %v10337_v6  ;;  %v4616_v30 = vrot.slane %v10368_v5, %v10340_v48 }
 0xa28   :  { %6955 = vmatprep.subr.bf16.mxu1 %v8426_v18 }
 0xa29   :  { %v7343_v41 = vrot.slane %v7333_v46, %v10320_v16 }
 0xa2b   :  { %6956 = vmatpush1.bf16.msra.mxu1 %v8425_v47 }
 0xa2c   :  { %6957 = vmatprep.subr.bf16.mxu1 %v8450_v50 }
 0xa2f   :  { %6958 = vmatpush1.bf16.msra.mxu1 %v8449_v60  ;;  %v4385_v60 = vld [vmem:[#allocation19 + $0x6b0] sm:$0xff] }
 0xa30   :  { %6959 = vmatprep.subr.bf16.mxu1 %v8474_v62  ;;  %v8310_v62 = vcombine.high %v4373_v52, %v4385_v60 }
 0xa33   :  { %6960 = vmatpush1.bf16.msra.mxu1 %v8473_v3  ;;  %v8309_v3 = vcombine.low %v4373_v52, %v4385_v60 }
 0xa34   :  { %7011 = vmatprep.subr.bf16.mxu1 %v8118_v4  ;;  %v8334_v4 = vcombine.high %v4397_v1, %v4409_v2 }
 0xa36   :  { %6962 = vmatmul.mubr.bf16.vlgmr.msra.gmra.mrb[48].mxu1 %v10256_v17 }
 0xa37   :  { %7012 = vmatpush1.bf16.msra.mxu1 %v8117_v15  ;;  %7043 = vmatprep.mubr.bf16.mxu1 %v10254_v12  ;;  %v8238_v12 = vcombine.high %v4301_v29, %v4313_v10  ;;  %v8333_v15 = vcombine.low %v4397_v1, %v4409_v2  ;;  %v4493_v29 = vld [vmem:[#allocation19 + $0xa10] sm:$0xff] }
 0xa38   :  { %7013 = vmatprep.subr.bf16.mxu1 %v8142_v19  ;;  %v4505_v10 = vld [vmem:[#allocation19 + $0xa70] sm:$0xff] }
 0xa3b   :  { %7014 = vmatpush1.bf16.msra.mxu1 %v8141_v22 }
 0xa3c   :  { %7015 = vmatprep.subr.bf16.mxu1 %v8166_v23  ;;  %v4445_v23 = vld [vmem:[#allocation19 + $0x890] sm:$0xff] }
 0xa3f   :  { %7016 = vmatpush1.bf16.msra.mxu1 %v8165_v8  ;;  %v8357_v8 = vcombine.low %v4421_v7, %v4433_v49 }
 0xa40   :  { %7017 = vmatprep.subr.bf16.mxu1 %v8190_v20  ;;  %v8382_v20 = vcombine.high %v4445_v23, %v4457_v38 }
 0xa43   :  { %7018 = vmatpush1.bf16.msra.mxu1 %v8189_v9  ;;  %v8381_v9 = vcombine.low %v4445_v23, %v4457_v38 }
 0xa44   :  { %7019 = vmatprep.subr.bf16.mxu1 %v8214_v27  ;;  %v8406_v27 = vcombine.high %v4469_v21, %v4481_v24 }
 0xa47   :  { %7020 = vmatpush1.bf16.msra.mxu1 %v8213_v32  ;;  %v8405_v32 = vcombine.low %v4469_v21, %v4481_v24 }
 0xa48   :  { %7021 = vmatprep.subr.bf16.mxu1 %v8238_v12  ;;  %v8430_v12 = vcombine.high %v4493_v29, %v4505_v10 }
 0xa49   :  { %v6840_v40 = vpop.f32.mrb[36].mxu1 }
 0xa4a   :  { %v6841_v44 = vadd.f32 %v6840_v40, %v4604_v34  ;;  %v6842_v45 = vpop.f32.mrb[37].mxu1  ;;  %v4529_v34 = vld [vmem:[#allocation19 + $0xb30] sm:$0xff] }
 0xa4b   :  { %v6843_v18 = vadd.f32 %v6842_v45, %v4608_v35  ;;  %v6844_v25 = vpop.f32.mrb[38].mxu1  ;;  %7022 = vmatpush1.bf16.msra.mxu1 %v8237_v36  ;;  %v8454_v40 = vcombine.high %v4517_v11, %v4529_v34  ;;  %v4553_v45 = vld [vmem:[#allocation19 + $0xbf0] sm:$0xff] }
 0xa4c   :  { %v8491_v47 = vmul.f32 -1.442695, %v6841_v44  ;;  %v6845_v50 = vpop.f32.mrb[39].mxu1  ;;  %7023 = vmatprep.subr.bf16.mxu1 %v8262_v39  ;;  %v8429_v39 = vcombine.low %v4493_v29, %v4505_v10  ;;  %v4541_v44 = vld [vmem:[#allocation19 + $0xb90] sm:$0xff]  ;;  %v8453_v25 = vcombine.low %v4517_v11, %v4529_v34 }
 0xa4d   :  { %v8492_v51 = vmul.f32 -1.442695, %v6843_v18 }
 0xa4e   :  { %9394 = vpow2.f32 %v8491_v47  ;;  %v8477_v47 = vcombine.low %v4541_v44, %v4553_v45 }
 0xa4f   :  { %9396 = vpow2.f32 %v8492_v51  ;;  %7024 = vmatpush1.bf16.msra.mxu1 %v8261_v26  ;;  %v8478_v26 = vcombine.high %v4541_v44, %v4553_v45 }
 0xa50   :  { %7025 = vmatprep.subr.bf16.mxu1 %v8286_v53 }
 0xa53   :  { %7026 = vmatpush1.bf16.msra.mxu1 %v8285_v13 }
 0xa54   :  { %7027 = vmatprep.subr.bf16.mxu1 %v8310_v62 }
 0xa57   :  { %7028 = vmatpush1.bf16.msra.mxu1 %v8309_v3 }
 0xa58   :  { %v9395_v19 = vpop.eup %9394  ;;  %7029 = vmatprep.subr.bf16.mxu1 %v8334_v4 }
 0xa59   :  { %v9397_v0 = vpop.eup %9396  ;;  %v7175_v22 = vadd.f32 1.0, %v9395_v19  ;;  %v4624_v19 = vrot.slane %v10368_v5, %v10307_v61 }
 0xa5a   :  { %v7176_v14 = vadd.f32 1.0, %v9397_v0 }
 0xa5b   :  { %9398 = vrcp.f32 %v7175_v22  ;;  %7030 = vmatpush1.bf16.msra.mxu1 %v8333_v15  ;;  %v4620_v15 = vrot.slane %v10368_v5, %v10304_v58 }
 0xa5c   :  { %9400 = vrcp.f32 %v7176_v14  ;;  %7031 = vmatprep.subr.bf16.mxu1 %v8358_v63 }
 0xa5f   :  { %7032 = vmatpush1.bf16.msra.mxu1 %v8357_v8 }
 0xa60   :  { %7033 = vmatprep.subr.bf16.mxu1 %v8382_v20 }
 0xa63   :  { %7034 = vmatpush1.bf16.msra.mxu1 %v8381_v9 }
 0xa64   :  { %7035 = vmatprep.subr.bf16.mxu1 %v8406_v27 }
 0xa65   :  { %v9399_v33 = vpop.eup %9398 }
 0xa66   :  { %v9401_v35 = vpop.eup %9400 }
 0xa67   :  { %v7335_v36 = vcombine.low %v9399_v33, %v9401_v35  ;;  %7036 = vmatpush1.bf16.msra.mxu1 %v8405_v32 }
 0xa68   :  { %7037 = vmatprep.subr.bf16.mxu1 %v8430_v12  ;;  %v9434_v12 = vld [vmem:[#allocation20 + $0x10] sm:$0xff] }
 0xa69   :  { %v7357_v43 = vrot.slane %v7335_v36, %v10320_v16  ;;  %v4628_v33 = vrot.slane %v9434_v12, %v10225_v54  ;;  %v4632_v11 = vrot.slane %v9434_v12, %v10228_v56  ;;  %v7429_v56 = vrot.slane %v7407_v42, %v10320_v16 }
 0xa6b   :  { %v7365_v18 = vcombine.low %v7343_v41, %v7357_v43  ;;  %7038 = vmatpush1.bf16.msra.mxu1 %v8429_v39 }
 0xa6c   :  { %7039 = vmatprep.subr.bf16.mxu1 %v8454_v40 }
 0xa6d   :  { %7546 = vst [vmem:[%s10466_s14 + $0x10] sm:$0xff] %v7365_v18 }
 0xa6f   :  { %7040 = vmatpush1.bf16.msra.mxu1 %v8453_v25 }
 0xa70   :  { %7041 = vmatprep.subr.bf16.mxu1 %v8478_v26 }
 0xa73   :  { %7042 = vmatpush1.bf16.msra.mxu1 %v8477_v47 }
 0xa76   :  { %7044 = vmatmul.mubr.bf16.vlgmr.msra.gmra.mrb[52].mxu1 %v10256_v17 }
 0xa89   :  { %v6881_v46 = vpop.f32.mrb[40].mxu1 }
 0xa8a   :  { %v6882_v50 = vadd.f32 %v6881_v46, %v4612_v57  ;;  %v6883_v53 = vpop.f32.mrb[41].mxu1 }
 0xa8b   :  { %v6884_v51 = vadd.f32 %v6883_v53, %v4616_v30  ;;  %v6885_v52 = vpop.f32.mrb[42].mxu1  ;;  %v4648_v53 = vrot.slane %v9434_v12, %v10340_v48  ;;  %v7465_v48 = vrot.slane %v7443_v31, %v10320_v16 }
 0xa8c   :  { %v8493_v60 = vmul.f32 -1.442695, %v6882_v50  ;;  %v6886_v13 = vpop.f32.mrb[43].mxu1  ;;  %v4644_v50 = vrot.slane %v9434_v12, %v10337_v6 }
 0xa8d   :  { %v8494_v62 = vmul.f32 -1.442695, %v6884_v51 }
 0xa8e   :  { %9402 = vpow2.f32 %v8493_v60 }
 0xa8f   :  { %9404 = vpow2.f32 %v8494_v62 }
 0xa98   :  { %v9403_v1 = vpop.eup %9402 }
 0xa99   :  { %v9405_v2 = vpop.eup %9404  ;;  %v7177_v3 = vadd.f32 1.0, %v9403_v1 }
 0xa9a   :  { %v7178_v17 = vadd.f32 1.0, %v9405_v2 }
 0xa9b   :  { %9406 = vrcp.f32 %v7177_v3 }
 0xa9c   :  { %9408 = vrcp.f32 %v7178_v17 }
 0xaa5   :  { %v9407_v4 = vpop.eup %9406 }
 0xaa6   :  { %v9409_v7 = vpop.eup %9408 }
 0xaa7   :  { %v7369_v49 = vcombine.low %v9407_v4, %v9409_v7 }
 0xaa9   :  { %v7379_v61 = vrot.slane %v7369_v49, %v10320_v16 }
 0xac9   :  { %v6922_v63 = vpop.f32.mrb[44].mxu1 }
 0xaca   :  { %v6923_v0 = vadd.f32 %v6922_v63, %v4620_v15  ;;  %v6924_v22 = vpop.f32.mrb[45].mxu1 }
 0xacb   :  { %v6925_v23 = vadd.f32 %v6924_v22, %v4624_v19  ;;  %v6926_v38 = vpop.f32.mrb[46].mxu1 }
 0xacc   :  { %v8495_v14 = vmul.f32 -1.442695, %v6923_v0  ;;  %v6927_v8 = vpop.f32.mrb[47].mxu1 }
 0xacd   :  { %v8496_v20 = vmul.f32 -1.442695, %v6925_v23 }
 0xace   :  { %9410 = vpow2.f32 %v8495_v14 }
 0xacf   :  { %9412 = vpow2.f32 %v8496_v20 }
 0xad8   :  { %v9411_v21 = vpop.eup %9410 }
 0xad9   :  { %v9413_v24 = vpop.eup %9412  ;;  %v7179_v9 = vadd.f32 1.0, %v9411_v21 }
 0xada   :  { %v7180_v27 = vadd.f32 1.0, %v9413_v24 }
 0xadb   :  { %9414 = vrcp.f32 %v7179_v9 }
 0xadc   :  { %9416 = vrcp.f32 %v7180_v27 }
 0xae5   :  { %v9415_v58 = vpop.eup %9414 }
 0xae6   :  { %v9417_v29 = vpop.eup %9416 }
 0xae7   :  { %v7371_v10 = vcombine.low %v9415_v58, %v9417_v29 }
 0xae9   :  { %v7393_v5 = vrot.slane %v7371_v10, %v10320_v16 }
 0xaeb   :  { %v7401_v32 = vcombine.low %v7379_v61, %v7393_v5 }
 0xaed   :  { %7548 = vst [vmem:[%s10466_s14 + $0x18] sm:$0xff] %v7401_v32 }
 0xb09   :  { %v6963_v34 = vpop.f32.mrb[48].mxu1 }
 0xb0a   :  { %v6964_v35 = vadd.f32 %v6963_v34, %v4628_v33  ;;  %v6965_v36 = vpop.f32.mrb[49].mxu1 }
 0xb0b   :  { %v6966_v39 = vadd.f32 %v6965_v36, %v4632_v11  ;;  %v6967_v40 = vpop.f32.mrb[50].mxu1 }
 0xb0c   :  { %v8497_v41 = vmul.f32 -1.442695, %v6964_v35  ;;  %v6968_v43 = vpop.f32.mrb[51].mxu1 }
 0xb0d   :  { %v8498_v44 = vmul.f32 -1.442695, %v6966_v39 }
 0xb0e   :  { %9418 = vpow2.f32 %v8497_v41 }
 0xb0f   :  { %9420 = vpow2.f32 %v8498_v44 }
 0xb18   :  { %v9419_v45 = vpop.eup %9418 }
 0xb19   :  { %v9421_v18 = vpop.eup %9420  ;;  %v7181_v25 = vadd.f32 1.0, %v9419_v45 }
 0xb1a   :  { %v7182_v26 = vadd.f32 1.0, %v9421_v18 }
 0xb1b   :  { %9422 = vrcp.f32 %v7181_v25 }
 0xb1c   :  { %9424 = vrcp.f32 %v7182_v26 }
 0xb25   :  { %v9423_v47 = vpop.eup %9422 }
 0xb26   :  { %v9425_v54 = vpop.eup %9424 }
 0xb27   :  { %v7405_v57 = vcombine.low %v9423_v47, %v9425_v54 }
 0xb29   :  { %v7415_v30 = vrot.slane %v7405_v57, %v10320_v16 }
 0xb2b   :  { %v7437_v46 = vcombine.low %v7415_v30, %v7429_v56 }
 0xb2d   :  { %7550 = vst [vmem:[%s10466_s14 + $0x20] sm:$0xff] %v7437_v46 }
 0xb49   :  { %v7045_v51 = vpop.f32.mrb[52].mxu1 }
 0xb4a   :  { %v7046_v52 = vadd.f32 %v7045_v51, %v4644_v50  ;;  %v7047_v60 = vpop.f32.mrb[53].mxu1 }
 0xb4b   :  { %v7048_v13 = vadd.f32 %v7047_v60, %v4648_v53  ;;  %v7049_v62 = vpop.f32.mrb[54].mxu1 }
 0xb4c   :  { %v8501_v1 = vmul.f32 -1.442695, %v7046_v52  ;;  %v7050_v2 = vpop.f32.mrb[55].mxu1 }
 0xb4d   :  { %v8502_v37 = vmul.f32 -1.442695, %v7048_v13 }
 0xb4e   :  { %9426 = vpow2.f32 %v8501_v1 }
 0xb4f   :  { %9428 = vpow2.f32 %v8502_v37 }
 0xb58   :  { %v9427_v55 = vpop.eup %9426 }
 0xb59   :  { %v9429_v42 = vpop.eup %9428  ;;  %v7185_v3 = vadd.f32 1.0, %v9427_v55 }
 0xb5a   :  { %v7186_v17 = vadd.f32 1.0, %v9429_v42 }
 0xb5b   :  { %9430 = vrcp.f32 %v7185_v3 }
 0xb5c   :  { %9432 = vrcp.f32 %v7186_v17 }
 0xb65   :  { %v9431_v4 = vpop.eup %9430 }
 0xb66   :  { %v9433_v6 = vpop.eup %9432 }
 0xb67   :  { %v7441_v7 = vcombine.low %v9431_v4, %v9433_v6 }
 0xb69   :  { %v7451_v49 = vrot.slane %v7441_v7, %v10320_v16 }
 0xb6b   :  { %v7473_v15 = vcombine.low %v7451_v49, %v7465_v48 }
 0xb6d   :  { %7552 = vst [vmem:[%s10466_s14 + $0x28] sm:$0xff] %v7473_v15 }
 0xb6e   :  { %7560 = vsyncadd [#allocation4], 96  ;;  %s9780_s10 = smov [#allocation23]  }
 0xb6f   :  { %s7561_s11 = sshll.u32 %s9780_s10, 4  ;;  %s7562_s11 = int_to_ptr.vmem [resolvable:$true] %s7561_s11 }
 0xb70   :  { %s9699_s25 = scalar_lea.vmem %s7562_s11, 32  ;;  %s9703_s20 = scalar_lea.vmem %s7562_s11, 128 }
 0xb71   :  { %p9700_p12 = scmp.ne.s32.totalorder %s7562_s11, %s9699_s25  ;;  %p9704_p13 = scmp.lt.s32.totalorder %s7562_s11, %s7562_s11 }
 0xb72   :  { %p9705_p0 = scmp.lt.s32.totalorder %s9703_s20, %s9699_s25 }
 0xb74   :  { %p9706_p1 = por %p9705_p0, %p9704_p13 }
 0xb76   :  { %p9707_p2 = pnand %p9706_p1, %p9700_p12 }
 0xb78   :  { %9710 = shalt.err (!%p9707_p2)
}
 0xb79   :  { %s9711_s28 = scalar_lea.hbm %s10467_s15, 32 }
 0xb7a   :  { %p9712_p3 = scmp.ne.s32.totalorder %s10467_s15, %s9711_s28  ;;  %p9715_p4 = scmp.lt.u32.totalorder %s9711_s28, %s10467_s15 }
 0xb7c   :  { %p9717_p5 = pnand %p9715_p4, %p9712_p3 }
 0xb7e   :  { %9720 = shalt.err (!%p9717_p5)
}
 0xb7f   :  { %s9781_s4 = smov 32   ;;  %s9782_s3 = smov 2  }
 0xb80   :  { %7567 = dma.vmem_to_hbm [thread:$0]  %s7562_s11, 32, %s10467_s15, [#allocation4], %s9781_s4, %s9781_s4, %s9782_s3  }
 0xb81   :  { %7572 = vsyncadd [#allocation25], 96  ;;  %s9783_s12 = smov [#allocation24]  }
 0xb82   :  { %s7573_s17 = sshll.u32 %s9783_s12, 4  ;;  %s7574_s17 = int_to_ptr.vmem [resolvable:$true] %s7573_s17 }
 0xb83   :  { %s9721_s1 = scalar_lea.vmem %s7574_s17, 32  ;;  %s9725_s13 = scalar_lea.vmem %s7574_s17, 128 }
 0xb84   :  { %p9722_p6 = scmp.ne.s32.totalorder %s7574_s17, %s9721_s1  ;;  %p9726_p7 = scmp.lt.s32.totalorder %s7574_s17, %s7574_s17 }
 0xb85   :  { %p9727_p8 = scmp.lt.s32.totalorder %s9725_s13, %s9721_s1 }
 0xb87   :  { %p9728_p9 = por %p9727_p8, %p9726_p7 }
 0xb89   :  { %p9729_p10 = pnand %p9728_p9, %p9722_p6 }
 0xb8b   :  { %9732 = shalt.err (!%p9729_p10)
}
 0xb8c   :  { %s9733_s7 = scalar_lea.hbm %s10468_s16, 32 }
 0xb8d   :  { %p9734_p11 = scmp.ne.s32.totalorder %s10468_s16, %s9733_s7  ;;  %p9737_p12 = scmp.lt.u32.totalorder %s9733_s7, %s10468_s16 }
 0xb8f   :  { %p9739_p13 = pnand %p9737_p12, %p9734_p11 }
 0xb91   :  { %9742 = shalt.err (!%p9739_p13)
}
 0xb92   :  { %7579 = dma.vmem_to_hbm [thread:$0]  %s7574_s17, 32, %s10468_s16, [#allocation25], %s9781_s4, %s9781_s4, %s9782_s3  }
 0xb93   :  { %9757 = dma.done.wait [#allocation4], 128  }
 0xb94   :  { %9758 = vsyncadd [#allocation4], 4294967168 }
 0xb95   :  { %9759 = dma.done.wait [#allocation25], 128  }
 0xb96   :  { %9760 = vsyncadd [#allocation25], 4294967168 }
 0xb97   :  { %7588 = vsyncpa [#allocation3], 1 }
 0xb98   :  { %7589 = vsyncpa [#allocation6], 1 }
 0xb99   :  { %7590 = vsyncpa [#allocation9], 1 }
 0xb9a   :  { %7591 = vsyncpa [#allocation12], 1 }
 0xb9b   :  { %7592 = vsyncpa [#allocation15], 1 }
 0xb9c   :  { %7593 = vsyncpa [#allocation18], 1 }
 0xb9d   :  { %7594 = vsyncpa [#allocation21], 1 }
 0xb9e   :  { %7595 = vsyncpa [#allocation4], 1 }
 0xb9f   :  { %7596 = vsyncpa [#allocation25], 1 }

</bundles_post_ra>
